<compile_context>
chip_gen: v5e
topology: v5e:2x2
jax: 0.10.0
libtpu: 0.0.40
codegen_flags: <defaults>
</compile_context>

<pallas_src>
import math
import functools

import jax
import jax.numpy as jnp
from jax.experimental import pallas as pl
from jax.experimental.pallas import tpu as pltpu

LN_EPS = 1e-5
NEG_MASK = -1e30  # finite "-inf": exp() underflows to 0, no NaN even for fully-masked rows


# ---------------------------------------------------------------------------
# In-kernel helpers (trace-time functions used inside the Pallas kernel)
# ---------------------------------------------------------------------------
def _layernorm(x, g, b):
    m = jnp.mean(x, axis=-1, keepdims=True)
    v = jnp.mean(jnp.square(x - m), axis=-1, keepdims=True)
    return (x - m) * jax.lax.rsqrt(v + LN_EPS) * g + b


def _gelu(x):
    # tanh-approx GELU: transcendental goes to the EUP slot (idle next to the MXU).
    # TODO(synk): PyTorch F.gelu default is the exact erf GELU; tanh approx deviates ~1e-3.
    c = math.sqrt(2.0 / math.pi)
    return 0.5 * x * (1.0 + jnp.tanh(c * (x + 0.044715 * x * x * x)))


def _attention(q3, k3, v3, mask, nhead):
    """Multi-head scaled-dot-product attention core.

    q3: (B, Tq, D) f32 projected queries; k3/v3: (B, Tk, D) f32 projected keys/values.
    mask: (B, Tq, Tk) additive f32 or None.
    Returns the lane-dense concatenated head output, shape (B*Tq, D) f32 (in registers,
    no VMEM scratch / masked partial stores).
    """
    B, Tq, D = q3.shape
    hd = D // nhead
    scale = 1.0 / math.sqrt(hd)
    outs = []
    for h in range(nhead):  # static unroll; per-head outputs stay in registers
        sl = slice(h * hd, (h + 1) * hd)
        qh = q3[..., sl].astype(jnp.bfloat16)
        kh = k3[..., sl].astype(jnp.bfloat16)
        vh = v3[..., sl].astype(jnp.bfloat16)
        # Batched over B, contraction on the last dim -> no materialized transpose.
        s = jnp.einsum('bqd,bkd->bqk', qh, kh,
                       preferred_element_type=jnp.float32) * scale
        if mask is not None:
            s = s + mask
        m = jnp.max(s, axis=-1, keepdims=True)
        e = jnp.exp(s - m)
        p = e * pl.reciprocal(jnp.sum(e, axis=-1, keepdims=True), approx=True)
        outs.append(jnp.einsum('bqk,bkd->bqd', p.astype(jnp.bfloat16), vh,
                               preferred_element_type=jnp.float32))
    o = jnp.concatenate(outs, axis=-1)            # (B, Tq, D) lane-dense
    return o.reshape(B * Tq, D)


def _stream(tgt2, q_in_bf, k_self, v_self, k_mem, v_mem, mask,
            sa_w_ref, sa_b_ref, sa_wo_ref, sa_bo_ref,
            ca_w_ref, ca_b_ref, ca_wo_ref, ca_bo_ref,
            n1_g_ref, n1_b_ref, n2_g_ref, n2_b_ref,
            l1_w_ref, l1_b_ref, l2_w_ref, l2_b_ref,
            *, nhead, B, T, D):
    """One forward_stream. Self/cross K/V are precomputed & shared across streams.
    Weights are loaded from refs at point of use (lets Mosaic schedule loads)."""
    # --- self-attention (K/V of norm_c shared; Q projected here) ---
    q = (jnp.dot(q_in_bf, sa_w_ref[:, :D], preferred_element_type=jnp.float32)
         + sa_b_ref[:, :D])
    att = _attention(q.reshape(B, T, D), k_self, v_self, mask, nhead)
    tgt2 = tgt2 + (jnp.dot(att.astype(jnp.bfloat16), sa_wo_ref[...],
                           preferred_element_type=jnp.float32) + sa_bo_ref[...])
    # --- cross-attention over memory (K/V shared; no mask; pre-LN) ---
    can = _layernorm(tgt2, n1_g_ref[...], n1_b_ref[...])
    q = (jnp.dot(can.astype(jnp.bfloat16), ca_w_ref[:, :D],
                 preferred_element_type=jnp.float32) + ca_b_ref[:, :D])
    att = _attention(q.reshape(B, T, D), k_mem, v_mem, None, nhead)
    tgt2 = tgt2 + (jnp.dot(att.astype(jnp.bfloat16), ca_wo_ref[...],
                           preferred_element_type=jnp.float32) + ca_bo_ref[...])
    # --- pre-LN GELU MLP ---
    hn = _layernorm(tgt2, n2_g_ref[...], n2_b_ref[...])
    h = _gelu(jnp.dot(hn.astype(jnp.bfloat16), l1_w_ref[...],
                      preferred_element_type=jnp.float32) + l1_b_ref[...])
    ff = (jnp.dot(h.astype(jnp.bfloat16), l2_w_ref[...],
                  preferred_element_type=jnp.float32) + l2_b_ref[...])
    return tgt2 + ff


# ---------------------------------------------------------------------------
# Fused whole-decoder kernel: grid=(num_layers,), layer axis "arbitrary"
# ---------------------------------------------------------------------------
def _decoder_kernel(nhead, num_layers,
                    q_ref, c_ref, mem_ref, qmask_ref, cmask_ref,
                    sa_w_ref, sa_b_ref, sa_wo_ref, sa_bo_ref,
                    ca_w_ref, ca_b_ref, ca_wo_ref, ca_bo_ref,
                    nq_g_ref, nq_b_ref, nc_g_ref, nc_b_ref,
                    n1_g_ref, n1_b_ref, n2_g_ref, n2_b_ref,
                    l1_w_ref, l1_b_ref, l2_w_ref, l2_b_ref,
                    fin_g_ref, fin_b_ref,
                    q_out_ref,
                    c_scr):
    layer = pl.program_id(0)
    B, T, D = q_ref.shape
    S = mem_ref.shape[1]

    # Layer 0: pull HBM activations into the resident carries
    # (query carry = the output block, content carry = VMEM scratch).
    @pl.when(layer == 0)
    def _():
        q_out_ref[...] = q_ref[...]
        c_scr[...] = c_ref[...].reshape(B * T, D)

    q2 = q_out_ref[...].reshape(B * T, D)
    c2 = c_scr[...]

    # Per-layer pre-norms (norm_q / norm_c), fused in-kernel.
    qn_bf = _layernorm(q2, nq_g_ref[...], nq_b_ref[...]).astype(jnp.bfloat16)
    cn_bf = _layernorm(c2, nc_g_ref[...], nc_b_ref[...]).astype(jnp.bfloat16)

    # ---- projections shared by BOTH streams: computed ONCE per layer ----
    # self-attention K/V of norm_c(content)
    kv_c = (jnp.dot(cn_bf, sa_w_ref[:, D:], preferred_element_type=jnp.float32)
            + sa_b_ref[:, D:])
    k_self = kv_c[:, :D].reshape(B, T, D)
    v_self = kv_c[:, D:].reshape(B, T, D)
    # cross-attention K/V of memory (memory ships as bf16 -> direct MXU operand)
    mem_bf = mem_ref[...].reshape(B * S, D)
    kv_m = (jnp.dot(mem_bf, ca_w_ref[:, D:], preferred_element_type=jnp.float32)
            + ca_b_ref[:, D:])
    k_mem = kv_m[:, :D].reshape(B, S, D)
    v_mem = kv_m[:, D:].reshape(B, S, D)

    srefs = (sa_w_ref, sa_b_ref, sa_wo_ref, sa_bo_ref,
             ca_w_ref, ca_b_ref, ca_wo_ref, ca_bo_ref,
             n1_g_ref, n1_b_ref, n2_g_ref, n2_b_ref,
             l1_w_ref, l1_b_ref, l2_w_ref, l2_b_ref)

    # ---- query stream ----
    new_q = _stream(q2, qn_bf, k_self, v_self, k_mem, v_mem, qmask_ref[...],
                    *srefs, nhead=nhead, B=B, T=T, D=D)

    @pl.when(layer == num_layers - 1)
    def _():
        # fold the decoder's final LayerNorm into the last layer
        q_out_ref[...] = _layernorm(new_q, fin_g_ref[...],
                                    fin_b_ref[...]).reshape(B, T, D)

    @pl.when(layer < num_layers - 1)
    def _():
        q_out_ref[...] = new_q.reshape(B, T, D)
        # ---- content stream (update_content=True; skipped on last layer) ----
        new_c = _stream(c2, cn_bf, k_self, v_self, k_mem, v_mem, cmask_ref[...],
                        *srefs, nhead=nhead, B=B, T=T, D=D)
        c_scr[...] = new_c


# ---------------------------------------------------------------------------
# Wrapper
# ---------------------------------------------------------------------------
def decoder_forward(params, query, content, memory, nhead,
                    query_mask=None, content_mask=None, content_key_padding_mask=None):
    B, T, D = query.shape
    S = memory.shape[1]
    L = int(params['num_layers'])
    FF = params['l1_w'].shape[-1]

    def additive(m):
        if m is None:
            return jnp.zeros((T, T), jnp.float32)
        if jnp.issubdtype(m.dtype, jnp.bool_):
            return jnp.where(m, NEG_MASK, 0.0).astype(jnp.float32)
        # sanitize -inf -> large finite negative (exp underflows to 0 either way)
        return jnp.maximum(m.astype(jnp.float32), NEG_MASK)

    qm = additive(query_mask)
    cm = additive(content_mask)
    if content_key_padding_mask is None:
        pad = jnp.zeros((B, T), jnp.float32)
    else:
        pad = jnp.where(content_key_padding_mask, NEG_MASK, 0.0).astype(jnp.float32)
    q_mask = qm[None, :, :] + pad[:, None, :]   # (B, T, T) additive
    c_mask = cm[None, :, :] + pad[:, None, :]

    kernel = functools.partial(_decoder_kernel, nhead, L)

    def whole(shape):
        zeros = (0,) * len(shape)
        return pl.BlockSpec(shape, lambda l, _z=zeros: _z)

    def per_layer(trailing):
        trailing = tuple(trailing)
        zeros = (0,) * len(trailing)
        return pl.BlockSpec((None,) + trailing, lambda l, _z=zeros: (l,) + _z)

    in_specs = [
        whole((B, T, D)),                                 # query   (f32)
        whole((B, T, D)),                                 # content (f32)
        whole((B, S, D)),                                 # memory  (bf16)
        whole((B, T, T)),                                 # q_mask
        whole((B, T, T)),                                 # c_mask
        per_layer((D, 3 * D)), per_layer((1, 3 * D)),     # sa_w, sa_b
        per_layer((D, D)), per_layer((1, D)),             # sa_wo, sa_bo
        per_layer((D, 3 * D)), per_layer((1, 3 * D)),     # ca_w, ca_b
        per_layer((D, D)), per_layer((1, D)),             # ca_wo, ca_bo
        per_layer((1, D)), per_layer((1, D)),             # nq_g, nq_b
        per_layer((1, D)), per_layer((1, D)),             # nc_g, nc_b
        per_layer((1, D)), per_layer((1, D)),             # n1_g, n1_b
        per_layer((1, D)), per_layer((1, D)),             # n2_g, n2_b
        per_layer((D, FF)), per_layer((1, FF)),           # l1_w, l1_b
        per_layer((FF, D)), per_layer((1, D)),            # l2_w, l2_b
        whole((1, D)), whole((1, D)),                     # final norm g, b
    ]

    operands = (query.astype(jnp.float32), content.astype(jnp.float32),
                memory.astype(jnp.bfloat16), q_mask, c_mask,
                params['sa_w'], params['sa_b'], params['sa_wo'], params['sa_bo'],
                params['ca_w'], params['ca_b'], params['ca_wo'], params['ca_bo'],
                params['nq_g'], params['nq_b'], params['nc_g'], params['nc_b'],
                params['n1_g'], params['n1_b'], params['n2_g'], params['n2_b'],
                params['l1_w'], params['l1_b'], params['l2_w'], params['l2_b'],
                params['norm_g'], params['norm_b'])

    # Advisory cost estimate for XLA scheduling around the fused decoder.
    rows = B * T
    streams = 2 * L - 1
    flops = (L * 2 * rows * D * (2 * D)              # shared self-attn K/V of norm_c
             + L * 2 * (B * S) * D * (2 * D)         # shared cross-attn K/V of memory
             + streams * (3 * 2 * rows * D * D       # self Q, self out, cross Q projections
                          + 2 * rows * D * D         # cross out projection
                          + 2 * 2 * B * T * T * D    # self scores + PV
                          + 2 * 2 * B * T * S * D    # cross scores + PV
                          + 2 * 2 * rows * D * FF))  # MLP
    transcendentals = streams * (B * T * (T + S) + rows * FF)
    bytes_accessed = sum(int(x.size) * x.dtype.itemsize for x in operands) + rows * D * 4

    return pl.pallas_call(
        kernel,
        out_shape=jax.ShapeDtypeStruct((B, T, D), jnp.float32),
        grid_spec=pltpu.PrefetchScalarGridSpec(
            num_scalar_prefetch=0,
            grid=(L,),
            in_specs=in_specs,
            out_specs=pl.BlockSpec((B, T, D), lambda l: (0, 0, 0)),
            scratch_shapes=[pltpu.VMEM((B * T, D), jnp.float32)]),   # content carry
        compiler_params=pltpu.CompilerParams(
            dimension_semantics=("arbitrary",),          # layers are sequential
            vmem_limit_bytes=48 * 1024 * 1024),
        cost_estimate=pl.CostEstimate(flops=int(flops),
                                      transcendentals=int(transcendentals),
                                      bytes_accessed=int(bytes_accessed)),
    )(*operands)


# ---------------------------------------------------------------------------
# Deterministic synthetic parameters (layer-stacked; bf16 weights, f32 biases / LN)
# ---------------------------------------------------------------------------
def init_params(key, D, FF, L):
    s = 0.05
    key, *ks = jax.random.split(key, 13)

    def w(k, shape):   # bf16 weights, f32 accumulation in-kernel
        return (jax.random.normal(k, shape, jnp.float32) * s).astype(jnp.bfloat16)

    def b(k, shape):   # f32 biases (added to f32 accumulators)
        return jax.random.normal(k, shape, jnp.float32) * s

    ones = lambda: jnp.ones((L, 1, D), jnp.float32)
    zeros = lambda: jnp.zeros((L, 1, D), jnp.float32)
    return dict(
        sa_w=w(ks[0], (L, D, 3 * D)), sa_b=b(ks[1], (L, 1, 3 * D)),
        sa_wo=w(ks[2], (L, D, D)), sa_bo=b(ks[3], (L, 1, D)),
        ca_w=w(ks[4], (L, D, 3 * D)), ca_b=b(ks[5], (L, 1, 3 * D)),
        ca_wo=w(ks[6], (L, D, D)), ca_bo=b(ks[7], (L, 1, D)),
        l1_w=w(ks[8], (L, D, FF)), l1_b=b(ks[9], (L, 1, FF)),
        l2_w=w(ks[10], (L, FF, D)), l2_b=b(ks[11], (L, 1, D)),
        nq_g=ones(), nq_b=zeros(), nc_g=ones(), nc_b=zeros(),
        n1_g=ones(), n1_b=zeros(), n2_g=ones(), n2_b=zeros(),
        norm_g=jnp.ones((1, D), jnp.float32), norm_b=jnp.zeros((1, D), jnp.float32),
        num_layers=L)


if __name__ == "__main__":
    # Small but TPU-friendly shapes: D multiple of 128 -> lane-dense matmuls/stores.
    B, T, S, D, H, FF, L = 2, 8, 16, 128, 4, 256, 2

    root = jax.random.PRNGKey(0)
    k_q, k_c, k_m, k_p = jax.random.split(root, 4)
    query = jax.random.normal(k_q, (B, T, D), jnp.float32)
    content = jax.random.normal(k_c, (B, T, D), jnp.float32)
    memory = jax.random.normal(k_m, (B, S, D), jnp.float32)

    # PARSeq-style float attention masks (0 = attend, -inf = blocked)
    causal = jnp.where(jnp.tril(jnp.ones((T, T), dtype=bool)), 0.0, -jnp.inf).astype(jnp.float32)
    query_mask = causal
    content_mask = causal
    # bool key-padding mask: pad the last content position of batch element 1
    content_key_padding_mask = jnp.zeros((B, T), dtype=bool).at[1, T - 1].set(True)

    params = init_params(k_p, D, FF, L)

    out = decoder_forward(params, query, content, memory, H,
                          query_mask=query_mask,
                          content_mask=content_mask,
                          content_key_padding_mask=content_key_padding_mask)
    out = jax.block_until_ready(out)
    assert out.shape == (B, T, D) and bool(jnp.all(jnp.isfinite(out)))
    print("KERNEL_OK")
</pallas_src>

<mosaic_0001>
module attributes {stable_mosaic.version = 11 : i64} {
  func.func @_decoder_kernel(%arg0: i32, %arg1: memref<2x8x128xf32, #tpu.memory_space<vmem>>, %arg2: memref<2x8x128xf32, #tpu.memory_space<vmem>>, %arg3: memref<2x16x128xbf16, #tpu.memory_space<vmem>>, %arg4: memref<2x8x8xf32, #tpu.memory_space<vmem>>, %arg5: memref<2x8x8xf32, #tpu.memory_space<vmem>>, %arg6: memref<1x128x384xbf16, #tpu.memory_space<vmem>>, %arg7: memref<1x1x384xf32, #tpu.memory_space<vmem>>, %arg8: memref<1x128x128xbf16, #tpu.memory_space<vmem>>, %arg9: memref<1x1x128xf32, #tpu.memory_space<vmem>>, %arg10: memref<1x128x384xbf16, #tpu.memory_space<vmem>>, %arg11: memref<1x1x384xf32, #tpu.memory_space<vmem>>, %arg12: memref<1x128x128xbf16, #tpu.memory_space<vmem>>, %arg13: memref<1x1x128xf32, #tpu.memory_space<vmem>>, %arg14: memref<1x1x128xf32, #tpu.memory_space<vmem>>, %arg15: memref<1x1x128xf32, #tpu.memory_space<vmem>>, %arg16: memref<1x1x128xf32, #tpu.memory_space<vmem>>, %arg17: memref<1x1x128xf32, #tpu.memory_space<vmem>>, %arg18: memref<1x1x128xf32, #tpu.memory_space<vmem>>, %arg19: memref<1x1x128xf32, #tpu.memory_space<vmem>>, %arg20: memref<1x1x128xf32, #tpu.memory_space<vmem>>, %arg21: memref<1x1x128xf32, #tpu.memory_space<vmem>>, %arg22: memref<1x128x256xbf16, #tpu.memory_space<vmem>>, %arg23: memref<1x1x256xf32, #tpu.memory_space<vmem>>, %arg24: memref<1x256x128xbf16, #tpu.memory_space<vmem>>, %arg25: memref<1x1x128xf32, #tpu.memory_space<vmem>>, %arg26: memref<1x128xf32, #tpu.memory_space<vmem>>, %arg27: memref<1x128xf32, #tpu.memory_space<vmem>>, %arg28: memref<2x8x128xf32, #tpu.memory_space<vmem>>, %arg29: memref<16x128xf32, #tpu.memory_space<vmem>>) attributes {dimension_semantics = [#tpu.dimension_semantics<arbitrary>], iteration_bounds = array<i64: 2>, scalar_prefetch = 0 : i64, scratch_operands = 1 : i64, tpu.core_type = #tpu.core_type<tc>, window_params = [{pipeline_mode = #tpu.pipeline_mode<synchronous>, transform_indices = @transform_0, window_bounds = array<i64: 2, 8, 128>}, {pipeline_mode = #tpu.pipeline_mode<synchronous>, transform_indices = @transform_1, window_bounds = array<i64: 2, 8, 128>}, {pipeline_mode = #tpu.pipeline_mode<synchronous>, transform_indices = @transform_2, window_bounds = array<i64: 2, 16, 128>}, {pipeline_mode = #tpu.pipeline_mode<synchronous>, transform_indices = @transform_3, window_bounds = array<i64: 2, 8, 8>}, {pipeline_mode = #tpu.pipeline_mode<synchronous>, transform_indices = @transform_4, window_bounds = array<i64: 2, 8, 8>}, {transform_indices = @transform_5, window_bounds = array<i64: 1, 128, 384>}, {transform_indices = @transform_6, window_bounds = array<i64: 1, 1, 384>}, {transform_indices = @transform_7, window_bounds = array<i64: 1, 128, 128>}, {transform_indices = @transform_8, window_bounds = array<i64: 1, 1, 128>}, {transform_indices = @transform_9, window_bounds = array<i64: 1, 128, 384>}, {transform_indices = @transform_10, window_bounds = array<i64: 1, 1, 384>}, {transform_indices = @transform_11, window_bounds = array<i64: 1, 128, 128>}, {transform_indices = @transform_12, window_bounds = array<i64: 1, 1, 128>}, {transform_indices = @transform_13, window_bounds = array<i64: 1, 1, 128>}, {transform_indices = @transform_14, window_bounds = array<i64: 1, 1, 128>}, {transform_indices = @transform_15, window_bounds = array<i64: 1, 1, 128>}, {transform_indices = @transform_16, window_bounds = array<i64: 1, 1, 128>}, {transform_indices = @transform_17, window_bounds = array<i64: 1, 1, 128>}, {transform_indices = @transform_18, window_bounds = array<i64: 1, 1, 128>}, {transform_indices = @transform_19, window_bounds = array<i64: 1, 1, 128>}, {transform_indices = @transform_20, window_bounds = array<i64: 1, 1, 128>}, {transform_indices = @transform_21, window_bounds = array<i64: 1, 128, 256>}, {transform_indices = @transform_22, window_bounds = array<i64: 1, 1, 256>}, {transform_indices = @transform_23, window_bounds = array<i64: 1, 256, 128>}, {transform_indices = @transform_24, window_bounds = array<i64: 1, 1, 128>}, {pipeline_mode = #tpu.pipeline_mode<synchronous>, transform_indices = @transform_25, window_bounds = array<i64: 1, 128>}, {pipeline_mode = #tpu.pipeline_mode<synchronous>, transform_indices = @transform_26, window_bounds = array<i64: 1, 128>}, {pipeline_mode = #tpu.pipeline_mode<synchronous>, transform_indices = @transform_27, window_bounds = array<i64: 2, 8, 128>}]} {
    %c0_i32 = arith.constant 0 : i32
    %0 = arith.cmpi eq, %arg0, %c0_i32 : i32
    %1 = arith.extui %0 : i1 to i32
    %c0_i32_0 = arith.constant 0 : i32
    %2 = arith.cmpi ne, %1, %c0_i32_0 : i32
    scf.if %2 {
      %c0_156 = arith.constant 0 : index
      %c0_157 = arith.constant 0 : index
      %c0_158 = arith.constant 0 : index
      %384 = vector.load %arg1[%c0_156, %c0_157, %c0_158] : memref<2x8x128xf32, #tpu.memory_space<vmem>>, vector<2x8x128xf32>
      %c0_159 = arith.constant 0 : index
      %c0_160 = arith.constant 0 : index
      %c0_161 = arith.constant 0 : index
      %385 = vector.load %arg28[%c0_159, %c0_160, %c0_161] : memref<2x8x128xf32, #tpu.memory_space<vmem>>, vector<2x8x128xf32>
      tpu.vector_store %arg28[%c0_159, %c0_160, %c0_161], %384 {strides = array<i32>} : memref<2x8x128xf32, #tpu.memory_space<vmem>>, vector<2x8x128xf32>,
      %c0_162 = arith.constant 0 : index
      %c0_163 = arith.constant 0 : index
      %c0_164 = arith.constant 0 : index
      %386 = vector.load %arg2[%c0_162, %c0_163, %c0_164] : memref<2x8x128xf32, #tpu.memory_space<vmem>>, vector<2x8x128xf32>
      %387 = vector.shape_cast %386 : vector<2x8x128xf32> to vector<16x128xf32>
      %c0_165 = arith.constant 0 : index
      %c0_166 = arith.constant 0 : index
      %388 = vector.load %arg29[%c0_165, %c0_166] : memref<16x128xf32, #tpu.memory_space<vmem>>, vector<16x128xf32>
      tpu.vector_store %arg29[%c0_165, %c0_166], %387 {strides = array<i32>} : memref<16x128xf32, #tpu.memory_space<vmem>>, vector<16x128xf32>,
    } else {
    }
    %c0 = arith.constant 0 : index
    %c0_1 = arith.constant 0 : index
    %c0_2 = arith.constant 0 : index
    %3 = vector.load %arg28[%c0, %c0_1, %c0_2] : memref<2x8x128xf32, #tpu.memory_space<vmem>>, vector<2x8x128xf32>
    %4 = vector.shape_cast %3 : vector<2x8x128xf32> to vector<16x128xf32>
    %c0_3 = arith.constant 0 : index
    %c0_4 = arith.constant 0 : index
    %5 = vector.load %arg29[%c0_3, %c0_4] : memref<16x128xf32, #tpu.memory_space<vmem>>, vector<16x128xf32>
    %c0_5 = arith.constant 0 : index
    %c0_6 = arith.constant 0 : index
    %c0_7 = arith.constant 0 : index
    %6 = vector.load %arg14[%c0_5, %c0_6, %c0_7] : memref<1x1x128xf32, #tpu.memory_space<vmem>>, vector<1x1x128xf32>
    %7 = vector.shape_cast %6 : vector<1x1x128xf32> to vector<1x128xf32>
    %c0_8 = arith.constant 0 : index
    %c0_9 = arith.constant 0 : index
    %c0_10 = arith.constant 0 : index
    %8 = vector.load %arg15[%c0_8, %c0_9, %c0_10] : memref<1x1x128xf32, #tpu.memory_space<vmem>>, vector<1x1x128xf32>
    %9 = vector.shape_cast %8 : vector<1x1x128xf32> to vector<1x128xf32>
    %cst = arith.constant dense<0.000000e+00> : vector<16xf32>
    %10 = vector.multi_reduction <add>, %4, %cst [1] : vector<16x128xf32> to vector<16xf32>
    %11 = vector.shape_cast %10 : vector<16xf32> to vector<16x1xf32>
    %cst_11 = arith.constant 1.280000e+02 : f32
    %12 = vector.broadcast %cst_11 : f32 to vector<16x1xf32>
    %13 = arith.divf %11, %12 : vector<16x1xf32>
    %14 = vector.broadcast %13 : vector<16x1xf32> to vector<16x128xf32>
    %15 = arith.subf %4, %14 : vector<16x128xf32>
    %16 = arith.mulf %15, %15 : vector<16x128xf32>
    %cst_12 = arith.constant dense<0.000000e+00> : vector<16xf32>
    %17 = vector.multi_reduction <add>, %16, %cst_12 [1] : vector<16x128xf32> to vector<16xf32>
    %18 = vector.shape_cast %17 : vector<16xf32> to vector<16x1xf32>
    %cst_13 = arith.constant 1.280000e+02 : f32
    %19 = vector.broadcast %cst_13 : f32 to vector<16x1xf32>
    %20 = arith.divf %18, %19 : vector<16x1xf32>
    %21 = vector.broadcast %13 : vector<16x1xf32> to vector<16x128xf32>
    %22 = arith.subf %4, %21 : vector<16x128xf32>
    %cst_14 = arith.constant 9.99999974E-6 : f32
    %23 = vector.broadcast %cst_14 : f32 to vector<16x1xf32>
    %24 = arith.addf %20, %23 : vector<16x1xf32>
    %25 = math.rsqrt %24 : vector<16x1xf32>
    %26 = vector.broadcast %25 : vector<16x1xf32> to vector<16x128xf32>
    %27 = arith.mulf %22, %26 : vector<16x128xf32>
    %28 = vector.broadcast %7 : vector<1x128xf32> to vector<16x128xf32>
    %29 = arith.mulf %27, %28 : vector<16x128xf32>
    %30 = vector.broadcast %9 : vector<1x128xf32> to vector<16x128xf32>
    %31 = arith.addf %29, %30 : vector<16x128xf32>
    %32 = arith.truncf %31 : vector<16x128xf32> to vector<16x128xbf16>
    %c0_15 = arith.constant 0 : index
    %c0_16 = arith.constant 0 : index
    %c0_17 = arith.constant 0 : index
    %33 = vector.load %arg16[%c0_15, %c0_16, %c0_17] : memref<1x1x128xf32, #tpu.memory_space<vmem>>, vector<1x1x128xf32>
    %34 = vector.shape_cast %33 : vector<1x1x128xf32> to vector<1x128xf32>
    %c0_18 = arith.constant 0 : index
    %c0_19 = arith.constant 0 : index
    %c0_20 = arith.constant 0 : index
    %35 = vector.load %arg17[%c0_18, %c0_19, %c0_20] : memref<1x1x128xf32, #tpu.memory_space<vmem>>, vector<1x1x128xf32>
    %36 = vector.shape_cast %35 : vector<1x1x128xf32> to vector<1x128xf32>
    %cst_21 = arith.constant dense<0.000000e+00> : vector<16xf32>
    %37 = vector.multi_reduction <add>, %5, %cst_21 [1] : vector<16x128xf32> to vector<16xf32>
    %38 = vector.shape_cast %37 : vector<16xf32> to vector<16x1xf32>
    %cst_22 = arith.constant 1.280000e+02 : f32
    %39 = vector.broadcast %cst_22 : f32 to vector<16x1xf32>
    %40 = arith.divf %38, %39 : vector<16x1xf32>
    %41 = vector.broadcast %40 : vector<16x1xf32> to vector<16x128xf32>
    %42 = arith.subf %5, %41 : vector<16x128xf32>
    %43 = arith.mulf %42, %42 : vector<16x128xf32>
    %cst_23 = arith.constant dense<0.000000e+00> : vector<16xf32>
    %44 = vector.multi_reduction <add>, %43, %cst_23 [1] : vector<16x128xf32> to vector<16xf32>
    %45 = vector.shape_cast %44 : vector<16xf32> to vector<16x1xf32>
    %cst_24 = arith.constant 1.280000e+02 : f32
    %46 = vector.broadcast %cst_24 : f32 to vector<16x1xf32>
    %47 = arith.divf %45, %46 : vector<16x1xf32>
    %48 = vector.broadcast %40 : vector<16x1xf32> to vector<16x128xf32>
    %49 = arith.subf %5, %48 : vector<16x128xf32>
    %cst_25 = arith.constant 9.99999974E-6 : f32
    %50 = vector.broadcast %cst_25 : f32 to vector<16x1xf32>
    %51 = arith.addf %47, %50 : vector<16x1xf32>
    %52 = math.rsqrt %51 : vector<16x1xf32>
    %53 = vector.broadcast %52 : vector<16x1xf32> to vector<16x128xf32>
    %54 = arith.mulf %49, %53 : vector<16x128xf32>
    %55 = vector.broadcast %34 : vector<1x128xf32> to vector<16x128xf32>
    %56 = arith.mulf %54, %55 : vector<16x128xf32>
    %57 = vector.broadcast %36 : vector<1x128xf32> to vector<16x128xf32>
    %58 = arith.addf %56, %57 : vector<16x128xf32>
    %59 = arith.truncf %58 : vector<16x128xf32> to vector<16x128xbf16>
    %c0_26 = arith.constant 0 : index
    %c0_27 = arith.constant 0 : index
    %c128 = arith.constant 128 : index
    %60 = vector.load %arg6[%c0_26, %c0_27, %c128] : memref<1x128x384xbf16, #tpu.memory_space<vmem>>, vector<1x128x256xbf16>
    %61 = vector.shape_cast %60 : vector<1x128x256xbf16> to vector<128x256xbf16>
    %cst_28 = arith.constant dense<0.000000e+00> : vector<16x256xf32>
    %62 = tpu.matmul %59, %61, %cst_28 {dimension_numbers = #tpu.dot_dimension_numbers<[1], [0], [0], [1], [0, 0, 1, 1], [], []>} : vector<16x128xbf16>, vector<128x256xbf16>, vector<16x256xf32> -> vector<16x256xf32>
    %c0_29 = arith.constant 0 : index
    %c0_30 = arith.constant 0 : index
    %c128_31 = arith.constant 128 : index
    %63 = vector.load %arg7[%c0_29, %c0_30, %c128_31] : memref<1x1x384xf32, #tpu.memory_space<vmem>>, vector<1x1x256xf32>
    %64 = vector.shape_cast %63 : vector<1x1x256xf32> to vector<1x256xf32>
    %65 = vector.broadcast %64 : vector<1x256xf32> to vector<16x256xf32>
    %66 = arith.addf %62, %65 : vector<16x256xf32>
    %67 = vector.extract_strided_slice %66 {offsets = [0, 0], sizes = [16, 128], strides = [1, 1]} : vector<16x256xf32> to vector<16x128xf32>
    %68 = vector.shape_cast %67 : vector<16x128xf32> to vector<2x8x128xf32>
    %69 = vector.extract_strided_slice %66 {offsets = [0, 128], sizes = [16, 128], strides = [1, 1]} : vector<16x256xf32> to vector<16x128xf32>
    %70 = vector.shape_cast %69 : vector<16x128xf32> to vector<2x8x128xf32>
    %c0_32 = arith.constant 0 : index
    %c0_33 = arith.constant 0 : index
    %c0_34 = arith.constant 0 : index
    %71 = vector.load %arg3[%c0_32, %c0_33, %c0_34] : memref<2x16x128xbf16, #tpu.memory_space<vmem>>, vector<2x16x128xbf16>
    %72 = vector.shape_cast %71 : vector<2x16x128xbf16> to vector<32x128xbf16>
    %c0_35 = arith.constant 0 : index
    %c0_36 = arith.constant 0 : index
    %c128_37 = arith.constant 128 : index
    %73 = vector.load %arg10[%c0_35, %c0_36, %c128_37] : memref<1x128x384xbf16, #tpu.memory_space<vmem>>, vector<1x128x256xbf16>
    %74 = vector.shape_cast %73 : vector<1x128x256xbf16> to vector<128x256xbf16>
    %cst_38 = arith.constant dense<0.000000e+00> : vector<32x256xf32>
    %75 = tpu.matmul %72, %74, %cst_38 {dimension_numbers = #tpu.dot_dimension_numbers<[1], [0], [0], [1], [0, 0, 1, 1], [], []>} : vector<32x128xbf16>, vector<128x256xbf16>, vector<32x256xf32> -> vector<32x256xf32>
    %c0_39 = arith.constant 0 : index
    %c0_40 = arith.constant 0 : index
    %c128_41 = arith.constant 128 : index
    %76 = vector.load %arg11[%c0_39, %c0_40, %c128_41] : memref<1x1x384xf32, #tpu.memory_space<vmem>>, vector<1x1x256xf32>
    %77 = vector.shape_cast %76 : vector<1x1x256xf32> to vector<1x256xf32>
    %78 = vector.broadcast %77 : vector<1x256xf32> to vector<32x256xf32>
    %79 = arith.addf %75, %78 : vector<32x256xf32>
    %80 = vector.extract_strided_slice %79 {offsets = [0, 0], sizes = [32, 128], strides = [1, 1]} : vector<32x256xf32> to vector<32x128xf32>
    %81 = vector.shape_cast %80 : vector<32x128xf32> to vector<2x16x128xf32>
    %82 = vector.extract_strided_slice %79 {offsets = [0, 128], sizes = [32, 128], strides = [1, 1]} : vector<32x256xf32> to vector<32x128xf32>
    %83 = vector.shape_cast %82 : vector<32x128xf32> to vector<2x16x128xf32>
    %c0_42 = arith.constant 0 : index
    %c0_43 = arith.constant 0 : index
    %c0_44 = arith.constant 0 : index
    %84 = vector.load %arg4[%c0_42, %c0_43, %c0_44] : memref<2x8x8xf32, #tpu.memory_space<vmem>>, vector<2x8x8xf32>
    %c0_45 = arith.constant 0 : index
    %c0_46 = arith.constant 0 : index
    %c0_47 = arith.constant 0 : index
    %85 = vector.load %arg6[%c0_45, %c0_46, %c0_47] : memref<1x128x384xbf16, #tpu.memory_space<vmem>>, vector<1x128x128xbf16>
    %86 = vector.shape_cast %85 : vector<1x128x128xbf16> to vector<128x128xbf16>
    %cst_48 = arith.constant dense<0.000000e+00> : vector<16x128xf32>
    %87 = tpu.matmul %32, %86, %cst_48 {dimension_numbers = #tpu.dot_dimension_numbers<[1], [0], [0], [1], [0, 0, 1, 1], [], []>} : vector<16x128xbf16>, vector<128x128xbf16>, vector<16x128xf32> -> vector<16x128xf32>
    %c0_49 = arith.constant 0 : index
    %c0_50 = arith.constant 0 : index
    %c0_51 = arith.constant 0 : index
    %88 = vector.load %arg7[%c0_49, %c0_50, %c0_51] : memref<1x1x384xf32, #tpu.memory_space<vmem>>, vector<1x1x128xf32>
    %89 = vector.shape_cast %88 : vector<1x1x128xf32> to vector<1x128xf32>
    %90 = vector.broadcast %89 : vector<1x128xf32> to vector<16x128xf32>
    %91 = arith.addf %87, %90 : vector<16x128xf32>
    %92 = vector.shape_cast %91 : vector<16x128xf32> to vector<2x8x128xf32>
    %93 = vector.extract_strided_slice %92 {offsets = [0, 0, 0], sizes = [2, 8, 32], strides = [1, 1, 1]} : vector<2x8x128xf32> to vector<2x8x32xf32>
    %94 = arith.truncf %93 : vector<2x8x32xf32> to vector<2x8x32xbf16>
    %95 = vector.extract_strided_slice %68 {offsets = [0, 0, 0], sizes = [2, 8, 32], strides = [1, 1, 1]} : vector<2x8x128xf32> to vector<2x8x32xf32>
    %96 = arith.truncf %95 : vector<2x8x32xf32> to vector<2x8x32xbf16>
    %97 = vector.extract_strided_slice %70 {offsets = [0, 0, 0], sizes = [2, 8, 32], strides = [1, 1, 1]} : vector<2x8x128xf32> to vector<2x8x32xf32>
    %98 = arith.truncf %97 : vector<2x8x32xf32> to vector<2x8x32xbf16>
    "tpu.trace_start"() <{level = 10 : i32, message = "bqd,bkd->bqk"}> : () -> ()
    %cst_52 = arith.constant dense<0.000000e+00> : vector<2x8x8xf32>
    %99 = tpu.matmul %94, %96, %cst_52 {dimension_numbers = #tpu.dot_dimension_numbers<[2], [2], [1], [1], [0, 0, 0, 1, 1, 1], [0], [0]>} : vector<2x8x32xbf16>, vector<2x8x32xbf16>, vector<2x8x8xf32> -> vector<2x8x8xf32>
    "tpu.trace_stop"() : () -> ()
    %cst_53 = arith.constant 0.176776692 : f32
    %100 = vector.broadcast %cst_53 : f32 to vector<2x8x8xf32>
    %101 = arith.mulf %99, %100 : vector<2x8x8xf32>
    %102 = arith.addf %101, %84 : vector<2x8x8xf32>
    %cst_54 = arith.constant dense<0xFF800000> : vector<2x8xf32>
    %103 = vector.multi_reduction <maximumf>, %102, %cst_54 [2] : vector<2x8x8xf32> to vector<2x8xf32>
    %104 = vector.shape_cast %103 : vector<2x8xf32> to vector<2x8x1xf32>
    %105 = vector.broadcast %104 : vector<2x8x1xf32> to vector<2x8x8xf32>
    %106 = arith.subf %102, %105 : vector<2x8x8xf32>
    %107 = math.exp %106 : vector<2x8x8xf32>
    %cst_55 = arith.constant dense<0.000000e+00> : vector<2x8xf32>
    %108 = vector.multi_reduction <add>, %107, %cst_55 [2] : vector<2x8x8xf32> to vector<2x8xf32>
    %109 = vector.shape_cast %108 : vector<2x8xf32> to vector<2x8x1xf32>
    %110 = tpu.reciprocal %109 {approx = true} : vector<2x8x1xf32> -> vector<2x8x1xf32>
    %111 = vector.broadcast %110 : vector<2x8x1xf32> to vector<2x8x8xf32>
    %112 = arith.mulf %107, %111 : vector<2x8x8xf32>
    %113 = arith.truncf %112 : vector<2x8x8xf32> to vector<2x8x8xbf16>
    "tpu.trace_start"() <{level = 10 : i32, message = "bqk,bkd->bqd"}> : () -> ()
    %cst_56 = arith.constant dense<0.000000e+00> : vector<2x8x32xf32>
    %114 = tpu.matmul %113, %98, %cst_56 {dimension_numbers = #tpu.dot_dimension_numbers<[2], [1], [1], [2], [0, 0, 0, 1, 1, 2], [0], [0]>} : vector<2x8x8xbf16>, vector<2x8x32xbf16>, vector<2x8x32xf32> -> vector<2x8x32xf32>
    "tpu.trace_stop"() : () -> ()
    %115 = vector.extract_strided_slice %92 {offsets = [0, 0, 32], sizes = [2, 8, 32], strides = [1, 1, 1]} : vector<2x8x128xf32> to vector<2x8x32xf32>
    %116 = arith.truncf %115 : vector<2x8x32xf32> to vector<2x8x32xbf16>
    %117 = vector.extract_strided_slice %68 {offsets = [0, 0, 32], sizes = [2, 8, 32], strides = [1, 1, 1]} : vector<2x8x128xf32> to vector<2x8x32xf32>
    %118 = arith.truncf %117 : vector<2x8x32xf32> to vector<2x8x32xbf16>
    %119 = vector.extract_strided_slice %70 {offsets = [0, 0, 32], sizes = [2, 8, 32], strides = [1, 1, 1]} : vector<2x8x128xf32> to vector<2x8x32xf32>
    %120 = arith.truncf %119 : vector<2x8x32xf32> to vector<2x8x32xbf16>
    "tpu.trace_start"() <{level = 10 : i32, message = "bqd,bkd->bqk"}> : () -> ()
    %cst_57 = arith.constant dense<0.000000e+00> : vector<2x8x8xf32>
    %121 = tpu.matmul %116, %118, %cst_57 {dimension_numbers = #tpu.dot_dimension_numbers<[2], [2], [1], [1], [0, 0, 0, 1, 1, 1], [0], [0]>} : vector<2x8x32xbf16>, vector<2x8x32xbf16>, vector<2x8x8xf32> -> vector<2x8x8xf32>
    "tpu.trace_stop"() : () -> ()
    %cst_58 = arith.constant 0.176776692 : f32
    %122 = vector.broadcast %cst_58 : f32 to vector<2x8x8xf32>
    %123 = arith.mulf %121, %122 : vector<2x8x8xf32>
    %124 = arith.addf %123, %84 : vector<2x8x8xf32>
    %cst_59 = arith.constant dense<0xFF800000> : vector<2x8xf32>
    %125 = vector.multi_reduction <maximumf>, %124, %cst_59 [2] : vector<2x8x8xf32> to vector<2x8xf32>
    %126 = vector.shape_cast %125 : vector<2x8xf32> to vector<2x8x1xf32>
    %127 = vector.broadcast %126 : vector<2x8x1xf32> to vector<2x8x8xf32>
    %128 = arith.subf %124, %127 : vector<2x8x8xf32>
    %129 = math.exp %128 : vector<2x8x8xf32>
    %cst_60 = arith.constant dense<0.000000e+00> : vector<2x8xf32>
    %130 = vector.multi_reduction <add>, %129, %cst_60 [2] : vector<2x8x8xf32> to vector<2x8xf32>
    %131 = vector.shape_cast %130 : vector<2x8xf32> to vector<2x8x1xf32>
    %132 = tpu.reciprocal %131 {approx = true} : vector<2x8x1xf32> -> vector<2x8x1xf32>
    %133 = vector.broadcast %132 : vector<2x8x1xf32> to vector<2x8x8xf32>
    %134 = arith.mulf %129, %133 : vector<2x8x8xf32>
    %135 = arith.truncf %134 : vector<2x8x8xf32> to vector<2x8x8xbf16>
    "tpu.trace_start"() <{level = 10 : i32, message = "bqk,bkd->bqd"}> : () -> ()
    %cst_61 = arith.constant dense<0.000000e+00> : vector<2x8x32xf32>
    %136 = tpu.matmul %135, %120, %cst_61 {dimension_numbers = #tpu.dot_dimension_numbers<[2], [1], [1], [2], [0, 0, 0, 1, 1, 2], [0], [0]>} : vector<2x8x8xbf16>, vector<2x8x32xbf16>, vector<2x8x32xf32> -> vector<2x8x32xf32>
    "tpu.trace_stop"() : () -> ()
    %137 = vector.extract_strided_slice %92 {offsets = [0, 0, 64], sizes = [2, 8, 32], strides = [1, 1, 1]} : vector<2x8x128xf32> to vector<2x8x32xf32>
    %138 = arith.truncf %137 : vector<2x8x32xf32> to vector<2x8x32xbf16>
    %139 = vector.extract_strided_slice %68 {offsets = [0, 0, 64], sizes = [2, 8, 32], strides = [1, 1, 1]} : vector<2x8x128xf32> to vector<2x8x32xf32>
    %140 = arith.truncf %139 : vector<2x8x32xf32> to vector<2x8x32xbf16>
    %141 = vector.extract_strided_slice %70 {offsets = [0, 0, 64], sizes = [2, 8, 32], strides = [1, 1, 1]} : vector<2x8x128xf32> to vector<2x8x32xf32>
    %142 = arith.truncf %141 : vector<2x8x32xf32> to vector<2x8x32xbf16>
    "tpu.trace_start"() <{level = 10 : i32, message = "bqd,bkd->bqk"}> : () -> ()
    %cst_62 = arith.constant dense<0.000000e+00> : vector<2x8x8xf32>
    %143 = tpu.matmul %138, %140, %cst_62 {dimension_numbers = #tpu.dot_dimension_numbers<[2], [2], [1], [1], [0, 0, 0, 1, 1, 1], [0], [0]>} : vector<2x8x32xbf16>, vector<2x8x32xbf16>, vector<2x8x8xf32> -> vector<2x8x8xf32>
    "tpu.trace_stop"() : () -> ()
    %cst_63 = arith.constant 0.176776692 : f32
    %144 = vector.broadcast %cst_63 : f32 to vector<2x8x8xf32>
    %145 = arith.mulf %143, %144 : vector<2x8x8xf32>
    %146 = arith.addf %145, %84 : vector<2x8x8xf32>
    %cst_64 = arith.constant dense<0xFF800000> : vector<2x8xf32>
    %147 = vector.multi_reduction <maximumf>, %146, %cst_64 [2] : vector<2x8x8xf32> to vector<2x8xf32>
    %148 = vector.shape_cast %147 : vector<2x8xf32> to vector<2x8x1xf32>
    %149 = vector.broadcast %148 : vector<2x8x1xf32> to vector<2x8x8xf32>
    %150 = arith.subf %146, %149 : vector<2x8x8xf32>
    %151 = math.exp %150 : vector<2x8x8xf32>
    %cst_65 = arith.constant dense<0.000000e+00> : vector<2x8xf32>
    %152 = vector.multi_reduction <add>, %151, %cst_65 [2] : vector<2x8x8xf32> to vector<2x8xf32>
    %153 = vector.shape_cast %152 : vector<2x8xf32> to vector<2x8x1xf32>
    %154 = tpu.reciprocal %153 {approx = true} : vector<2x8x1xf32> -> vector<2x8x1xf32>
    %155 = vector.broadcast %154 : vector<2x8x1xf32> to vector<2x8x8xf32>
    %156 = arith.mulf %151, %155 : vector<2x8x8xf32>
    %157 = arith.truncf %156 : vector<2x8x8xf32> to vector<2x8x8xbf16>
    "tpu.trace_start"() <{level = 10 : i32, message = "bqk,bkd->bqd"}> : () -> ()
    %cst_66 = arith.constant dense<0.000000e+00> : vector<2x8x32xf32>
    %158 = tpu.matmul %157, %142, %cst_66 {dimension_numbers = #tpu.dot_dimension_numbers<[2], [1], [1], [2], [0, 0, 0, 1, 1, 2], [0], [0]>} : vector<2x8x8xbf16>, vector<2x8x32xbf16>, vector<2x8x32xf32> -> vector<2x8x32xf32>
    "tpu.trace_stop"() : () -> ()
    %159 = vector.extract_strided_slice %92 {offsets = [0, 0, 96], sizes = [2, 8, 32], strides = [1, 1, 1]} : vector<2x8x128xf32> to vector<2x8x32xf32>
    %160 = arith.truncf %159 : vector<2x8x32xf32> to vector<2x8x32xbf16>
    %161 = vector.extract_strided_slice %68 {offsets = [0, 0, 96], sizes = [2, 8, 32], strides = [1, 1, 1]} : vector<2x8x128xf32> to vector<2x8x32xf32>
    %162 = arith.truncf %161 : vector<2x8x32xf32> to vector<2x8x32xbf16>
    %163 = vector.extract_strided_slice %70 {offsets = [0, 0, 96], sizes = [2, 8, 32], strides = [1, 1, 1]} : vector<2x8x128xf32> to vector<2x8x32xf32>
    %164 = arith.truncf %163 : vector<2x8x32xf32> to vector<2x8x32xbf16>
    "tpu.trace_start"() <{level = 10 : i32, message = "bqd,bkd->bqk"}> : () -> ()
    %cst_67 = arith.constant dense<0.000000e+00> : vector<2x8x8xf32>
    %165 = tpu.matmul %160, %162, %cst_67 {dimension_numbers = #tpu.dot_dimension_numbers<[2], [2], [1], [1], [0, 0, 0, 1, 1, 1], [0], [0]>} : vector<2x8x32xbf16>, vector<2x8x32xbf16>, vector<2x8x8xf32> -> vector<2x8x8xf32>
    "tpu.trace_stop"() : () -> ()
    %cst_68 = arith.constant 0.176776692 : f32
    %166 = vector.broadcast %cst_68 : f32 to vector<2x8x8xf32>
    %167 = arith.mulf %165, %166 : vector<2x8x8xf32>
    %168 = arith.addf %167, %84 : vector<2x8x8xf32>
    %cst_69 = arith.constant dense<0xFF800000> : vector<2x8xf32>
    %169 = vector.multi_reduction <maximumf>, %168, %cst_69 [2] : vector<2x8x8xf32> to vector<2x8xf32>
    %170 = vector.shape_cast %169 : vector<2x8xf32> to vector<2x8x1xf32>
    %171 = vector.broadcast %170 : vector<2x8x1xf32> to vector<2x8x8xf32>
    %172 = arith.subf %168, %171 : vector<2x8x8xf32>
    %173 = math.exp %172 : vector<2x8x8xf32>
    %cst_70 = arith.constant dense<0.000000e+00> : vector<2x8xf32>
    %174 = vector.multi_reduction <add>, %173, %cst_70 [2] : vector<2x8x8xf32> to vector<2x8xf32>
    %175 = vector.shape_cast %174 : vector<2x8xf32> to vector<2x8x1xf32>
    %176 = tpu.reciprocal %175 {approx = true} : vector<2x8x1xf32> -> vector<2x8x1xf32>
    %177 = vector.broadcast %176 : vector<2x8x1xf32> to vector<2x8x8xf32>
    %178 = arith.mulf %173, %177 : vector<2x8x8xf32>
    %179 = arith.truncf %178 : vector<2x8x8xf32> to vector<2x8x8xbf16>
    "tpu.trace_start"() <{level = 10 : i32, message = "bqk,bkd->bqd"}> : () -> ()
    %cst_71 = arith.constant dense<0.000000e+00> : vector<2x8x32xf32>
    %180 = tpu.matmul %179, %164, %cst_71 {dimension_numbers = #tpu.dot_dimension_numbers<[2], [1], [1], [2], [0, 0, 0, 1, 1, 2], [0], [0]>} : vector<2x8x8xbf16>, vector<2x8x32xbf16>, vector<2x8x32xf32> -> vector<2x8x32xf32>
    "tpu.trace_stop"() : () -> ()
    %181 = tpu.concatenate %114, %136, %158, %180 in 2 : vector<2x8x32xf32>, vector<2x8x32xf32>, vector<2x8x32xf32>, vector<2x8x32xf32> -> vector<2x8x128xf32>
    %182 = vector.shape_cast %181 : vector<2x8x128xf32> to vector<16x128xf32>
    %183 = arith.truncf %182 : vector<16x128xf32> to vector<16x128xbf16>
    %c0_72 = arith.constant 0 : index
    %c0_73 = arith.constant 0 : index
    %c0_74 = arith.constant 0 : index
    %184 = vector.load %arg8[%c0_72, %c0_73, %c0_74] : memref<1x128x128xbf16, #tpu.memory_space<vmem>>, vector<1x128x128xbf16>
    %185 = vector.shape_cast %184 : vector<1x128x128xbf16> to vector<128x128xbf16>
    %cst_75 = arith.constant dense<0.000000e+00> : vector<16x128xf32>
    %186 = tpu.matmul %183, %185, %cst_75 {dimension_numbers = #tpu.dot_dimension_numbers<[1], [0], [0], [1], [0, 0, 1, 1], [], []>} : vector<16x128xbf16>, vector<128x128xbf16>, vector<16x128xf32> -> vector<16x128xf32>
    %c0_76 = arith.constant 0 : index
    %c0_77 = arith.constant 0 : index
    %c0_78 = arith.constant 0 : index
    %187 = vector.load %arg9[%c0_76, %c0_77, %c0_78] : memref<1x1x128xf32, #tpu.memory_space<vmem>>, vector<1x1x128xf32>
    %188 = vector.shape_cast %187 : vector<1x1x128xf32> to vector<1x128xf32>
    %189 = vector.broadcast %188 : vector<1x128xf32> to vector<16x128xf32>
    %190 = arith.addf %186, %189 : vector<16x128xf32>
    %191 = arith.addf %4, %190 : vector<16x128xf32>
    %c0_79 = arith.constant 0 : index
    %c0_80 = arith.constant 0 : index
    %c0_81 = arith.constant 0 : index
    %192 = vector.load %arg18[%c0_79, %c0_80, %c0_81] : memref<1x1x128xf32, #tpu.memory_space<vmem>>, vector<1x1x128xf32>
    %193 = vector.shape_cast %192 : vector<1x1x128xf32> to vector<1x128xf32>
    %c0_82 = arith.constant 0 : index
    %c0_83 = arith.constant 0 : index
    %c0_84 = arith.constant 0 : index
    %194 = vector.load %arg19[%c0_82, %c0_83, %c0_84] : memref<1x1x128xf32, #tpu.memory_space<vmem>>, vector<1x1x128xf32>
    %195 = vector.shape_cast %194 : vector<1x1x128xf32> to vector<1x128xf32>
    %cst_85 = arith.constant dense<0.000000e+00> : vector<16xf32>
    %196 = vector.multi_reduction <add>, %191, %cst_85 [1] : vector<16x128xf32> to vector<16xf32>
    %197 = vector.shape_cast %196 : vector<16xf32> to vector<16x1xf32>
    %cst_86 = arith.constant 1.280000e+02 : f32
    %198 = vector.broadcast %cst_86 : f32 to vector<16x1xf32>
    %199 = arith.divf %197, %198 : vector<16x1xf32>
    %200 = vector.broadcast %199 : vector<16x1xf32> to vector<16x128xf32>
    %201 = arith.subf %191, %200 : vector<16x128xf32>
    %202 = arith.mulf %201, %201 : vector<16x128xf32>
    %cst_87 = arith.constant dense<0.000000e+00> : vector<16xf32>
    %203 = vector.multi_reduction <add>, %202, %cst_87 [1] : vector<16x128xf32> to vector<16xf32>
    %204 = vector.shape_cast %203 : vector<16xf32> to vector<16x1xf32>
    %cst_88 = arith.constant 1.280000e+02 : f32
    %205 = vector.broadcast %cst_88 : f32 to vector<16x1xf32>
    %206 = arith.divf %204, %205 : vector<16x1xf32>
    %207 = vector.broadcast %199 : vector<16x1xf32> to vector<16x128xf32>
    %208 = arith.subf %191, %207 : vector<16x128xf32>
    %cst_89 = arith.constant 9.99999974E-6 : f32
    %209 = vector.broadcast %cst_89 : f32 to vector<16x1xf32>
    %210 = arith.addf %206, %209 : vector<16x1xf32>
    %211 = math.rsqrt %210 : vector<16x1xf32>
    %212 = vector.broadcast %211 : vector<16x1xf32> to vector<16x128xf32>
    %213 = arith.mulf %208, %212 : vector<16x128xf32>
    %214 = vector.broadcast %193 : vector<1x128xf32> to vector<16x128xf32>
    %215 = arith.mulf %213, %214 : vector<16x128xf32>
    %216 = vector.broadcast %195 : vector<1x128xf32> to vector<16x128xf32>
    %217 = arith.addf %215, %216 : vector<16x128xf32>
    %218 = arith.truncf %217 : vector<16x128xf32> to vector<16x128xbf16>
    %c0_90 = arith.constant 0 : index
    %c0_91 = arith.constant 0 : index
    %c0_92 = arith.constant 0 : index
    %219 = vector.load %arg10[%c0_90, %c0_91, %c0_92] : memref<1x128x384xbf16, #tpu.memory_space<vmem>>, vector<1x128x128xbf16>
    %220 = vector.shape_cast %219 : vector<1x128x128xbf16> to vector<128x128xbf16>
    %cst_93 = arith.constant dense<0.000000e+00> : vector<16x128xf32>
    %221 = tpu.matmul %218, %220, %cst_93 {dimension_numbers = #tpu.dot_dimension_numbers<[1], [0], [0], [1], [0, 0, 1, 1], [], []>} : vector<16x128xbf16>, vector<128x128xbf16>, vector<16x128xf32> -> vector<16x128xf32>
    %c0_94 = arith.constant 0 : index
    %c0_95 = arith.constant 0 : index
    %c0_96 = arith.constant 0 : index
    %222 = vector.load %arg11[%c0_94, %c0_95, %c0_96] : memref<1x1x384xf32, #tpu.memory_space<vmem>>, vector<1x1x128xf32>
    %223 = vector.shape_cast %222 : vector<1x1x128xf32> to vector<1x128xf32>
    %224 = vector.broadcast %223 : vector<1x128xf32> to vector<16x128xf32>
    %225 = arith.addf %221, %224 : vector<16x128xf32>
    %226 = vector.shape_cast %225 : vector<16x128xf32> to vector<2x8x128xf32>
    %227 = vector.extract_strided_slice %226 {offsets = [0, 0, 0], sizes = [2, 8, 32], strides = [1, 1, 1]} : vector<2x8x128xf32> to vector<2x8x32xf32>
    %228 = arith.truncf %227 : vector<2x8x32xf32> to vector<2x8x32xbf16>
    %229 = vector.extract_strided_slice %81 {offsets = [0, 0, 0], sizes = [2, 16, 32], strides = [1, 1, 1]} : vector<2x16x128xf32> to vector<2x16x32xf32>
    %230 = arith.truncf %229 : vector<2x16x32xf32> to vector<2x16x32xbf16>
    %231 = vector.extract_strided_slice %83 {offsets = [0, 0, 0], sizes = [2, 16, 32], strides = [1, 1, 1]} : vector<2x16x128xf32> to vector<2x16x32xf32>
    %232 = arith.truncf %231 : vector<2x16x32xf32> to vector<2x16x32xbf16>
    "tpu.trace_start"() <{level = 10 : i32, message = "bqd,bkd->bqk"}> : () -> ()
    %cst_97 = arith.constant dense<0.000000e+00> : vector<2x8x16xf32>
    %233 = tpu.matmul %228, %230, %cst_97 {dimension_numbers = #tpu.dot_dimension_numbers<[2], [2], [1], [1], [0, 0, 0, 1, 1, 1], [0], [0]>} : vector<2x8x32xbf16>, vector<2x16x32xbf16>, vector<2x8x16xf32> -> vector<2x8x16xf32>
    "tpu.trace_stop"() : () -> ()
    %cst_98 = arith.constant 0.176776692 : f32
    %234 = vector.broadcast %cst_98 : f32 to vector<2x8x16xf32>
    %235 = arith.mulf %233, %234 : vector<2x8x16xf32>
    %cst_99 = arith.constant dense<0xFF800000> : vector<2x8xf32>
    %236 = vector.multi_reduction <maximumf>, %235, %cst_99 [2] : vector<2x8x16xf32> to vector<2x8xf32>
    %237 = vector.shape_cast %236 : vector<2x8xf32> to vector<2x8x1xf32>
    %238 = vector.broadcast %237 : vector<2x8x1xf32> to vector<2x8x16xf32>
    %239 = arith.subf %235, %238 : vector<2x8x16xf32>
    %240 = math.exp %239 : vector<2x8x16xf32>
    %cst_100 = arith.constant dense<0.000000e+00> : vector<2x8xf32>
    %241 = vector.multi_reduction <add>, %240, %cst_100 [2] : vector<2x8x16xf32> to vector<2x8xf32>
    %242 = vector.shape_cast %241 : vector<2x8xf32> to vector<2x8x1xf32>
    %243 = tpu.reciprocal %242 {approx = true} : vector<2x8x1xf32> -> vector<2x8x1xf32>
    %244 = vector.broadcast %243 : vector<2x8x1xf32> to vector<2x8x16xf32>
    %245 = arith.mulf %240, %244 : vector<2x8x16xf32>
    %246 = arith.truncf %245 : vector<2x8x16xf32> to vector<2x8x16xbf16>
    "tpu.trace_start"() <{level = 10 : i32, message = "bqk,bkd->bqd"}> : () -> ()
    %cst_101 = arith.constant dense<0.000000e+00> : vector<2x8x32xf32>
    %247 = tpu.matmul %246, %232, %cst_101 {dimension_numbers = #tpu.dot_dimension_numbers<[2], [1], [1], [2], [0, 0, 0, 1, 1, 2], [0], [0]>} : vector<2x8x16xbf16>, vector<2x16x32xbf16>, vector<2x8x32xf32> -> vector<2x8x32xf32>
    "tpu.trace_stop"() : () -> ()
    %248 = vector.extract_strided_slice %226 {offsets = [0, 0, 32], sizes = [2, 8, 32], strides = [1, 1, 1]} : vector<2x8x128xf32> to vector<2x8x32xf32>
    %249 = arith.truncf %248 : vector<2x8x32xf32> to vector<2x8x32xbf16>
    %250 = vector.extract_strided_slice %81 {offsets = [0, 0, 32], sizes = [2, 16, 32], strides = [1, 1, 1]} : vector<2x16x128xf32> to vector<2x16x32xf32>
    %251 = arith.truncf %250 : vector<2x16x32xf32> to vector<2x16x32xbf16>
    %252 = vector.extract_strided_slice %83 {offsets = [0, 0, 32], sizes = [2, 16, 32], strides = [1, 1, 1]} : vector<2x16x128xf32> to vector<2x16x32xf32>
    %253 = arith.truncf %252 : vector<2x16x32xf32> to vector<2x16x32xbf16>
    "tpu.trace_start"() <{level = 10 : i32, message = "bqd,bkd->bqk"}> : () -> ()
    %cst_102 = arith.constant dense<0.000000e+00> : vector<2x8x16xf32>
    %254 = tpu.matmul %249, %251, %cst_102 {dimension_numbers = #tpu.dot_dimension_numbers<[2], [2], [1], [1], [0, 0, 0, 1, 1, 1], [0], [0]>} : vector<2x8x32xbf16>, vector<2x16x32xbf16>, vector<2x8x16xf32> -> vector<2x8x16xf32>
    "tpu.trace_stop"() : () -> ()
    %cst_103 = arith.constant 0.176776692 : f32
    %255 = vector.broadcast %cst_103 : f32 to vector<2x8x16xf32>
    %256 = arith.mulf %254, %255 : vector<2x8x16xf32>
    %cst_104 = arith.constant dense<0xFF800000> : vector<2x8xf32>
    %257 = vector.multi_reduction <maximumf>, %256, %cst_104 [2] : vector<2x8x16xf32> to vector<2x8xf32>
    %258 = vector.shape_cast %257 : vector<2x8xf32> to vector<2x8x1xf32>
    %259 = vector.broadcast %258 : vector<2x8x1xf32> to vector<2x8x16xf32>
    %260 = arith.subf %256, %259 : vector<2x8x16xf32>
    %261 = math.exp %260 : vector<2x8x16xf32>
    %cst_105 = arith.constant dense<0.000000e+00> : vector<2x8xf32>
    %262 = vector.multi_reduction <add>, %261, %cst_105 [2] : vector<2x8x16xf32> to vector<2x8xf32>
    %263 = vector.shape_cast %262 : vector<2x8xf32> to vector<2x8x1xf32>
    %264 = tpu.reciprocal %263 {approx = true} : vector<2x8x1xf32> -> vector<2x8x1xf32>
    %265 = vector.broadcast %264 : vector<2x8x1xf32> to vector<2x8x16xf32>
    %266 = arith.mulf %261, %265 : vector<2x8x16xf32>
    %267 = arith.truncf %266 : vector<2x8x16xf32> to vector<2x8x16xbf16>
    "tpu.trace_start"() <{level = 10 : i32, message = "bqk,bkd->bqd"}> : () -> ()
    %cst_106 = arith.constant dense<0.000000e+00> : vector<2x8x32xf32>
    %268 = tpu.matmul %267, %253, %cst_106 {dimension_numbers = #tpu.dot_dimension_numbers<[2], [1], [1], [2], [0, 0, 0, 1, 1, 2], [0], [0]>} : vector<2x8x16xbf16>, vector<2x16x32xbf16>, vector<2x8x32xf32> -> vector<2x8x32xf32>
    "tpu.trace_stop"() : () -> ()
    %269 = vector.extract_strided_slice %226 {offsets = [0, 0, 64], sizes = [2, 8, 32], strides = [1, 1, 1]} : vector<2x8x128xf32> to vector<2x8x32xf32>
    %270 = arith.truncf %269 : vector<2x8x32xf32> to vector<2x8x32xbf16>
    %271 = vector.extract_strided_slice %81 {offsets = [0, 0, 64], sizes = [2, 16, 32], strides = [1, 1, 1]} : vector<2x16x128xf32> to vector<2x16x32xf32>
    %272 = arith.truncf %271 : vector<2x16x32xf32> to vector<2x16x32xbf16>
    %273 = vector.extract_strided_slice %83 {offsets = [0, 0, 64], sizes = [2, 16, 32], strides = [1, 1, 1]} : vector<2x16x128xf32> to vector<2x16x32xf32>
    %274 = arith.truncf %273 : vector<2x16x32xf32> to vector<2x16x32xbf16>
    "tpu.trace_start"() <{level = 10 : i32, message = "bqd,bkd->bqk"}> : () -> ()
    %cst_107 = arith.constant dense<0.000000e+00> : vector<2x8x16xf32>
    %275 = tpu.matmul %270, %272, %cst_107 {dimension_numbers = #tpu.dot_dimension_numbers<[2], [2], [1], [1], [0, 0, 0, 1, 1, 1], [0], [0]>} : vector<2x8x32xbf16>, vector<2x16x32xbf16>, vector<2x8x16xf32> -> vector<2x8x16xf32>
    "tpu.trace_stop"() : () -> ()
    %cst_108 = arith.constant 0.176776692 : f32
    %276 = vector.broadcast %cst_108 : f32 to vector<2x8x16xf32>
    %277 = arith.mulf %275, %276 : vector<2x8x16xf32>
    %cst_109 = arith.constant dense<0xFF800000> : vector<2x8xf32>
    %278 = vector.multi_reduction <maximumf>, %277, %cst_109 [2] : vector<2x8x16xf32> to vector<2x8xf32>
    %279 = vector.shape_cast %278 : vector<2x8xf32> to vector<2x8x1xf32>
    %280 = vector.broadcast %279 : vector<2x8x1xf32> to vector<2x8x16xf32>
    %281 = arith.subf %277, %280 : vector<2x8x16xf32>
    %282 = math.exp %281 : vector<2x8x16xf32>
    %cst_110 = arith.constant dense<0.000000e+00> : vector<2x8xf32>
    %283 = vector.multi_reduction <add>, %282, %cst_110 [2] : vector<2x8x16xf32> to vector<2x8xf32>
    %284 = vector.shape_cast %283 : vector<2x8xf32> to vector<2x8x1xf32>
    %285 = tpu.reciprocal %284 {approx = true} : vector<2x8x1xf32> -> vector<2x8x1xf32>
    %286 = vector.broadcast %285 : vector<2x8x1xf32> to vector<2x8x16xf32>
    %287 = arith.mulf %282, %286 : vector<2x8x16xf32>
    %288 = arith.truncf %287 : vector<2x8x16xf32> to vector<2x8x16xbf16>
    "tpu.trace_start"() <{level = 10 : i32, message = "bqk,bkd->bqd"}> : () -> ()
    %cst_111 = arith.constant dense<0.000000e+00> : vector<2x8x32xf32>
    %289 = tpu.matmul %288, %274, %cst_111 {dimension_numbers = #tpu.dot_dimension_numbers<[2], [1], [1], [2], [0, 0, 0, 1, 1, 2], [0], [0]>} : vector<2x8x16xbf16>, vector<2x16x32xbf16>, vector<2x8x32xf32> -> vector<2x8x32xf32>
    "tpu.trace_stop"() : () -> ()
    %290 = vector.extract_strided_slice %226 {offsets = [0, 0, 96], sizes = [2, 8, 32], strides = [1, 1, 1]} : vector<2x8x128xf32> to vector<2x8x32xf32>
    %291 = arith.truncf %290 : vector<2x8x32xf32> to vector<2x8x32xbf16>
    %292 = vector.extract_strided_slice %81 {offsets = [0, 0, 96], sizes = [2, 16, 32], strides = [1, 1, 1]} : vector<2x16x128xf32> to vector<2x16x32xf32>
    %293 = arith.truncf %292 : vector<2x16x32xf32> to vector<2x16x32xbf16>
    %294 = vector.extract_strided_slice %83 {offsets = [0, 0, 96], sizes = [2, 16, 32], strides = [1, 1, 1]} : vector<2x16x128xf32> to vector<2x16x32xf32>
    %295 = arith.truncf %294 : vector<2x16x32xf32> to vector<2x16x32xbf16>
    "tpu.trace_start"() <{level = 10 : i32, message = "bqd,bkd->bqk"}> : () -> ()
    %cst_112 = arith.constant dense<0.000000e+00> : vector<2x8x16xf32>
    %296 = tpu.matmul %291, %293, %cst_112 {dimension_numbers = #tpu.dot_dimension_numbers<[2], [2], [1], [1], [0, 0, 0, 1, 1, 1], [0], [0]>} : vector<2x8x32xbf16>, vector<2x16x32xbf16>, vector<2x8x16xf32> -> vector<2x8x16xf32>
    "tpu.trace_stop"() : () -> ()
    %cst_113 = arith.constant 0.176776692 : f32
    %297 = vector.broadcast %cst_113 : f32 to vector<2x8x16xf32>
    %298 = arith.mulf %296, %297 : vector<2x8x16xf32>
    %cst_114 = arith.constant dense<0xFF800000> : vector<2x8xf32>
    %299 = vector.multi_reduction <maximumf>, %298, %cst_114 [2] : vector<2x8x16xf32> to vector<2x8xf32>
    %300 = vector.shape_cast %299 : vector<2x8xf32> to vector<2x8x1xf32>
    %301 = vector.broadcast %300 : vector<2x8x1xf32> to vector<2x8x16xf32>
    %302 = arith.subf %298, %301 : vector<2x8x16xf32>
    %303 = math.exp %302 : vector<2x8x16xf32>
    %cst_115 = arith.constant dense<0.000000e+00> : vector<2x8xf32>
    %304 = vector.multi_reduction <add>, %303, %cst_115 [2] : vector<2x8x16xf32> to vector<2x8xf32>
    %305 = vector.shape_cast %304 : vector<2x8xf32> to vector<2x8x1xf32>
    %306 = tpu.reciprocal %305 {approx = true} : vector<2x8x1xf32> -> vector<2x8x1xf32>
    %307 = vector.broadcast %306 : vector<2x8x1xf32> to vector<2x8x16xf32>
    %308 = arith.mulf %303, %307 : vector<2x8x16xf32>
    %309 = arith.truncf %308 : vector<2x8x16xf32> to vector<2x8x16xbf16>
    "tpu.trace_start"() <{level = 10 : i32, message = "bqk,bkd->bqd"}> : () -> ()
    %cst_116 = arith.constant dense<0.000000e+00> : vector<2x8x32xf32>
    %310 = tpu.matmul %309, %295, %cst_116 {dimension_numbers = #tpu.dot_dimension_numbers<[2], [1], [1], [2], [0, 0, 0, 1, 1, 2], [0], [0]>} : vector<2x8x16xbf16>, vector<2x16x32xbf16>, vector<2x8x32xf32> -> vector<2x8x32xf32>
    "tpu.trace_stop"() : () -> ()
    %311 = tpu.concatenate %247, %268, %289, %310 in 2 : vector<2x8x32xf32>, vector<2x8x32xf32>, vector<2x8x32xf32>, vector<2x8x32xf32> -> vector<2x8x128xf32>
    %312 = vector.shape_cast %311 : vector<2x8x128xf32> to vector<16x128xf32>
    %313 = arith.truncf %312 : vector<16x128xf32> to vector<16x128xbf16>
    %c0_117 = arith.constant 0 : index
    %c0_118 = arith.constant 0 : index
    %c0_119 = arith.constant 0 : index
    %314 = vector.load %arg12[%c0_117, %c0_118, %c0_119] : memref<1x128x128xbf16, #tpu.memory_space<vmem>>, vector<1x128x128xbf16>
    %315 = vector.shape_cast %314 : vector<1x128x128xbf16> to vector<128x128xbf16>
    %cst_120 = arith.constant dense<0.000000e+00> : vector<16x128xf32>
    %316 = tpu.matmul %313, %315, %cst_120 {dimension_numbers = #tpu.dot_dimension_numbers<[1], [0], [0], [1], [0, 0, 1, 1], [], []>} : vector<16x128xbf16>, vector<128x128xbf16>, vector<16x128xf32> -> vector<16x128xf32>
    %c0_121 = arith.constant 0 : index
    %c0_122 = arith.constant 0 : index
    %c0_123 = arith.constant 0 : index
    %317 = vector.load %arg13[%c0_121, %c0_122, %c0_123] : memref<1x1x128xf32, #tpu.memory_space<vmem>>, vector<1x1x128xf32>
    %318 = vector.shape_cast %317 : vector<1x1x128xf32> to vector<1x128xf32>
    %319 = vector.broadcast %318 : vector<1x128xf32> to vector<16x128xf32>
    %320 = arith.addf %316, %319 : vector<16x128xf32>
    %321 = arith.addf %191, %320 : vector<16x128xf32>
    %c0_124 = arith.constant 0 : index
    %c0_125 = arith.constant 0 : index
    %c0_126 = arith.constant 0 : index
    %322 = vector.load %arg20[%c0_124, %c0_125, %c0_126] : memref<1x1x128xf32, #tpu.memory_space<vmem>>, vector<1x1x128xf32>
    %323 = vector.shape_cast %322 : vector<1x1x128xf32> to vector<1x128xf32>
    %c0_127 = arith.constant 0 : index
    %c0_128 = arith.constant 0 : index
    %c0_129 = arith.constant 0 : index
    %324 = vector.load %arg21[%c0_127, %c0_128, %c0_129] : memref<1x1x128xf32, #tpu.memory_space<vmem>>, vector<1x1x128xf32>
    %325 = vector.shape_cast %324 : vector<1x1x128xf32> to vector<1x128xf32>
    %cst_130 = arith.constant dense<0.000000e+00> : vector<16xf32>
    %326 = vector.multi_reduction <add>, %321, %cst_130 [1] : vector<16x128xf32> to vector<16xf32>
    %327 = vector.shape_cast %326 : vector<16xf32> to vector<16x1xf32>
    %cst_131 = arith.constant 1.280000e+02 : f32
    %328 = vector.broadcast %cst_131 : f32 to vector<16x1xf32>
    %329 = arith.divf %327, %328 : vector<16x1xf32>
    %330 = vector.broadcast %329 : vector<16x1xf32> to vector<16x128xf32>
    %331 = arith.subf %321, %330 : vector<16x128xf32>
    %332 = arith.mulf %331, %331 : vector<16x128xf32>
    %cst_132 = arith.constant dense<0.000000e+00> : vector<16xf32>
    %333 = vector.multi_reduction <add>, %332, %cst_132 [1] : vector<16x128xf32> to vector<16xf32>
    %334 = vector.shape_cast %333 : vector<16xf32> to vector<16x1xf32>
    %cst_133 = arith.constant 1.280000e+02 : f32
    %335 = vector.broadcast %cst_133 : f32 to vector<16x1xf32>
    %336 = arith.divf %334, %335 : vector<16x1xf32>
    %337 = vector.broadcast %329 : vector<16x1xf32> to vector<16x128xf32>
    %338 = arith.subf %321, %337 : vector<16x128xf32>
    %cst_134 = arith.constant 9.99999974E-6 : f32
    %339 = vector.broadcast %cst_134 : f32 to vector<16x1xf32>
    %340 = arith.addf %336, %339 : vector<16x1xf32>
    %341 = math.rsqrt %340 : vector<16x1xf32>
    %342 = vector.broadcast %341 : vector<16x1xf32> to vector<16x128xf32>
    %343 = arith.mulf %338, %342 : vector<16x128xf32>
    %344 = vector.broadcast %323 : vector<1x128xf32> to vector<16x128xf32>
    %345 = arith.mulf %343, %344 : vector<16x128xf32>
    %346 = vector.broadcast %325 : vector<1x128xf32> to vector<16x128xf32>
    %347 = arith.addf %345, %346 : vector<16x128xf32>
    %348 = arith.truncf %347 : vector<16x128xf32> to vector<16x128xbf16>
    %c0_135 = arith.constant 0 : index
    %c0_136 = arith.constant 0 : index
    %c0_137 = arith.constant 0 : index
    %349 = vector.load %arg22[%c0_135, %c0_136, %c0_137] : memref<1x128x256xbf16, #tpu.memory_space<vmem>>, vector<1x128x256xbf16>
    %350 = vector.shape_cast %349 : vector<1x128x256xbf16> to vector<128x256xbf16>
    %cst_138 = arith.constant dense<0.000000e+00> : vector<16x256xf32>
    %351 = tpu.matmul %348, %350, %cst_138 {dimension_numbers = #tpu.dot_dimension_numbers<[1], [0], [0], [1], [0, 0, 1, 1], [], []>} : vector<16x128xbf16>, vector<128x256xbf16>, vector<16x256xf32> -> vector<16x256xf32>
    %c0_139 = arith.constant 0 : index
    %c0_140 = arith.constant 0 : index
    %c0_141 = arith.constant 0 : index
    %352 = vector.load %arg23[%c0_139, %c0_140, %c0_141] : memref<1x1x256xf32, #tpu.memory_space<vmem>>, vector<1x1x256xf32>
    %353 = vector.shape_cast %352 : vector<1x1x256xf32> to vector<1x256xf32>
    %354 = vector.broadcast %353 : vector<1x256xf32> to vector<16x256xf32>
    %355 = arith.addf %351, %354 : vector<16x256xf32>
    %cst_142 = arith.constant 5.000000e-01 : f32
    %356 = vector.broadcast %cst_142 : f32 to vector<16x256xf32>
    %357 = arith.mulf %356, %355 : vector<16x256xf32>
    %cst_143 = arith.constant 4.471500e-02 : f32
    %358 = vector.broadcast %cst_143 : f32 to vector<16x256xf32>
    %359 = arith.mulf %358, %355 : vector<16x256xf32>
    %360 = arith.mulf %359, %355 : vector<16x256xf32>
    %361 = arith.mulf %360, %355 : vector<16x256xf32>
    %362 = arith.addf %355, %361 : vector<16x256xf32>
    %cst_144 = arith.constant 0.797884583 : f32
    %363 = vector.broadcast %cst_144 : f32 to vector<16x256xf32>
    %364 = arith.mulf %363, %362 : vector<16x256xf32>
    %365 = math.tanh %364 : vector<16x256xf32>
    %cst_145 = arith.constant 1.000000e+00 : f32
    %366 = vector.broadcast %cst_145 : f32 to vector<16x256xf32>
    %367 = arith.addf %366, %365 : vector<16x256xf32>
    %368 = arith.mulf %357, %367 : vector<16x256xf32>
    %369 = arith.truncf %368 : vector<16x256xf32> to vector<16x256xbf16>
    %c0_146 = arith.constant 0 : index
    %c0_147 = arith.constant 0 : index
    %c0_148 = arith.constant 0 : index
    %370 = vector.load %arg24[%c0_146, %c0_147, %c0_148] : memref<1x256x128xbf16, #tpu.memory_space<vmem>>, vector<1x256x128xbf16>
    %371 = vector.shape_cast %370 : vector<1x256x128xbf16> to vector<256x128xbf16>
    %cst_149 = arith.constant dense<0.000000e+00> : vector<16x128xf32>
    %372 = tpu.matmul %369, %371, %cst_149 {dimension_numbers = #tpu.dot_dimension_numbers<[1], [0], [0], [1], [0, 0, 1, 1], [], []>} : vector<16x256xbf16>, vector<256x128xbf16>, vector<16x128xf32> -> vector<16x128xf32>
    %c0_150 = arith.constant 0 : index
    %c0_151 = arith.constant 0 : index
    %c0_152 = arith.constant 0 : index
    %373 = vector.load %arg25[%c0_150, %c0_151, %c0_152] : memref<1x1x128xf32, #tpu.memory_space<vmem>>, vector<1x1x128xf32>
    %374 = vector.shape_cast %373 : vector<1x1x128xf32> to vector<1x128xf32>
    %375 = vector.broadcast %374 : vector<1x128xf32> to vector<16x128xf32>
    %376 = arith.addf %372, %375 : vector<16x128xf32>
    %377 = arith.addf %321, %376 : vector<16x128xf32>
    %c1_i32 = arith.constant 1 : i32
    %378 = arith.cmpi eq, %arg0, %c1_i32 : i32
    %379 = arith.extui %378 : i1 to i32
    %c0_i32_153 = arith.constant 0 : i32
    %380 = arith.cmpi ne, %379, %c0_i32_153 : i32
    scf.if %380 {
      %c0_156 = arith.constant 0 : index
      %c0_157 = arith.constant 0 : index
      %384 = vector.load %arg26[%c0_156, %c0_157] : memref<1x128xf32, #tpu.memory_space<vmem>>, vector<1x128xf32>
      %c0_158 = arith.constant 0 : index
      %c0_159 = arith.constant 0 : index
      %385 = vector.load %arg27[%c0_158, %c0_159] : memref<1x128xf32, #tpu.memory_space<vmem>>, vector<1x128xf32>
      %cst_160 = arith.constant dense<0.000000e+00> : vector<16xf32>
      %386 = vector.multi_reduction <add>, %377, %cst_160 [1] : vector<16x128xf32> to vector<16xf32>
      %387 = vector.shape_cast %386 : vector<16xf32> to vector<16x1xf32>
      %cst_161 = arith.constant 1.280000e+02 : f32
      %388 = vector.broadcast %cst_161 : f32 to vector<16x1xf32>
      %389 = arith.divf %387, %388 : vector<16x1xf32>
      %390 = vector.broadcast %389 : vector<16x1xf32> to vector<16x128xf32>
      %391 = arith.subf %377, %390 : vector<16x128xf32>
      %392 = arith.mulf %391, %391 : vector<16x128xf32>
      %cst_162 = arith.constant dense<0.000000e+00> : vector<16xf32>
      %393 = vector.multi_reduction <add>, %392, %cst_162 [1] : vector<16x128xf32> to vector<16xf32>
      %394 = vector.shape_cast %393 : vector<16xf32> to vector<16x1xf32>
      %cst_163 = arith.constant 1.280000e+02 : f32
      %395 = vector.broadcast %cst_163 : f32 to vector<16x1xf32>
      %396 = arith.divf %394, %395 : vector<16x1xf32>
      %397 = vector.broadcast %389 : vector<16x1xf32> to vector<16x128xf32>
      %398 = arith.subf %377, %397 : vector<16x128xf32>
      %cst_164 = arith.constant 9.99999974E-6 : f32
      %399 = vector.broadcast %cst_164 : f32 to vector<16x1xf32>
      %400 = arith.addf %396, %399 : vector<16x1xf32>
      %401 = math.rsqrt %400 : vector<16x1xf32>
      %402 = vector.broadcast %401 : vector<16x1xf32> to vector<16x128xf32>
      %403 = arith.mulf %398, %402 : vector<16x128xf32>
      %404 = vector.broadcast %384 : vector<1x128xf32> to vector<16x128xf32>
      %405 = arith.mulf %403, %404 : vector<16x128xf32>
      %406 = vector.broadcast %385 : vector<1x128xf32> to vector<16x128xf32>
      %407 = arith.addf %405, %406 : vector<16x128xf32>
      %408 = vector.shape_cast %407 : vector<16x128xf32> to vector<2x8x128xf32>
      %c0_165 = arith.constant 0 : index
      %c0_166 = arith.constant 0 : index
      %c0_167 = arith.constant 0 : index
      %409 = vector.load %arg28[%c0_165, %c0_166, %c0_167] : memref<2x8x128xf32, #tpu.memory_space<vmem>>, vector<2x8x128xf32>
      tpu.vector_store %arg28[%c0_165, %c0_166, %c0_167], %408 {strides = array<i32>} : memref<2x8x128xf32, #tpu.memory_space<vmem>>, vector<2x8x128xf32>,
    } else {
    }
    %c1_i32_154 = arith.constant 1 : i32
    %381 = arith.cmpi slt, %arg0, %c1_i32_154 : i32
    %382 = arith.extui %381 : i1 to i32
    %c0_i32_155 = arith.constant 0 : i32
    %383 = arith.cmpi ne, %382, %c0_i32_155 : i32
    scf.if %383 {
      %384 = vector.shape_cast %377 : vector<16x128xf32> to vector<2x8x128xf32>
      %c0_156 = arith.constant 0 : index
      %c0_157 = arith.constant 0 : index
      %c0_158 = arith.constant 0 : index
      %385 = vector.load %arg28[%c0_156, %c0_157, %c0_158] : memref<2x8x128xf32, #tpu.memory_space<vmem>>, vector<2x8x128xf32>
      tpu.vector_store %arg28[%c0_156, %c0_157, %c0_158], %384 {strides = array<i32>} : memref<2x8x128xf32, #tpu.memory_space<vmem>>, vector<2x8x128xf32>,
      %c0_159 = arith.constant 0 : index
      %c0_160 = arith.constant 0 : index
      %c0_161 = arith.constant 0 : index
      %386 = vector.load %arg5[%c0_159, %c0_160, %c0_161] : memref<2x8x8xf32, #tpu.memory_space<vmem>>, vector<2x8x8xf32>
      %c0_162 = arith.constant 0 : index
      %c0_163 = arith.constant 0 : index
      %c0_164 = arith.constant 0 : index
      %387 = vector.load %arg6[%c0_162, %c0_163, %c0_164] : memref<1x128x384xbf16, #tpu.memory_space<vmem>>, vector<1x128x128xbf16>
      %388 = vector.shape_cast %387 : vector<1x128x128xbf16> to vector<128x128xbf16>
      %cst_165 = arith.constant dense<0.000000e+00> : vector<16x128xf32>
      %389 = tpu.matmul %59, %388, %cst_165 {dimension_numbers = #tpu.dot_dimension_numbers<[1], [0], [0], [1], [0, 0, 1, 1], [], []>} : vector<16x128xbf16>, vector<128x128xbf16>, vector<16x128xf32> -> vector<16x128xf32>
      %c0_166 = arith.constant 0 : index
      %c0_167 = arith.constant 0 : index
      %c0_168 = arith.constant 0 : index
      %390 = vector.load %arg7[%c0_166, %c0_167, %c0_168] : memref<1x1x384xf32, #tpu.memory_space<vmem>>, vector<1x1x128xf32>
      %391 = vector.shape_cast %390 : vector<1x1x128xf32> to vector<1x128xf32>
      %392 = vector.broadcast %391 : vector<1x128xf32> to vector<16x128xf32>
      %393 = arith.addf %389, %392 : vector<16x128xf32>
      %394 = vector.shape_cast %393 : vector<16x128xf32> to vector<2x8x128xf32>
      %395 = vector.extract_strided_slice %394 {offsets = [0, 0, 0], sizes = [2, 8, 32], strides = [1, 1, 1]} : vector<2x8x128xf32> to vector<2x8x32xf32>
      %396 = arith.truncf %395 : vector<2x8x32xf32> to vector<2x8x32xbf16>
      %397 = vector.extract_strided_slice %68 {offsets = [0, 0, 0], sizes = [2, 8, 32], strides = [1, 1, 1]} : vector<2x8x128xf32> to vector<2x8x32xf32>
      %398 = arith.truncf %397 : vector<2x8x32xf32> to vector<2x8x32xbf16>
      %399 = vector.extract_strided_slice %70 {offsets = [0, 0, 0], sizes = [2, 8, 32], strides = [1, 1, 1]} : vector<2x8x128xf32> to vector<2x8x32xf32>
      %400 = arith.truncf %399 : vector<2x8x32xf32> to vector<2x8x32xbf16>
      "tpu.trace_start"() <{level = 10 : i32, message = "bqd,bkd->bqk"}> : () -> ()
      %cst_169 = arith.constant dense<0.000000e+00> : vector<2x8x8xf32>
      %401 = tpu.matmul %396, %398, %cst_169 {dimension_numbers = #tpu.dot_dimension_numbers<[2], [2], [1], [1], [0, 0, 0, 1, 1, 1], [0], [0]>} : vector<2x8x32xbf16>, vector<2x8x32xbf16>, vector<2x8x8xf32> -> vector<2x8x8xf32>
      "tpu.trace_stop"() : () -> ()
      %cst_170 = arith.constant 0.176776692 : f32
      %402 = vector.broadcast %cst_170 : f32 to vector<2x8x8xf32>
      %403 = arith.mulf %401, %402 : vector<2x8x8xf32>
      %404 = arith.addf %403, %386 : vector<2x8x8xf32>
      %cst_171 = arith.constant dense<0xFF800000> : vector<2x8xf32>
      %405 = vector.multi_reduction <maximumf>, %404, %cst_171 [2] : vector<2x8x8xf32> to vector<2x8xf32>
      %406 = vector.shape_cast %405 : vector<2x8xf32> to vector<2x8x1xf32>
      %407 = vector.broadcast %406 : vector<2x8x1xf32> to vector<2x8x8xf32>
      %408 = arith.subf %404, %407 : vector<2x8x8xf32>
      %409 = math.exp %408 : vector<2x8x8xf32>
      %cst_172 = arith.constant dense<0.000000e+00> : vector<2x8xf32>
      %410 = vector.multi_reduction <add>, %409, %cst_172 [2] : vector<2x8x8xf32> to vector<2x8xf32>
      %411 = vector.shape_cast %410 : vector<2x8xf32> to vector<2x8x1xf32>
      %412 = tpu.reciprocal %411 {approx = true} : vector<2x8x1xf32> -> vector<2x8x1xf32>
      %413 = vector.broadcast %412 : vector<2x8x1xf32> to vector<2x8x8xf32>
      %414 = arith.mulf %409, %413 : vector<2x8x8xf32>
      %415 = arith.truncf %414 : vector<2x8x8xf32> to vector<2x8x8xbf16>
      "tpu.trace_start"() <{level = 10 : i32, message = "bqk,bkd->bqd"}> : () -> ()
      %cst_173 = arith.constant dense<0.000000e+00> : vector<2x8x32xf32>
      %416 = tpu.matmul %415, %400, %cst_173 {dimension_numbers = #tpu.dot_dimension_numbers<[2], [1], [1], [2], [0, 0, 0, 1, 1, 2], [0], [0]>} : vector<2x8x8xbf16>, vector<2x8x32xbf16>, vector<2x8x32xf32> -> vector<2x8x32xf32>
      "tpu.trace_stop"() : () -> ()
      %417 = vector.extract_strided_slice %394 {offsets = [0, 0, 32], sizes = [2, 8, 32], strides = [1, 1, 1]} : vector<2x8x128xf32> to vector<2x8x32xf32>
      %418 = arith.truncf %417 : vector<2x8x32xf32> to vector<2x8x32xbf16>
      %419 = vector.extract_strided_slice %68 {offsets = [0, 0, 32], sizes = [2, 8, 32], strides = [1, 1, 1]} : vector<2x8x128xf32> to vector<2x8x32xf32>
      %420 = arith.truncf %419 : vector<2x8x32xf32> to vector<2x8x32xbf16>
      %421 = vector.extract_strided_slice %70 {offsets = [0, 0, 32], sizes = [2, 8, 32], strides = [1, 1, 1]} : vector<2x8x128xf32> to vector<2x8x32xf32>
      %422 = arith.truncf %421 : vector<2x8x32xf32> to vector<2x8x32xbf16>
      "tpu.trace_start"() <{level = 10 : i32, message = "bqd,bkd->bqk"}> : () -> ()
      %cst_174 = arith.constant dense<0.000000e+00> : vector<2x8x8xf32>
      %423 = tpu.matmul %418, %420, %cst_174 {dimension_numbers = #tpu.dot_dimension_numbers<[2], [2], [1], [1], [0, 0, 0, 1, 1, 1], [0], [0]>} : vector<2x8x32xbf16>, vector<2x8x32xbf16>, vector<2x8x8xf32> -> vector<2x8x8xf32>
      "tpu.trace_stop"() : () -> ()
      %cst_175 = arith.constant 0.176776692 : f32
      %424 = vector.broadcast %cst_175 : f32 to vector<2x8x8xf32>
      %425 = arith.mulf %423, %424 : vector<2x8x8xf32>
      %426 = arith.addf %425, %386 : vector<2x8x8xf32>
      %cst_176 = arith.constant dense<0xFF800000> : vector<2x8xf32>
      %427 = vector.multi_reduction <maximumf>, %426, %cst_176 [2] : vector<2x8x8xf32> to vector<2x8xf32>
      %428 = vector.shape_cast %427 : vector<2x8xf32> to vector<2x8x1xf32>
      %429 = vector.broadcast %428 : vector<2x8x1xf32> to vector<2x8x8xf32>
      %430 = arith.subf %426, %429 : vector<2x8x8xf32>
      %431 = math.exp %430 : vector<2x8x8xf32>
      %cst_177 = arith.constant dense<0.000000e+00> : vector<2x8xf32>
      %432 = vector.multi_reduction <add>, %431, %cst_177 [2] : vector<2x8x8xf32> to vector<2x8xf32>
      %433 = vector.shape_cast %432 : vector<2x8xf32> to vector<2x8x1xf32>
      %434 = tpu.reciprocal %433 {approx = true} : vector<2x8x1xf32> -> vector<2x8x1xf32>
      %435 = vector.broadcast %434 : vector<2x8x1xf32> to vector<2x8x8xf32>
      %436 = arith.mulf %431, %435 : vector<2x8x8xf32>
      %437 = arith.truncf %436 : vector<2x8x8xf32> to vector<2x8x8xbf16>
      "tpu.trace_start"() <{level = 10 : i32, message = "bqk,bkd->bqd"}> : () -> ()
      %cst_178 = arith.constant dense<0.000000e+00> : vector<2x8x32xf32>
      %438 = tpu.matmul %437, %422, %cst_178 {dimension_numbers = #tpu.dot_dimension_numbers<[2], [1], [1], [2], [0, 0, 0, 1, 1, 2], [0], [0]>} : vector<2x8x8xbf16>, vector<2x8x32xbf16>, vector<2x8x32xf32> -> vector<2x8x32xf32>
      "tpu.trace_stop"() : () -> ()
      %439 = vector.extract_strided_slice %394 {offsets = [0, 0, 64], sizes = [2, 8, 32], strides = [1, 1, 1]} : vector<2x8x128xf32> to vector<2x8x32xf32>
      %440 = arith.truncf %439 : vector<2x8x32xf32> to vector<2x8x32xbf16>
      %441 = vector.extract_strided_slice %68 {offsets = [0, 0, 64], sizes = [2, 8, 32], strides = [1, 1, 1]} : vector<2x8x128xf32> to vector<2x8x32xf32>
      %442 = arith.truncf %441 : vector<2x8x32xf32> to vector<2x8x32xbf16>
      %443 = vector.extract_strided_slice %70 {offsets = [0, 0, 64], sizes = [2, 8, 32], strides = [1, 1, 1]} : vector<2x8x128xf32> to vector<2x8x32xf32>
      %444 = arith.truncf %443 : vector<2x8x32xf32> to vector<2x8x32xbf16>
      "tpu.trace_start"() <{level = 10 : i32, message = "bqd,bkd->bqk"}> : () -> ()
      %cst_179 = arith.constant dense<0.000000e+00> : vector<2x8x8xf32>
      %445 = tpu.matmul %440, %442, %cst_179 {dimension_numbers = #tpu.dot_dimension_numbers<[2], [2], [1], [1], [0, 0, 0, 1, 1, 1], [0], [0]>} : vector<2x8x32xbf16>, vector<2x8x32xbf16>, vector<2x8x8xf32> -> vector<2x8x8xf32>
      "tpu.trace_stop"() : () -> ()
      %cst_180 = arith.constant 0.176776692 : f32
      %446 = vector.broadcast %cst_180 : f32 to vector<2x8x8xf32>
      %447 = arith.mulf %445, %446 : vector<2x8x8xf32>
      %448 = arith.addf %447, %386 : vector<2x8x8xf32>
      %cst_181 = arith.constant dense<0xFF800000> : vector<2x8xf32>
      %449 = vector.multi_reduction <maximumf>, %448, %cst_181 [2] : vector<2x8x8xf32> to vector<2x8xf32>
      %450 = vector.shape_cast %449 : vector<2x8xf32> to vector<2x8x1xf32>
      %451 = vector.broadcast %450 : vector<2x8x1xf32> to vector<2x8x8xf32>
      %452 = arith.subf %448, %451 : vector<2x8x8xf32>
      %453 = math.exp %452 : vector<2x8x8xf32>
      %cst_182 = arith.constant dense<0.000000e+00> : vector<2x8xf32>
      %454 = vector.multi_reduction <add>, %453, %cst_182 [2] : vector<2x8x8xf32> to vector<2x8xf32>
      %455 = vector.shape_cast %454 : vector<2x8xf32> to vector<2x8x1xf32>
      %456 = tpu.reciprocal %455 {approx = true} : vector<2x8x1xf32> -> vector<2x8x1xf32>
      %457 = vector.broadcast %456 : vector<2x8x1xf32> to vector<2x8x8xf32>
      %458 = arith.mulf %453, %457 : vector<2x8x8xf32>
      %459 = arith.truncf %458 : vector<2x8x8xf32> to vector<2x8x8xbf16>
      "tpu.trace_start"() <{level = 10 : i32, message = "bqk,bkd->bqd"}> : () -> ()
      %cst_183 = arith.constant dense<0.000000e+00> : vector<2x8x32xf32>
      %460 = tpu.matmul %459, %444, %cst_183 {dimension_numbers = #tpu.dot_dimension_numbers<[2], [1], [1], [2], [0, 0, 0, 1, 1, 2], [0], [0]>} : vector<2x8x8xbf16>, vector<2x8x32xbf16>, vector<2x8x32xf32> -> vector<2x8x32xf32>
      "tpu.trace_stop"() : () -> ()
      %461 = vector.extract_strided_slice %394 {offsets = [0, 0, 96], sizes = [2, 8, 32], strides = [1, 1, 1]} : vector<2x8x128xf32> to vector<2x8x32xf32>
      %462 = arith.truncf %461 : vector<2x8x32xf32> to vector<2x8x32xbf16>
      %463 = vector.extract_strided_slice %68 {offsets = [0, 0, 96], sizes = [2, 8, 32], strides = [1, 1, 1]} : vector<2x8x128xf32> to vector<2x8x32xf32>
      %464 = arith.truncf %463 : vector<2x8x32xf32> to vector<2x8x32xbf16>
      %465 = vector.extract_strided_slice %70 {offsets = [0, 0, 96], sizes = [2, 8, 32], strides = [1, 1, 1]} : vector<2x8x128xf32> to vector<2x8x32xf32>
      %466 = arith.truncf %465 : vector<2x8x32xf32> to vector<2x8x32xbf16>
      "tpu.trace_start"() <{level = 10 : i32, message = "bqd,bkd->bqk"}> : () -> ()
      %cst_184 = arith.constant dense<0.000000e+00> : vector<2x8x8xf32>
      %467 = tpu.matmul %462, %464, %cst_184 {dimension_numbers = #tpu.dot_dimension_numbers<[2], [2], [1], [1], [0, 0, 0, 1, 1, 1], [0], [0]>} : vector<2x8x32xbf16>, vector<2x8x32xbf16>, vector<2x8x8xf32> -> vector<2x8x8xf32>
      "tpu.trace_stop"() : () -> ()
      %cst_185 = arith.constant 0.176776692 : f32
      %468 = vector.broadcast %cst_185 : f32 to vector<2x8x8xf32>
      %469 = arith.mulf %467, %468 : vector<2x8x8xf32>
      %470 = arith.addf %469, %386 : vector<2x8x8xf32>
      %cst_186 = arith.constant dense<0xFF800000> : vector<2x8xf32>
      %471 = vector.multi_reduction <maximumf>, %470, %cst_186 [2] : vector<2x8x8xf32> to vector<2x8xf32>
      %472 = vector.shape_cast %471 : vector<2x8xf32> to vector<2x8x1xf32>
      %473 = vector.broadcast %472 : vector<2x8x1xf32> to vector<2x8x8xf32>
      %474 = arith.subf %470, %473 : vector<2x8x8xf32>
      %475 = math.exp %474 : vector<2x8x8xf32>
      %cst_187 = arith.constant dense<0.000000e+00> : vector<2x8xf32>
      %476 = vector.multi_reduction <add>, %475, %cst_187 [2] : vector<2x8x8xf32> to vector<2x8xf32>
      %477 = vector.shape_cast %476 : vector<2x8xf32> to vector<2x8x1xf32>
      %478 = tpu.reciprocal %477 {approx = true} : vector<2x8x1xf32> -> vector<2x8x1xf32>
      %479 = vector.broadcast %478 : vector<2x8x1xf32> to vector<2x8x8xf32>
      %480 = arith.mulf %475, %479 : vector<2x8x8xf32>
      %481 = arith.truncf %480 : vector<2x8x8xf32> to vector<2x8x8xbf16>
      "tpu.trace_start"() <{level = 10 : i32, message = "bqk,bkd->bqd"}> : () -> ()
      %cst_188 = arith.constant dense<0.000000e+00> : vector<2x8x32xf32>
      %482 = tpu.matmul %481, %466, %cst_188 {dimension_numbers = #tpu.dot_dimension_numbers<[2], [1], [1], [2], [0, 0, 0, 1, 1, 2], [0], [0]>} : vector<2x8x8xbf16>, vector<2x8x32xbf16>, vector<2x8x32xf32> -> vector<2x8x32xf32>
      "tpu.trace_stop"() : () -> ()
      %483 = tpu.concatenate %416, %438, %460, %482 in 2 : vector<2x8x32xf32>, vector<2x8x32xf32>, vector<2x8x32xf32>, vector<2x8x32xf32> -> vector<2x8x128xf32>
      %484 = vector.shape_cast %483 : vector<2x8x128xf32> to vector<16x128xf32>
      %485 = arith.truncf %484 : vector<16x128xf32> to vector<16x128xbf16>
      %c0_189 = arith.constant 0 : index
      %c0_190 = arith.constant 0 : index
      %c0_191 = arith.constant 0 : index
      %486 = vector.load %arg8[%c0_189, %c0_190, %c0_191] : memref<1x128x128xbf16, #tpu.memory_space<vmem>>, vector<1x128x128xbf16>
      %487 = vector.shape_cast %486 : vector<1x128x128xbf16> to vector<128x128xbf16>
      %cst_192 = arith.constant dense<0.000000e+00> : vector<16x128xf32>
      %488 = tpu.matmul %485, %487, %cst_192 {dimension_numbers = #tpu.dot_dimension_numbers<[1], [0], [0], [1], [0, 0, 1, 1], [], []>} : vector<16x128xbf16>, vector<128x128xbf16>, vector<16x128xf32> -> vector<16x128xf32>
      %c0_193 = arith.constant 0 : index
      %c0_194 = arith.constant 0 : index
      %c0_195 = arith.constant 0 : index
      %489 = vector.load %arg9[%c0_193, %c0_194, %c0_195] : memref<1x1x128xf32, #tpu.memory_space<vmem>>, vector<1x1x128xf32>
      %490 = vector.shape_cast %489 : vector<1x1x128xf32> to vector<1x128xf32>
      %491 = vector.broadcast %490 : vector<1x128xf32> to vector<16x128xf32>
      %492 = arith.addf %488, %491 : vector<16x128xf32>
      %493 = arith.addf %5, %492 : vector<16x128xf32>
      %c0_196 = arith.constant 0 : index
      %c0_197 = arith.constant 0 : index
      %c0_198 = arith.constant 0 : index
      %494 = vector.load %arg18[%c0_196, %c0_197, %c0_198] : memref<1x1x128xf32, #tpu.memory_space<vmem>>, vector<1x1x128xf32>
      %495 = vector.shape_cast %494 : vector<1x1x128xf32> to vector<1x128xf32>
      %c0_199 = arith.constant 0 : index
      %c0_200 = arith.constant 0 : index
      %c0_201 = arith.constant 0 : index
      %496 = vector.load %arg19[%c0_199, %c0_200, %c0_201] : memref<1x1x128xf32, #tpu.memory_space<vmem>>, vector<1x1x128xf32>
      %497 = vector.shape_cast %496 : vector<1x1x128xf32> to vector<1x128xf32>
      %cst_202 = arith.constant dense<0.000000e+00> : vector<16xf32>
      %498 = vector.multi_reduction <add>, %493, %cst_202 [1] : vector<16x128xf32> to vector<16xf32>
      %499 = vector.shape_cast %498 : vector<16xf32> to vector<16x1xf32>
      %cst_203 = arith.constant 1.280000e+02 : f32
      %500 = vector.broadcast %cst_203 : f32 to vector<16x1xf32>
      %501 = arith.divf %499, %500 : vector<16x1xf32>
      %502 = vector.broadcast %501 : vector<16x1xf32> to vector<16x128xf32>
      %503 = arith.subf %493, %502 : vector<16x128xf32>
      %504 = arith.mulf %503, %503 : vector<16x128xf32>
      %cst_204 = arith.constant dense<0.000000e+00> : vector<16xf32>
      %505 = vector.multi_reduction <add>, %504, %cst_204 [1] : vector<16x128xf32> to vector<16xf32>
      %506 = vector.shape_cast %505 : vector<16xf32> to vector<16x1xf32>
      %cst_205 = arith.constant 1.280000e+02 : f32
      %507 = vector.broadcast %cst_205 : f32 to vector<16x1xf32>
      %508 = arith.divf %506, %507 : vector<16x1xf32>
      %509 = vector.broadcast %501 : vector<16x1xf32> to vector<16x128xf32>
      %510 = arith.subf %493, %509 : vector<16x128xf32>
      %cst_206 = arith.constant 9.99999974E-6 : f32
      %511 = vector.broadcast %cst_206 : f32 to vector<16x1xf32>
      %512 = arith.addf %508, %511 : vector<16x1xf32>
      %513 = math.rsqrt %512 : vector<16x1xf32>
      %514 = vector.broadcast %513 : vector<16x1xf32> to vector<16x128xf32>
      %515 = arith.mulf %510, %514 : vector<16x128xf32>
      %516 = vector.broadcast %495 : vector<1x128xf32> to vector<16x128xf32>
      %517 = arith.mulf %515, %516 : vector<16x128xf32>
      %518 = vector.broadcast %497 : vector<1x128xf32> to vector<16x128xf32>
      %519 = arith.addf %517, %518 : vector<16x128xf32>
      %520 = arith.truncf %519 : vector<16x128xf32> to vector<16x128xbf16>
      %c0_207 = arith.constant 0 : index
      %c0_208 = arith.constant 0 : index
      %c0_209 = arith.constant 0 : index
      %521 = vector.load %arg10[%c0_207, %c0_208, %c0_209] : memref<1x128x384xbf16, #tpu.memory_space<vmem>>, vector<1x128x128xbf16>
      %522 = vector.shape_cast %521 : vector<1x128x128xbf16> to vector<128x128xbf16>
      %cst_210 = arith.constant dense<0.000000e+00> : vector<16x128xf32>
      %523 = tpu.matmul %520, %522, %cst_210 {dimension_numbers = #tpu.dot_dimension_numbers<[1], [0], [0], [1], [0, 0, 1, 1], [], []>} : vector<16x128xbf16>, vector<128x128xbf16>, vector<16x128xf32> -> vector<16x128xf32>
      %c0_211 = arith.constant 0 : index
      %c0_212 = arith.constant 0 : index
      %c0_213 = arith.constant 0 : index
      %524 = vector.load %arg11[%c0_211, %c0_212, %c0_213] : memref<1x1x384xf32, #tpu.memory_space<vmem>>, vector<1x1x128xf32>
      %525 = vector.shape_cast %524 : vector<1x1x128xf32> to vector<1x128xf32>
      %526 = vector.broadcast %525 : vector<1x128xf32> to vector<16x128xf32>
      %527 = arith.addf %523, %526 : vector<16x128xf32>
      %528 = vector.shape_cast %527 : vector<16x128xf32> to vector<2x8x128xf32>
      %529 = vector.extract_strided_slice %528 {offsets = [0, 0, 0], sizes = [2, 8, 32], strides = [1, 1, 1]} : vector<2x8x128xf32> to vector<2x8x32xf32>
      %530 = arith.truncf %529 : vector<2x8x32xf32> to vector<2x8x32xbf16>
      %531 = vector.extract_strided_slice %81 {offsets = [0, 0, 0], sizes = [2, 16, 32], strides = [1, 1, 1]} : vector<2x16x128xf32> to vector<2x16x32xf32>
      %532 = arith.truncf %531 : vector<2x16x32xf32> to vector<2x16x32xbf16>
      %533 = vector.extract_strided_slice %83 {offsets = [0, 0, 0], sizes = [2, 16, 32], strides = [1, 1, 1]} : vector<2x16x128xf32> to vector<2x16x32xf32>
      %534 = arith.truncf %533 : vector<2x16x32xf32> to vector<2x16x32xbf16>
      "tpu.trace_start"() <{level = 10 : i32, message = "bqd,bkd->bqk"}> : () -> ()
      %cst_214 = arith.constant dense<0.000000e+00> : vector<2x8x16xf32>
      %535 = tpu.matmul %530, %532, %cst_214 {dimension_numbers = #tpu.dot_dimension_numbers<[2], [2], [1], [1], [0, 0, 0, 1, 1, 1], [0], [0]>} : vector<2x8x32xbf16>, vector<2x16x32xbf16>, vector<2x8x16xf32> -> vector<2x8x16xf32>
      "tpu.trace_stop"() : () -> ()
      %cst_215 = arith.constant 0.176776692 : f32
      %536 = vector.broadcast %cst_215 : f32 to vector<2x8x16xf32>
      %537 = arith.mulf %535, %536 : vector<2x8x16xf32>
      %cst_216 = arith.constant dense<0xFF800000> : vector<2x8xf32>
      %538 = vector.multi_reduction <maximumf>, %537, %cst_216 [2] : vector<2x8x16xf32> to vector<2x8xf32>
      %539 = vector.shape_cast %538 : vector<2x8xf32> to vector<2x8x1xf32>
      %540 = vector.broadcast %539 : vector<2x8x1xf32> to vector<2x8x16xf32>
      %541 = arith.subf %537, %540 : vector<2x8x16xf32>
      %542 = math.exp %541 : vector<2x8x16xf32>
      %cst_217 = arith.constant dense<0.000000e+00> : vector<2x8xf32>
      %543 = vector.multi_reduction <add>, %542, %cst_217 [2] : vector<2x8x16xf32> to vector<2x8xf32>
      %544 = vector.shape_cast %543 : vector<2x8xf32> to vector<2x8x1xf32>
      %545 = tpu.reciprocal %544 {approx = true} : vector<2x8x1xf32> -> vector<2x8x1xf32>
      %546 = vector.broadcast %545 : vector<2x8x1xf32> to vector<2x8x16xf32>
      %547 = arith.mulf %542, %546 : vector<2x8x16xf32>
      %548 = arith.truncf %547 : vector<2x8x16xf32> to vector<2x8x16xbf16>
      "tpu.trace_start"() <{level = 10 : i32, message = "bqk,bkd->bqd"}> : () -> ()
      %cst_218 = arith.constant dense<0.000000e+00> : vector<2x8x32xf32>
      %549 = tpu.matmul %548, %534, %cst_218 {dimension_numbers = #tpu.dot_dimension_numbers<[2], [1], [1], [2], [0, 0, 0, 1, 1, 2], [0], [0]>} : vector<2x8x16xbf16>, vector<2x16x32xbf16>, vector<2x8x32xf32> -> vector<2x8x32xf32>
      "tpu.trace_stop"() : () -> ()
      %550 = vector.extract_strided_slice %528 {offsets = [0, 0, 32], sizes = [2, 8, 32], strides = [1, 1, 1]} : vector<2x8x128xf32> to vector<2x8x32xf32>
      %551 = arith.truncf %550 : vector<2x8x32xf32> to vector<2x8x32xbf16>
      %552 = vector.extract_strided_slice %81 {offsets = [0, 0, 32], sizes = [2, 16, 32], strides = [1, 1, 1]} : vector<2x16x128xf32> to vector<2x16x32xf32>
      %553 = arith.truncf %552 : vector<2x16x32xf32> to vector<2x16x32xbf16>
      %554 = vector.extract_strided_slice %83 {offsets = [0, 0, 32], sizes = [2, 16, 32], strides = [1, 1, 1]} : vector<2x16x128xf32> to vector<2x16x32xf32>
      %555 = arith.truncf %554 : vector<2x16x32xf32> to vector<2x16x32xbf16>
      "tpu.trace_start"() <{level = 10 : i32, message = "bqd,bkd->bqk"}> : () -> ()
      %cst_219 = arith.constant dense<0.000000e+00> : vector<2x8x16xf32>
      %556 = tpu.matmul %551, %553, %cst_219 {dimension_numbers = #tpu.dot_dimension_numbers<[2], [2], [1], [1], [0, 0, 0, 1, 1, 1], [0], [0]>} : vector<2x8x32xbf16>, vector<2x16x32xbf16>, vector<2x8x16xf32> -> vector<2x8x16xf32>
      "tpu.trace_stop"() : () -> ()
      %cst_220 = arith.constant 0.176776692 : f32
      %557 = vector.broadcast %cst_220 : f32 to vector<2x8x16xf32>
      %558 = arith.mulf %556, %557 : vector<2x8x16xf32>
      %cst_221 = arith.constant dense<0xFF800000> : vector<2x8xf32>
      %559 = vector.multi_reduction <maximumf>, %558, %cst_221 [2] : vector<2x8x16xf32> to vector<2x8xf32>
      %560 = vector.shape_cast %559 : vector<2x8xf32> to vector<2x8x1xf32>
      %561 = vector.broadcast %560 : vector<2x8x1xf32> to vector<2x8x16xf32>
      %562 = arith.subf %558, %561 : vector<2x8x16xf32>
      %563 = math.exp %562 : vector<2x8x16xf32>
      %cst_222 = arith.constant dense<0.000000e+00> : vector<2x8xf32>
      %564 = vector.multi_reduction <add>, %563, %cst_222 [2] : vector<2x8x16xf32> to vector<2x8xf32>
      %565 = vector.shape_cast %564 : vector<2x8xf32> to vector<2x8x1xf32>
      %566 = tpu.reciprocal %565 {approx = true} : vector<2x8x1xf32> -> vector<2x8x1xf32>
      %567 = vector.broadcast %566 : vector<2x8x1xf32> to vector<2x8x16xf32>
      %568 = arith.mulf %563, %567 : vector<2x8x16xf32>
      %569 = arith.truncf %568 : vector<2x8x16xf32> to vector<2x8x16xbf16>
      "tpu.trace_start"() <{level = 10 : i32, message = "bqk,bkd->bqd"}> : () -> ()
      %cst_223 = arith.constant dense<0.000000e+00> : vector<2x8x32xf32>
      %570 = tpu.matmul %569, %555, %cst_223 {dimension_numbers = #tpu.dot_dimension_numbers<[2], [1], [1], [2], [0, 0, 0, 1, 1, 2], [0], [0]>} : vector<2x8x16xbf16>, vector<2x16x32xbf16>, vector<2x8x32xf32> -> vector<2x8x32xf32>
      "tpu.trace_stop"() : () -> ()
      %571 = vector.extract_strided_slice %528 {offsets = [0, 0, 64], sizes = [2, 8, 32], strides = [1, 1, 1]} : vector<2x8x128xf32> to vector<2x8x32xf32>
      %572 = arith.truncf %571 : vector<2x8x32xf32> to vector<2x8x32xbf16>
      %573 = vector.extract_strided_slice %81 {offsets = [0, 0, 64], sizes = [2, 16, 32], strides = [1, 1, 1]} : vector<2x16x128xf32> to vector<2x16x32xf32>
      %574 = arith.truncf %573 : vector<2x16x32xf32> to vector<2x16x32xbf16>
      %575 = vector.extract_strided_slice %83 {offsets = [0, 0, 64], sizes = [2, 16, 32], strides = [1, 1, 1]} : vector<2x16x128xf32> to vector<2x16x32xf32>
      %576 = arith.truncf %575 : vector<2x16x32xf32> to vector<2x16x32xbf16>
      "tpu.trace_start"() <{level = 10 : i32, message = "bqd,bkd->bqk"}> : () -> ()
      %cst_224 = arith.constant dense<0.000000e+00> : vector<2x8x16xf32>
      %577 = tpu.matmul %572, %574, %cst_224 {dimension_numbers = #tpu.dot_dimension_numbers<[2], [2], [1], [1], [0, 0, 0, 1, 1, 1], [0], [0]>} : vector<2x8x32xbf16>, vector<2x16x32xbf16>, vector<2x8x16xf32> -> vector<2x8x16xf32>
      "tpu.trace_stop"() : () -> ()
      %cst_225 = arith.constant 0.176776692 : f32
      %578 = vector.broadcast %cst_225 : f32 to vector<2x8x16xf32>
      %579 = arith.mulf %577, %578 : vector<2x8x16xf32>
      %cst_226 = arith.constant dense<0xFF800000> : vector<2x8xf32>
      %580 = vector.multi_reduction <maximumf>, %579, %cst_226 [2] : vector<2x8x16xf32> to vector<2x8xf32>
      %581 = vector.shape_cast %580 : vector<2x8xf32> to vector<2x8x1xf32>
      %582 = vector.broadcast %581 : vector<2x8x1xf32> to vector<2x8x16xf32>
      %583 = arith.subf %579, %582 : vector<2x8x16xf32>
      %584 = math.exp %583 : vector<2x8x16xf32>
      %cst_227 = arith.constant dense<0.000000e+00> : vector<2x8xf32>
      %585 = vector.multi_reduction <add>, %584, %cst_227 [2] : vector<2x8x16xf32> to vector<2x8xf32>
      %586 = vector.shape_cast %585 : vector<2x8xf32> to vector<2x8x1xf32>
      %587 = tpu.reciprocal %586 {approx = true} : vector<2x8x1xf32> -> vector<2x8x1xf32>
      %588 = vector.broadcast %587 : vector<2x8x1xf32> to vector<2x8x16xf32>
      %589 = arith.mulf %584, %588 : vector<2x8x16xf32>
      %590 = arith.truncf %589 : vector<2x8x16xf32> to vector<2x8x16xbf16>
      "tpu.trace_start"() <{level = 10 : i32, message = "bqk,bkd->bqd"}> : () -> ()
      %cst_228 = arith.constant dense<0.000000e+00> : vector<2x8x32xf32>
      %591 = tpu.matmul %590, %576, %cst_228 {dimension_numbers = #tpu.dot_dimension_numbers<[2], [1], [1], [2], [0, 0, 0, 1, 1, 2], [0], [0]>} : vector<2x8x16xbf16>, vector<2x16x32xbf16>, vector<2x8x32xf32> -> vector<2x8x32xf32>
      "tpu.trace_stop"() : () -> ()
      %592 = vector.extract_strided_slice %528 {offsets = [0, 0, 96], sizes = [2, 8, 32], strides = [1, 1, 1]} : vector<2x8x128xf32> to vector<2x8x32xf32>
      %593 = arith.truncf %592 : vector<2x8x32xf32> to vector<2x8x32xbf16>
      %594 = vector.extract_strided_slice %81 {offsets = [0, 0, 96], sizes = [2, 16, 32], strides = [1, 1, 1]} : vector<2x16x128xf32> to vector<2x16x32xf32>
      %595 = arith.truncf %594 : vector<2x16x32xf32> to vector<2x16x32xbf16>
      %596 = vector.extract_strided_slice %83 {offsets = [0, 0, 96], sizes = [2, 16, 32], strides = [1, 1, 1]} : vector<2x16x128xf32> to vector<2x16x32xf32>
      %597 = arith.truncf %596 : vector<2x16x32xf32> to vector<2x16x32xbf16>
      "tpu.trace_start"() <{level = 10 : i32, message = "bqd,bkd->bqk"}> : () -> ()
      %cst_229 = arith.constant dense<0.000000e+00> : vector<2x8x16xf32>
      %598 = tpu.matmul %593, %595, %cst_229 {dimension_numbers = #tpu.dot_dimension_numbers<[2], [2], [1], [1], [0, 0, 0, 1, 1, 1], [0], [0]>} : vector<2x8x32xbf16>, vector<2x16x32xbf16>, vector<2x8x16xf32> -> vector<2x8x16xf32>
      "tpu.trace_stop"() : () -> ()
      %cst_230 = arith.constant 0.176776692 : f32
      %599 = vector.broadcast %cst_230 : f32 to vector<2x8x16xf32>
      %600 = arith.mulf %598, %599 : vector<2x8x16xf32>
      %cst_231 = arith.constant dense<0xFF800000> : vector<2x8xf32>
      %601 = vector.multi_reduction <maximumf>, %600, %cst_231 [2] : vector<2x8x16xf32> to vector<2x8xf32>
      %602 = vector.shape_cast %601 : vector<2x8xf32> to vector<2x8x1xf32>
      %603 = vector.broadcast %602 : vector<2x8x1xf32> to vector<2x8x16xf32>
      %604 = arith.subf %600, %603 : vector<2x8x16xf32>
      %605 = math.exp %604 : vector<2x8x16xf32>
      %cst_232 = arith.constant dense<0.000000e+00> : vector<2x8xf32>
      %606 = vector.multi_reduction <add>, %605, %cst_232 [2] : vector<2x8x16xf32> to vector<2x8xf32>
      %607 = vector.shape_cast %606 : vector<2x8xf32> to vector<2x8x1xf32>
      %608 = tpu.reciprocal %607 {approx = true} : vector<2x8x1xf32> -> vector<2x8x1xf32>
      %609 = vector.broadcast %608 : vector<2x8x1xf32> to vector<2x8x16xf32>
      %610 = arith.mulf %605, %609 : vector<2x8x16xf32>
      %611 = arith.truncf %610 : vector<2x8x16xf32> to vector<2x8x16xbf16>
      "tpu.trace_start"() <{level = 10 : i32, message = "bqk,bkd->bqd"}> : () -> ()
      %cst_233 = arith.constant dense<0.000000e+00> : vector<2x8x32xf32>
      %612 = tpu.matmul %611, %597, %cst_233 {dimension_numbers = #tpu.dot_dimension_numbers<[2], [1], [1], [2], [0, 0, 0, 1, 1, 2], [0], [0]>} : vector<2x8x16xbf16>, vector<2x16x32xbf16>, vector<2x8x32xf32> -> vector<2x8x32xf32>
      "tpu.trace_stop"() : () -> ()
      %613 = tpu.concatenate %549, %570, %591, %612 in 2 : vector<2x8x32xf32>, vector<2x8x32xf32>, vector<2x8x32xf32>, vector<2x8x32xf32> -> vector<2x8x128xf32>
      %614 = vector.shape_cast %613 : vector<2x8x128xf32> to vector<16x128xf32>
      %615 = arith.truncf %614 : vector<16x128xf32> to vector<16x128xbf16>
      %c0_234 = arith.constant 0 : index
      %c0_235 = arith.constant 0 : index
      %c0_236 = arith.constant 0 : index
      %616 = vector.load %arg12[%c0_234, %c0_235, %c0_236] : memref<1x128x128xbf16, #tpu.memory_space<vmem>>, vector<1x128x128xbf16>
      %617 = vector.shape_cast %616 : vector<1x128x128xbf16> to vector<128x128xbf16>
      %cst_237 = arith.constant dense<0.000000e+00> : vector<16x128xf32>
      %618 = tpu.matmul %615, %617, %cst_237 {dimension_numbers = #tpu.dot_dimension_numbers<[1], [0], [0], [1], [0, 0, 1, 1], [], []>} : vector<16x128xbf16>, vector<128x128xbf16>, vector<16x128xf32> -> vector<16x128xf32>
      %c0_238 = arith.constant 0 : index
      %c0_239 = arith.constant 0 : index
      %c0_240 = arith.constant 0 : index
      %619 = vector.load %arg13[%c0_238, %c0_239, %c0_240] : memref<1x1x128xf32, #tpu.memory_space<vmem>>, vector<1x1x128xf32>
      %620 = vector.shape_cast %619 : vector<1x1x128xf32> to vector<1x128xf32>
      %621 = vector.broadcast %620 : vector<1x128xf32> to vector<16x128xf32>
      %622 = arith.addf %618, %621 : vector<16x128xf32>
      %623 = arith.addf %493, %622 : vector<16x128xf32>
      %c0_241 = arith.constant 0 : index
      %c0_242 = arith.constant 0 : index
      %c0_243 = arith.constant 0 : index
      %624 = vector.load %arg20[%c0_241, %c0_242, %c0_243] : memref<1x1x128xf32, #tpu.memory_space<vmem>>, vector<1x1x128xf32>
      %625 = vector.shape_cast %624 : vector<1x1x128xf32> to vector<1x128xf32>
      %c0_244 = arith.constant 0 : index
      %c0_245 = arith.constant 0 : index
      %c0_246 = arith.constant 0 : index
      %626 = vector.load %arg21[%c0_244, %c0_245, %c0_246] : memref<1x1x128xf32, #tpu.memory_space<vmem>>, vector<1x1x128xf32>
      %627 = vector.shape_cast %626 : vector<1x1x128xf32> to vector<1x128xf32>
      %cst_247 = arith.constant dense<0.000000e+00> : vector<16xf32>
      %628 = vector.multi_reduction <add>, %623, %cst_247 [1] : vector<16x128xf32> to vector<16xf32>
      %629 = vector.shape_cast %628 : vector<16xf32> to vector<16x1xf32>
      %cst_248 = arith.constant 1.280000e+02 : f32
      %630 = vector.broadcast %cst_248 : f32 to vector<16x1xf32>
      %631 = arith.divf %629, %630 : vector<16x1xf32>
      %632 = vector.broadcast %631 : vector<16x1xf32> to vector<16x128xf32>
      %633 = arith.subf %623, %632 : vector<16x128xf32>
      %634 = arith.mulf %633, %633 : vector<16x128xf32>
      %cst_249 = arith.constant dense<0.000000e+00> : vector<16xf32>
      %635 = vector.multi_reduction <add>, %634, %cst_249 [1] : vector<16x128xf32> to vector<16xf32>
      %636 = vector.shape_cast %635 : vector<16xf32> to vector<16x1xf32>
      %cst_250 = arith.constant 1.280000e+02 : f32
      %637 = vector.broadcast %cst_250 : f32 to vector<16x1xf32>
      %638 = arith.divf %636, %637 : vector<16x1xf32>
      %639 = vector.broadcast %631 : vector<16x1xf32> to vector<16x128xf32>
      %640 = arith.subf %623, %639 : vector<16x128xf32>
      %cst_251 = arith.constant 9.99999974E-6 : f32
      %641 = vector.broadcast %cst_251 : f32 to vector<16x1xf32>
      %642 = arith.addf %638, %641 : vector<16x1xf32>
      %643 = math.rsqrt %642 : vector<16x1xf32>
      %644 = vector.broadcast %643 : vector<16x1xf32> to vector<16x128xf32>
      %645 = arith.mulf %640, %644 : vector<16x128xf32>
      %646 = vector.broadcast %625 : vector<1x128xf32> to vector<16x128xf32>
      %647 = arith.mulf %645, %646 : vector<16x128xf32>
      %648 = vector.broadcast %627 : vector<1x128xf32> to vector<16x128xf32>
      %649 = arith.addf %647, %648 : vector<16x128xf32>
      %650 = arith.truncf %649 : vector<16x128xf32> to vector<16x128xbf16>
      %c0_252 = arith.constant 0 : index
      %c0_253 = arith.constant 0 : index
      %c0_254 = arith.constant 0 : index
      %651 = vector.load %arg22[%c0_252, %c0_253, %c0_254] : memref<1x128x256xbf16, #tpu.memory_space<vmem>>, vector<1x128x256xbf16>
      %652 = vector.shape_cast %651 : vector<1x128x256xbf16> to vector<128x256xbf16>
      %cst_255 = arith.constant dense<0.000000e+00> : vector<16x256xf32>
      %653 = tpu.matmul %650, %652, %cst_255 {dimension_numbers = #tpu.dot_dimension_numbers<[1], [0], [0], [1], [0, 0, 1, 1], [], []>} : vector<16x128xbf16>, vector<128x256xbf16>, vector<16x256xf32> -> vector<16x256xf32>
      %c0_256 = arith.constant 0 : index
      %c0_257 = arith.constant 0 : index
      %c0_258 = arith.constant 0 : index
      %654 = vector.load %arg23[%c0_256, %c0_257, %c0_258] : memref<1x1x256xf32, #tpu.memory_space<vmem>>, vector<1x1x256xf32>
      %655 = vector.shape_cast %654 : vector<1x1x256xf32> to vector<1x256xf32>
      %656 = vector.broadcast %655 : vector<1x256xf32> to vector<16x256xf32>
      %657 = arith.addf %653, %656 : vector<16x256xf32>
      %cst_259 = arith.constant 5.000000e-01 : f32
      %658 = vector.broadcast %cst_259 : f32 to vector<16x256xf32>
      %659 = arith.mulf %658, %657 : vector<16x256xf32>
      %cst_260 = arith.constant 4.471500e-02 : f32
      %660 = vector.broadcast %cst_260 : f32 to vector<16x256xf32>
      %661 = arith.mulf %660, %657 : vector<16x256xf32>
      %662 = arith.mulf %661, %657 : vector<16x256xf32>
      %663 = arith.mulf %662, %657 : vector<16x256xf32>
      %664 = arith.addf %657, %663 : vector<16x256xf32>
      %cst_261 = arith.constant 0.797884583 : f32
      %665 = vector.broadcast %cst_261 : f32 to vector<16x256xf32>
      %666 = arith.mulf %665, %664 : vector<16x256xf32>
      %667 = math.tanh %666 : vector<16x256xf32>
      %cst_262 = arith.constant 1.000000e+00 : f32
      %668 = vector.broadcast %cst_262 : f32 to vector<16x256xf32>
      %669 = arith.addf %668, %667 : vector<16x256xf32>
      %670 = arith.mulf %659, %669 : vector<16x256xf32>
      %671 = arith.truncf %670 : vector<16x256xf32> to vector<16x256xbf16>
      %c0_263 = arith.constant 0 : index
      %c0_264 = arith.constant 0 : index
      %c0_265 = arith.constant 0 : index
      %672 = vector.load %arg24[%c0_263, %c0_264, %c0_265] : memref<1x256x128xbf16, #tpu.memory_space<vmem>>, vector<1x256x128xbf16>
      %673 = vector.shape_cast %672 : vector<1x256x128xbf16> to vector<256x128xbf16>
      %cst_266 = arith.constant dense<0.000000e+00> : vector<16x128xf32>
      %674 = tpu.matmul %671, %673, %cst_266 {dimension_numbers = #tpu.dot_dimension_numbers<[1], [0], [0], [1], [0, 0, 1, 1], [], []>} : vector<16x256xbf16>, vector<256x128xbf16>, vector<16x128xf32> -> vector<16x128xf32>
      %c0_267 = arith.constant 0 : index
      %c0_268 = arith.constant 0 : index
      %c0_269 = arith.constant 0 : index
      %675 = vector.load %arg25[%c0_267, %c0_268, %c0_269] : memref<1x1x128xf32, #tpu.memory_space<vmem>>, vector<1x1x128xf32>
      %676 = vector.shape_cast %675 : vector<1x1x128xf32> to vector<1x128xf32>
      %677 = vector.broadcast %676 : vector<1x128xf32> to vector<16x128xf32>
      %678 = arith.addf %674, %677 : vector<16x128xf32>
      %679 = arith.addf %623, %678 : vector<16x128xf32>
      %c0_270 = arith.constant 0 : index
      %c0_271 = arith.constant 0 : index
      %680 = vector.load %arg29[%c0_270, %c0_271] : memref<16x128xf32, #tpu.memory_space<vmem>>, vector<16x128xf32>
      tpu.vector_store %arg29[%c0_270, %c0_271], %679 {strides = array<i32>} : memref<16x128xf32, #tpu.memory_space<vmem>>, vector<16x128xf32>,
    } else {
    }
    return
  }
  func.func @transform_0(%arg0: i32) -> (i32, i32, i32) {
    %c0_i32 = arith.constant 0 : i32
    %c0_i32_0 = arith.constant 0 : i32
    %c0_i32_1 = arith.constant 0 : i32
    %c0_i32_2 = arith.constant 0 : i32
    return %c0_i32, %c0_i32_0, %c0_i32_1 : i32, i32, i32
  }
  func.func @transform_1(%arg0: i32) -> (i32, i32, i32) {
    %c0_i32 = arith.constant 0 : i32
    %c0_i32_0 = arith.constant 0 : i32
    %c0_i32_1 = arith.constant 0 : i32
    %c0_i32_2 = arith.constant 0 : i32
    return %c0_i32, %c0_i32_0, %c0_i32_1 : i32, i32, i32
  }
  func.func @transform_2(%arg0: i32) -> (i32, i32, i32) {
    %c0_i32 = arith.constant 0 : i32
    %c0_i32_0 = arith.constant 0 : i32
    %c0_i32_1 = arith.constant 0 : i32
    %c0_i32_2 = arith.constant 0 : i32
    return %c0_i32, %c0_i32_0, %c0_i32_1 : i32, i32, i32
  }
  func.func @transform_3(%arg0: i32) -> (i32, i32, i32) {
    %c0_i32 = arith.constant 0 : i32
    %c0_i32_0 = arith.constant 0 : i32
    %c0_i32_1 = arith.constant 0 : i32
    %c0_i32_2 = arith.constant 0 : i32
    return %c0_i32, %c0_i32_0, %c0_i32_1 : i32, i32, i32
  }
  func.func @transform_4(%arg0: i32) -> (i32, i32, i32) {
    %c0_i32 = arith.constant 0 : i32
    %c0_i32_0 = arith.constant 0 : i32
    %c0_i32_1 = arith.constant 0 : i32
    %c0_i32_2 = arith.constant 0 : i32
    return %c0_i32, %c0_i32_0, %c0_i32_1 : i32, i32, i32
  }
  func.func @transform_5(%arg0: i32) -> (i32, i32, i32) {
    %c0_i32 = arith.constant 0 : i32
    %c0_i32_0 = arith.constant 0 : i32
    %c0_i32_1 = arith.constant 0 : i32
    return %arg0, %c0_i32, %c0_i32_0 : i32, i32, i32
  }
  func.func @transform_6(%arg0: i32) -> (i32, i32, i32) {
    %c0_i32 = arith.constant 0 : i32
    %c0_i32_0 = arith.constant 0 : i32
    %c0_i32_1 = arith.constant 0 : i32
    return %arg0, %c0_i32, %c0_i32_0 : i32, i32, i32
  }
  func.func @transform_7(%arg0: i32) -> (i32, i32, i32) {
    %c0_i32 = arith.constant 0 : i32
    %c0_i32_0 = arith.constant 0 : i32
    %c0_i32_1 = arith.constant 0 : i32
    return %arg0, %c0_i32, %c0_i32_0 : i32, i32, i32
  }
  func.func @transform_8(%arg0: i32) -> (i32, i32, i32) {
    %c0_i32 = arith.constant 0 : i32
    %c0_i32_0 = arith.constant 0 : i32
    %c0_i32_1 = arith.constant 0 : i32
    return %arg0, %c0_i32, %c0_i32_0 : i32, i32, i32
  }
  func.func @transform_9(%arg0: i32) -> (i32, i32, i32) {
    %c0_i32 = arith.constant 0 : i32
    %c0_i32_0 = arith.constant 0 : i32
    %c0_i32_1 = arith.constant 0 : i32
    return %arg0, %c0_i32, %c0_i32_0 : i32, i32, i32
  }
  func.func @transform_10(%arg0: i32) -> (i32, i32, i32) {
    %c0_i32 = arith.constant 0 : i32
    %c0_i32_0 = arith.constant 0 : i32
    %c0_i32_1 = arith.constant 0 : i32
    return %arg0, %c0_i32, %c0_i32_0 : i32, i32, i32
  }
  func.func @transform_11(%arg0: i32) -> (i32, i32, i32) {
    %c0_i32 = arith.constant 0 : i32
    %c0_i32_0 = arith.constant 0 : i32
    %c0_i32_1 = arith.constant 0 : i32
    return %arg0, %c0_i32, %c0_i32_0 : i32, i32, i32
  }
  func.func @transform_12(%arg0: i32) -> (i32, i32, i32) {
    %c0_i32 = arith.constant 0 : i32
    %c0_i32_0 = arith.constant 0 : i32
    %c0_i32_1 = arith.constant 0 : i32
    return %arg0, %c0_i32, %c0_i32_0 : i32, i32, i32
  }
  func.func @transform_13(%arg0: i32) -> (i32, i32, i32) {
    %c0_i32 = arith.constant 0 : i32
    %c0_i32_0 = arith.constant 0 : i32
    %c0_i32_1 = arith.constant 0 : i32
    return %arg0, %c0_i32, %c0_i32_0 : i32, i32, i32
  }
  func.func @transform_14(%arg0: i32) -> (i32, i32, i32) {
    %c0_i32 = arith.constant 0 : i32
    %c0_i32_0 = arith.constant 0 : i32
    %c0_i32_1 = arith.constant 0 : i32
    return %arg0, %c0_i32, %c0_i32_0 : i32, i32, i32
  }
  func.func @transform_15(%arg0: i32) -> (i32, i32, i32) {
    %c0_i32 = arith.constant 0 : i32
    %c0_i32_0 = arith.constant 0 : i32
    %c0_i32_1 = arith.constant 0 : i32
    return %arg0, %c0_i32, %c0_i32_0 : i32, i32, i32
  }
  func.func @transform_16(%arg0: i32) -> (i32, i32, i32) {
    %c0_i32 = arith.constant 0 : i32
    %c0_i32_0 = arith.constant 0 : i32
    %c0_i32_1 = arith.constant 0 : i32
    return %arg0, %c0_i32, %c0_i32_0 : i32, i32, i32
  }
  func.func @transform_17(%arg0: i32) -> (i32, i32, i32) {
    %c0_i32 = arith.constant 0 : i32
    %c0_i32_0 = arith.constant 0 : i32
    %c0_i32_1 = arith.constant 0 : i32
    return %arg0, %c0_i32, %c0_i32_0 : i32, i32, i32
  }
  func.func @transform_18(%arg0: i32) -> (i32, i32, i32) {
    %c0_i32 = arith.constant 0 : i32
    %c0_i32_0 = arith.constant 0 : i32
    %c0_i32_1 = arith.constant 0 : i32
    return %arg0, %c0_i32, %c0_i32_0 : i32, i32, i32
  }
  func.func @transform_19(%arg0: i32) -> (i32, i32, i32) {
    %c0_i32 = arith.constant 0 : i32
    %c0_i32_0 = arith.constant 0 : i32
    %c0_i32_1 = arith.constant 0 : i32
    return %arg0, %c0_i32, %c0_i32_0 : i32, i32, i32
  }
  func.func @transform_20(%arg0: i32) -> (i32, i32, i32) {
    %c0_i32 = arith.constant 0 : i32
    %c0_i32_0 = arith.constant 0 : i32
    %c0_i32_1 = arith.constant 0 : i32
    return %arg0, %c0_i32, %c0_i32_0 : i32, i32, i32
  }
  func.func @transform_21(%arg0: i32) -> (i32, i32, i32) {
    %c0_i32 = arith.constant 0 : i32
    %c0_i32_0 = arith.constant 0 : i32
    %c0_i32_1 = arith.constant 0 : i32
    return %arg0, %c0_i32, %c0_i32_0 : i32, i32, i32
  }
  func.func @transform_22(%arg0: i32) -> (i32, i32, i32) {
    %c0_i32 = arith.constant 0 : i32
    %c0_i32_0 = arith.constant 0 : i32
    %c0_i32_1 = arith.constant 0 : i32
    return %arg0, %c0_i32, %c0_i32_0 : i32, i32, i32
  }
  func.func @transform_23(%arg0: i32) -> (i32, i32, i32) {
    %c0_i32 = arith.constant 0 : i32
    %c0_i32_0 = arith.constant 0 : i32
    %c0_i32_1 = arith.constant 0 : i32
    return %arg0, %c0_i32, %c0_i32_0 : i32, i32, i32
  }
  func.func @transform_24(%arg0: i32) -> (i32, i32, i32) {
    %c0_i32 = arith.constant 0 : i32
    %c0_i32_0 = arith.constant 0 : i32
    %c0_i32_1 = arith.constant 0 : i32
    return %arg0, %c0_i32, %c0_i32_0 : i32, i32, i32
  }
  func.func @transform_25(%arg0: i32) -> (i32, i32) {
    %c0_i32 = arith.constant 0 : i32
    %c0_i32_0 = arith.constant 0 : i32
    %c0_i32_1 = arith.constant 0 : i32
    return %c0_i32, %c0_i32_0 : i32, i32
  }
  func.func @transform_26(%arg0: i32) -> (i32, i32) {
    %c0_i32 = arith.constant 0 : i32
    %c0_i32_0 = arith.constant 0 : i32
    %c0_i32_1 = arith.constant 0 : i32
    return %c0_i32, %c0_i32_0 : i32, i32
  }
  func.func @transform_27(%arg0: i32) -> (i32, i32, i32) {
    %c0_i32 = arith.constant 0 : i32
    %c0_i32_0 = arith.constant 0 : i32
    %c0_i32_1 = arith.constant 0 : i32
    %c0_i32_2 = arith.constant 0 : i32
    return %c0_i32, %c0_i32_0, %c0_i32_1 : i32, i32, i32
  }
}

</mosaic_0001>

<bundles_post_ra>
// kernel: tpu_custom_call.1
= control target key start
LH: loop header
LB: loop body
LE: loop exit
PB: predicated region body
PF: predicated region fallthrough
CT: control target
= control target key end

     0   :  { %s9299_s0 = inlined_call_operand.hbm [shape: f32[2,8,128], index: 0, kind: input, shape index: {}]   ;;  %s9300_s1 = inlined_call_operand.hbm [shape: f32[2,8,128], index: 1, kind: input, shape index: {}]   ;;  %s9301_s2 = inlined_call_operand.hbm [shape: bf16[2,16,128], index: 2, kind: input, shape index: {}]   ;;  %s9302_s3 = inlined_call_operand.hbm [shape: f32[2,8,8], index: 3, kind: input, shape index: {}]   ;;  %s9303_s4 = inlined_call_operand.hbm [shape: f32[2,8,8], index: 4, kind: input, shape index: {}]   ;;  %s9304_s5 = inlined_call_operand.hbm [shape: bf16[2,128,384], index: 5, kind: input, shape index: {}]   ;;  %s9305_s6 = inlined_call_operand.hbm [shape: f32[2,1,384], index: 6, kind: input, shape index: {}]   ;;  %s9306_s7 = inlined_call_operand.hbm [shape: bf16[2,128,128], index: 7, kind: input, shape index: {}]   ;;  %s9307_s8 = inlined_call_operand.hbm [shape: f32[2,1,128], index: 8, kind: input, shape index: {}]   ;;  %s9308_s9 = inlined_call_operand.hbm [shape: bf16[2,128,384], index: 9, kind: input, shape index: {}]   ;;  %s9309_s10 = inlined_call_operand.vmem [shape: f32[2,1,384], index: 10, kind: input, shape index: {}]   ;;  %s9310_s11 = inlined_call_operand.hbm [shape: bf16[2,128,128], index: 11, kind: input, shape index: {}]   ;;  %s9311_s12 = inlined_call_operand.hbm [shape: f32[2,1,128], index: 12, kind: input, shape index: {}]   ;;  %s9312_s13 = inlined_call_operand.vmem [shape: f32[2,1,128], index: 13, kind: input, shape index: {}]   ;;  %s9313_s14 = inlined_call_operand.hbm [shape: f32[2,1,128], index: 14, kind: input, shape index: {}]   ;;  %s9314_s15 = inlined_call_operand.vmem [shape: f32[2,1,128], index: 15, kind: input, shape index: {}]   ;;  %s9315_s16 = inlined_call_operand.hbm [shape: f32[2,1,128], index: 16, kind: input, shape index: {}]   ;;  %s9316_s17 = inlined_call_operand.vmem [shape: f32[2,1,128], index: 17, kind: input, shape index: {}]   ;;  %s9317_s18 = inlined_call_operand.hbm [shape: f32[2,1,128], index: 18, kind: input, shape index: {}]   ;;  %s9318_s19 = inlined_call_operand.vmem [shape: f32[2,1,128], index: 19, kind: input, shape index: {}]   ;;  %s9319_s20 = inlined_call_operand.hbm [shape: f32[2,1,128], index: 20, kind: input, shape index: {}]   ;;  %s9320_s21 = inlined_call_operand.hbm [shape: bf16[2,128,256], index: 21, kind: input, shape index: {}]   ;;  %s9321_s22 = inlined_call_operand.vmem [shape: f32[2,1,256], index: 22, kind: input, shape index: {}]   ;;  %s9322_s23 = inlined_call_operand.hbm [shape: bf16[2,256,128], index: 23, kind: input, shape index: {}]   ;;  %s9323_s24 = inlined_call_operand.vmem [shape: f32[2,1,128], index: 24, kind: input, shape index: {}]   ;;  %s9324_s25 = inlined_call_operand.vmem [shape: f32[1,128], index: 25, kind: input, shape index: {}]   ;;  %s9325_s26 = inlined_call_operand.vmem [shape: f32[1,128], index: 26, kind: input, shape index: {}]   ;;  %s9326_s27 = inlined_call_operand.hbm [shape: f32[2,8,128], index: 27, kind: output, shape index: {}]  }
   0x1   :  { %9366 = sst [smem:[#allocation51_spill]] %s9299_s0 }
   0x2   :  { %9367 = sst [smem:[#allocation52_spill]] %s9300_s1 }
   0x3   :  { %9368 = sst [smem:[#allocation53_spill]] %s9301_s2 }
   0x4   :  { %9369 = sst [smem:[#allocation54_spill]] %s9302_s3 }
   0x5   :  { %9370 = sst [smem:[#allocation55_spill]] %s9303_s4 }
   0x6   :  { %9371 = sst [smem:[#allocation56_spill]] %s9304_s5 }
   0x7   :  { %9372 = sst [smem:[#allocation57_spill]] %s9305_s6 }
   0x8   :  { %9373 = sst [smem:[#allocation58_spill]] %s9306_s7 }
   0x9   :  { %9374 = sst [smem:[#allocation59_spill]] %s9307_s8 }
   0xa   :  { %9375 = sst [smem:[#allocation60_spill]] %s9308_s9 }
   0xb   :  { %9376 = sst [smem:[#allocation61_spill]] %s9309_s10 }
   0xc   :  { %9377 = sst [smem:[#allocation62_spill]] %s9310_s11 }
   0xd   :  { %9378 = sst [smem:[#allocation63_spill]] %s9311_s12 }
   0xe   :  { %9379 = sst [smem:[#allocation64_spill]] %s9312_s13 }
   0xf   :  { %9380 = sst [smem:[#allocation65_spill]] %s9313_s14 }
  0x10   :  { %9381 = sst [smem:[#allocation66_spill]] %s9314_s15 }
  0x11   :  { %9382 = sst [smem:[#allocation67_spill]] %s9315_s16 }
  0x12   :  { %9383 = sst [smem:[#allocation68_spill]] %s9316_s17 }
  0x13   :  { %9384 = sst [smem:[#allocation69_spill]] %s9317_s18 }
  0x14   :  { %9385 = sst [smem:[#allocation70_spill]] %s9318_s19 }
  0x15   :  { %9386 = sst [smem:[#allocation71_spill]] %s9319_s20 }
  0x16   :  { %9387 = sst [smem:[#allocation72_spill]] %s9320_s21 }
  0x17   :  { %9388 = sst [smem:[#allocation73_spill]] %s9321_s22 }
  0x18   :  { %9389 = sst [smem:[#allocation74_spill]] %s9322_s23 }
  0x19   :  { %9390 = sst [smem:[#allocation75_spill]] %s9323_s24 }
  0x1a   :  { %9391 = sst [smem:[#allocation76_spill]] %s9324_s25 }
  0x1b   :  { %9392 = sst [smem:[#allocation77_spill]] %s9325_s26 }
  0x1c   :  { %9393 = sst [smem:[#allocation78_spill]] %s9326_s27 }
  0x1d   :  { %32 = vsyncpa [#allocation4], 0 }
  0x1e   :  { %33 = vsyncpa [#allocation7], 0 }
  0x1f   :  { %34 = vsyncpa [#allocation10], 0 }
  0x20   :  { %35 = vsyncpa [#allocation13], 0 }
  0x21   :  { %37 = vsyncpa [#allocation13 + $0x1], 0 }
  0x22   :  { %38 = vsyncpa [#allocation16], 0 }
  0x23   :  { %40 = vsyncpa [#allocation16 + $0x1], 0 }
  0x24   :  { %41 = vsyncpa [#allocation19], 0 }
  0x25   :  { %43 = vsyncpa [#allocation19 + $0x1], 0 }
  0x26   :  { %44 = vsyncpa [#allocation22], 0 }
  0x27   :  { %46 = vsyncpa [#allocation22 + $0x1], 0 }
  0x28   :  { %47 = vsyncpa [#allocation25], 0 }
  0x29   :  { %49 = vsyncpa [#allocation25 + $0x1], 0 }
  0x2a   :  { %50 = vsyncpa [#allocation28], 0 }
  0x2b   :  { %52 = vsyncpa [#allocation28 + $0x1], 0 }
  0x2c   :  { %53 = vsyncpa [#allocation31], 0 }
  0x2d   :  { %55 = vsyncpa [#allocation31 + $0x1], 0 }
  0x2e   :  { %56 = vsyncpa [#allocation5], 0  ;;  %s7834_s7 = smov 0   ;;  %s7836_s4 = smov 0  }
  0x2f   :  { %s7838_s8 = smov 0   ;;  %s7840_s30 = smov 0  }
  0x30 LB: > { %9394 = sst [smem:[#allocation44_spill]] %s7659_s4  ;;  %s7853_s9 = sadd.s32 4294967295, %s7667_s30   ;;  %s7667_s30 = sphi %s7840_s30, %s9473_s30   ;;  %s7663_s8 = sphi %s7838_s8, %s9476_s8   ;;  %s7659_s4 = sphi %s7836_s4, %s9475_s4   ;;  %s7655_s7 = sphi %s7834_s7, %s9474_s7  }
  0x31   : > { %9395 = sst [smem:[#allocation45_spill]] %s7663_s8  ;;  %s7856_s5 = sadd.s32 1, %s7667_s30  }
  0x32   : > { %9396 = sst [smem:[#allocation46_spill]] %s7853_s9  ;;  %s171_s28 = ssub.s32 %s7667_s30, %s7856_s5 }
  0x33   : > { %9397 = sst [smem:[#allocation47_spill]] %s7856_s5  ;;  %s174_s0 = sadd.s32 1, %s7663_s8 }
  0x34   : > { %p172_p0 = scmp.eq.s32.totalorder %s171_s28, 0  ;;  %p181_p1 = scmp.ne.s32.totalorder %s7663_s8, %s7659_s4 }
  0x35   : > { %p182_p2 = scmp.eq.s32.totalorder %s7667_s30, 0  ;;  %p187_p3 = scmp.ne.s32.totalorder %s7659_s4, %s7655_s7 }
  0x36   : > { %s7866_s10 = scalar_select %p172_p0, %s7663_s8, %s174_s0  }
  0x37   : > { %p7868_p4 = por %p182_p2, %p181_p1  ;;  %p188_p5 = scmp.eq.s32.totalorder %s7853_s9, 0 }
  0x38   : > { %9398 = sst [smem:[#allocation48_spill]] %s7866_s10  ;;  %p5730_p6 = scmp.ge.s32.totalorder %s7667_s30, 1 }
  0x39   : > { %p755_p7 = scmp.lt.s32.totalorder %s7667_s30, 3  ;;  %p7877_p8 = por %p188_p5, %p187_p3 }
  0x3a   : > { %p5731_p9 = scmp.ne.s32.totalorder %s7853_s9, 0  ;;  %s9404_s3 = sld [smem:[#allocation52_spill]] }
  0x3b   : > { %s9400_s1 = scalar_select %p7877_p8, 1, 0 }
  0x3c   : > { %p7882_p10 = pnand %p5730_p6, %p755_p7  ;;  %s9405_s10 = sld [smem:[#allocation54_spill]] }
  0x3d   : > { %9401 = sst [smem:[#allocation49_spill]] %s9400_s1  ;;  %s7669_s26 = smov [#allocation6]  }
  0x3e   : > { %s9402_s6 = scalar_select %p7882_p10, 1, 0 }
  0x3f   : > { %p6706_p11 = pneg %p7882_p10  ;;  %s782_s25 = sshll.u32 %s7669_s26, 4  ;;  %s783_s25 = int_to_ptr.vmem [resolvable:$true] %s782_s25 }
  0x40   : > { %9403 = sst [smem:[#allocation50_spill]] %s9402_s6  ;;  %s780_s7 = sshll.u32 %s9404_s3, 4  ;;  %s781_s7 = int_to_ptr.hbm [resolvable:$true] %s780_s7 }
  0x41   : > { %p7896_p12 = pnand %p6706_p11, %p188_p5  ;;  %s7670_s11 = smov 128  }
  0x42   : > { %s808_s5 = sshll.u32 %s9405_s10, 4  ;;  %s7671_s2 = smov 8   ;;  %s809_s5 = int_to_ptr.hbm [resolvable:$true] %s808_s5 }
  0x43   : > { %6712 = dma.hbm_to_vmem [thread:$0]  (!%p7896_p12), %s781_s7, 256, %s783_s25, [#allocation7], %s7670_s11, %s7670_s11, %s7671_s2  }
  0x44   : > { %s7672_s3 = smov [#allocation9]   ;;  %s9407_s0 = sld [smem:[#allocation51_spill]] }
  0x45   : > { %s810_s22 = sshll.u32 %s7672_s3, 4  ;;  %s9408_s17 = sld [smem:[#allocation53_spill]]  ;;  %s811_s22 = int_to_ptr.vmem [resolvable:$true] %s810_s22 }
  0x46   : > { %6718 = dma.hbm_to_vmem [thread:$0]  (!%p7896_p12), %s809_s5, 256, %s811_s22, [#allocation10], %s7670_s11, %s7670_s11, %s7671_s2  }
  0x47   : > { %s7673_s13 = smov [#allocation3]   ;;  %s7674_s25 = smov [#allocation8]  }
  0x48   : > { %s768_s1 = sshll.u32 %s7673_s13, 4  ;;  %s796_s7 = sshll.u32 %s7674_s25, 4  ;;  %s769_s1 = int_to_ptr.vmem [resolvable:$true] %s768_s1  ;;  %s797_s7 = int_to_ptr.vmem [resolvable:$true] %s796_s7 }
  0x49   : > { %s7675_s3 = smov 64   ;;  %s7676_s28 = smov 4  }
  0x4a   : > { %s766_s24 = sshll.u32 %s9407_s0, 4  ;;  %s9409_s5 = sld [smem:[#allocation55_spill]]  ;;  %s767_s24 = int_to_ptr.hbm [resolvable:$true] %s766_s24 }
  0x4b   : > { %s794_s15 = sshll.u32 %s9408_s17, 4  ;;  %s7677_s17 = smov [#allocation11]   ;;  %s795_s15 = int_to_ptr.hbm [resolvable:$true] %s794_s15 }
  0x4c   : > { %6709 = dma.hbm_to_vmem [thread:$0]  (!%p7896_p12), %s767_s24, 256, %s769_s1, [#allocation4], %s7670_s11, %s7670_s11, %s7671_s2  }
  0x4d   : > { %6715 = dma.hbm_to_vmem [thread:$0]  (!%p7896_p12), %s795_s15, 256, %s797_s7, [#allocation7], %s7675_s3, %s7675_s3, %s7676_s28  }
  0x4e   : > { %s824_s19 = sshll.u32 %s7677_s17, 4  ;;  %p5736_p13 = scmp.ge.s32.totalorder %s7667_s30, 2  ;;  %s825_s19 = int_to_ptr.vmem [resolvable:$true] %s824_s19 }
  0x4f   : > { %s7921_s13 = sand.u32 (!%p5736_p13), 1, %s7667_s30   ;;  %s7924_s15 = sand.u32 (!%p5736_p13), 1, %s7663_s8  }
  0x50   : > { %s822_s0 = sshll.u32 %s9409_s5, 4  ;;  %840 = sbr.rel (%p5736_p13) target bundleno = 335 (0x14f), region = 44  ;;  %s823_s0 = int_to_ptr.hbm [resolvable:$true] %s822_s0 }
  0x51   : > { %6721 = dma.hbm_to_vmem [thread:$0]  (!%p7896_p12), %s823_s0, 256, %s825_s19, [#allocation10], %s7670_s11, %s7670_s11, %s7671_s2  }
  0x52   : > { %s9337_s24 = smul.u32 (!%p5736_p13), 192, %s7924_s15  ;;  %s9410_s2 = sld [smem:[#allocation56_spill]] (!%p5736_p13) }
  0x53   : > { %s9338_s1 = smul.u32 (!%p5736_p13), 192, %s7667_s30  ;;  %s9341_s28 = scalar_lea.sflag (!%p5736_p13), [#allocation13], %s7921_s13 }
  0x54   : > { %s848_s25 = scalar_lea.vmem (!%p5736_p13), [#allocation12], %s9337_s24 }
  0x55   : > { %s856_s7 = sshll.u32 %s848_s25, 4  ;;  %s857_s7 = int_to_ptr.vmem [resolvable:$true] %s856_s7 }
  0x58   : > { %s853_s26 = scalar_lea.hbm %s9410_s2, %s9338_s1  ;;  %s7207_s17 = scalar_lea.hbm %s9410_s2, 384 }
  0x59   : > { %s854_s3 = sshll.u32 %s853_s26, 4  ;;  %s855_s3 = int_to_ptr.hbm [resolvable:$true] %s854_s3 }
  0x5a   : > { %s7201_s10 = sshra.s32 %s855_s3, 4  ;;  %s7202_s10 = int_to_ptr.hbm [resolvable:$true] %s7201_s10 }
  0x5b   : > { %s7203_s22 = scalar_lea.hbm %s7202_s10, 192  ;;  %p7208_p3 = scmp.lt.s32.totalorder %s7202_s10, %s9410_s2 }
  0x5c   : > { %p7204_p0 = scmp.ne.s32.totalorder %s7202_s10, %s7203_s22  ;;  %p7209_p6 = scmp.lt.s32.totalorder %s7207_s17, %s7203_s22 }
  0x5e   : > { %p7205_p1 = pnand %p7204_p0, %p7868_p4  ;;  %p7210_p7 = por %p7209_p6, %p7208_p3 }
  0x60   : > { %p7206_p2 = pneg %p7205_p1 }
  0x62   : > { %p7211_p11 = pnand %p7210_p7, %p7206_p2 }
  0x64   : > { %7214 = shalt.err (!%p7211_p11)
}
  0x65   : > { %s9342_s11 = smov 192   ;;  %s9343_s26 = smov 12  }
  0x66   : > { %6666 = dma.hbm_to_vmem [thread:$0]  (%p7868_p4), %s855_s3, 3072, %s857_s7, %s9341_s28, %s9342_s11, %s9342_s11, %s9343_s26  }
  0x67   : > { %s5738_s25 = sshll.u32 %s7924_s15, 6  ;;  %s6481_s10 = sshll.u32 %s7667_s30, 6 }
  0x68   : > { %s9411_s0 = sld [smem:[#allocation58_spill]]  ;;  %s889_s27 = scalar_lea.vmem [#allocation15], %s5738_s25 }
  0x69   : > { %s897_s24 = sshll.u32 %s889_s27, 4  ;;  %s9355_s1 = scalar_lea.sflag [#allocation16], %s7921_s13  ;;  %s898_s24 = int_to_ptr.vmem [resolvable:$true] %s897_s24 }
  0x6e   : > { %s894_s17 = scalar_lea.hbm %s9411_s0, %s6481_s10  ;;  %s7235_s28 = scalar_lea.hbm %s9411_s0, 128 }
  0x6f   : > { %s895_s19 = sshll.u32 %s894_s17, 4  ;;  %s896_s19 = int_to_ptr.hbm [resolvable:$true] %s895_s19 }
  0x70   : > { %s7229_s2 = sshra.s32 %s896_s19, 4  ;;  %s7230_s2 = int_to_ptr.hbm [resolvable:$true] %s7229_s2 }
  0x71   : > { %s7231_s8 = scalar_lea.hbm %s7230_s2, 64  ;;  %p7236_p1 = scmp.lt.s32.totalorder %s7230_s2, %s9411_s0 }
  0x72   : > { %p7232_p12 = scmp.ne.s32.totalorder %s7230_s2, %s7231_s8  ;;  %p7237_p2 = scmp.lt.s32.totalorder %s7235_s28, %s7231_s8 }
  0x74   : > { %p7233_p13 = pnand %p7232_p12, %p7868_p4  ;;  %p7238_p3 = por %p7237_p2, %p7236_p1 }
  0x76   : > { %p7234_p0 = pneg %p7233_p13 }
  0x78   : > { %p7239_p6 = pnand %p7238_p3, %p7234_p0 }
  0x7a   : > { %7242 = shalt.err (!%p7239_p6)
}
  0x7b   : > { %s9351_s5 = smov 64   ;;  %s9353_s17 = smov 4  }
  0x7c   : > { %6668 = dma.hbm_to_vmem [thread:$0]  (%p7868_p4), %s896_s19, 1024, %s898_s24, %s9355_s1, %s9351_s5, %s9351_s5, %s9353_s17  }
  0x7d   : > { %s9412_s2 = sld [smem:[#allocation62_spill]]  ;;  %s7978_s7 = scalar_lea.vmem [#allocation20], %s5738_s25 }
  0x7e   : > { %s9413_s22 = smul.u32 192, %s7667_s30  ;;  %s9414_s4 = sld [smem:[#allocation60_spill]] }
  0x7f   : > { %s9416_s23 = smul.u32 192, %s7924_s15  ;;  %s9358_s27 = scalar_lea.sflag [#allocation19], %s7921_s13 }
  0x81   : > { %s928_s21 = scalar_lea.vmem [#allocation18], %s9416_s23 }
  0x82   : > { %s936_s24 = sshll.u32 %s928_s21, 4  ;;  %s937_s24 = int_to_ptr.vmem [resolvable:$true] %s936_s24 }
  0x83   : > { %s7975_s8 = scalar_lea.hbm %s9412_s2, %s6481_s10 }
  0x84   : > { %s963_s28 = sshll.u32 %s7975_s8, 4  ;;  %s9415_s9 = smov %s9414_s4  ;;  %s8085_s28 = int_to_ptr.hbm [resolvable:$true] %s963_s28 }
  0x85   : > { %s933_s6 = scalar_lea.hbm %s9414_s4, %s9413_s22  ;;  %s7263_s17 = scalar_lea.hbm %s9415_s9, 384 }
  0x86   : > { %s934_s19 = sshll.u32 %s933_s6, 4  ;;  %s935_s19 = int_to_ptr.hbm [resolvable:$true] %s934_s19 }
  0x87   : > { %s7257_s10 = sshra.s32 %s935_s19, 4  ;;  %s7258_s10 = int_to_ptr.hbm [resolvable:$true] %s7257_s10 }
  0x88   : > { %s7259_s11 = scalar_lea.hbm %s7258_s10, 192  ;;  %p7264_p13 = scmp.lt.s32.totalorder %s7258_s10, %s9415_s9 }
  0x89   : > { %p7260_p7 = scmp.ne.s32.totalorder %s7258_s10, %s7259_s11  ;;  %p7265_p0 = scmp.lt.s32.totalorder %s7263_s17, %s7259_s11 }
  0x8b   : > { %p7261_p11 = pnand %p7260_p7, %p7868_p4  ;;  %p7266_p1 = por %p7265_p0, %p7264_p13 }
  0x8d   : > { %p7262_p12 = pneg %p7261_p11 }
  0x8f   : > { %p7267_p2 = pnand %p7266_p1, %p7262_p12 }
  0x91   : > { %7270 = shalt.err (!%p7267_p2)
}
  0x92   : > { %s9417_s21 = smov 12   ;;  %s9418_s23 = smov 192  }
  0x93   : > { %6670 = dma.hbm_to_vmem [thread:$0]  (%p7868_p4), %s935_s19, 3072, %s937_s24, %s9358_s27, %s9418_s23, %s9418_s23, %s9417_s21  }
  0x94   : > { %s9419_s12 = sld [smem:[#allocation63_spill]]  ;;  %s978_s22 = scalar_lea.vmem [#allocation21], %s7924_s15 }
  0x95   : > { %s985_s10 = sshll.u32 %s978_s22, 4  ;;  %s9357_s11 = scalar_lea.sflag [#allocation22], %s7921_s13  ;;  %s986_s10 = int_to_ptr.vmem [resolvable:$true] %s985_s10 }
  0x9a   : > { %s981_s5 = scalar_lea.hbm %s9419_s12, %s7667_s30  ;;  %s7291_s24 = scalar_lea.hbm %s9419_s12, 2 }
  0x9b   : > { %s983_s17 = sshll.u32 %s981_s5, 4  ;;  %s984_s17 = int_to_ptr.hbm [resolvable:$true] %s983_s17 }
  0x9c   : > { %s7285_s25 = sshra.s32 %s984_s17, 4  ;;  %s7286_s25 = int_to_ptr.hbm [resolvable:$true] %s7285_s25 }
  0x9d   : > { %s7287_s26 = scalar_lea.hbm %s7286_s25, 1  ;;  %p7292_p11 = scmp.lt.s32.totalorder %s7286_s25, %s9419_s12 }
  0x9e   : > { %p7288_p3 = scmp.ne.s32.totalorder %s7286_s25, %s7287_s26  ;;  %p7293_p12 = scmp.lt.s32.totalorder %s7291_s24, %s7287_s26 }
  0xa0   : > { %p7289_p6 = pnand %p7288_p3, %p7868_p4  ;;  %p7294_p13 = por %p7293_p12, %p7292_p11 }
  0xa2   : > { %p7290_p7 = pneg %p7289_p6 }
  0xa4   : > { %p7295_p0 = pnand %p7294_p13, %p7290_p7 }
  0xa6   : > { %7298 = shalt.err (!%p7295_p0)
}
  0xa7   : > { %6672 = dma.hbm_to_vmem [thread:$0]  (%p7868_p4), %s984_s17, 16, %s986_s10, %s9357_s11  }
  0xa8   : > { %s9420_s16 = sld [smem:[#allocation67_spill]]  ;;  %s1024_s0 = scalar_lea.vmem [#allocation24], %s7924_s15 }
  0xa9   : > { %s1031_s5 = sshll.u32 %s1024_s0, 4  ;;  %s9356_s25 = scalar_lea.sflag [#allocation25], %s7921_s13  ;;  %s1032_s5 = int_to_ptr.vmem [resolvable:$true] %s1031_s5 }
  0xae   : > { %s1027_s6 = scalar_lea.hbm %s9420_s16, %s7667_s30  ;;  %s7319_s17 = scalar_lea.hbm %s9420_s16, 2 }
  0xaf   : > { %s1029_s22 = sshll.u32 %s1027_s6, 4  ;;  %s1030_s22 = int_to_ptr.hbm [resolvable:$true] %s1029_s22 }
  0xb0   : > { %s7313_s26 = sshra.s32 %s1030_s22, 4  ;;  %s7314_s26 = int_to_ptr.hbm [resolvable:$true] %s7313_s26 }
  0xb1   : > { %s7315_s4 = scalar_lea.hbm %s7314_s26, 1  ;;  %p7320_p6 = scmp.lt.s32.totalorder %s7314_s26, %s9420_s16 }
  0xb2   : > { %p7316_p1 = scmp.ne.s32.totalorder %s7314_s26, %s7315_s4  ;;  %p7321_p7 = scmp.lt.s32.totalorder %s7319_s17, %s7315_s4 }
  0xb4   : > { %p7317_p2 = pnand %p7316_p1, %p7868_p4  ;;  %p7322_p11 = por %p7321_p7, %p7320_p6 }
  0xb6   : > { %p7318_p3 = pneg %p7317_p2 }
  0xb8   : > { %p7323_p12 = pnand %p7322_p11, %p7318_p3 }
  0xba   : > { %7326 = shalt.err (!%p7323_p12)
}
  0xbb   : > { %6674 = dma.hbm_to_vmem [thread:$0]  (%p7868_p4), %s1030_s22, 16, %s1032_s5, %s9356_s25  }
  0xbc   : > { %s9421_s20 = sld [smem:[#allocation71_spill]]  ;;  %s1070_s24 = scalar_lea.vmem [#allocation27], %s7924_s15 }
  0xbd   : > { %s1077_s26 = sshll.u32 %s1070_s24, 4  ;;  %s9359_s4 = scalar_lea.sflag [#allocation28], %s7921_s13  ;;  %s1078_s26 = int_to_ptr.vmem [resolvable:$true] %s1077_s26 }
  0xc2   : > { %s1073_s6 = scalar_lea.hbm %s9421_s20, %s7667_s30  ;;  %s7347_s5 = scalar_lea.hbm %s9421_s20, 2 }
  0xc3   : > { %s1075_s0 = sshll.u32 %s1073_s6, 4  ;;  %s1076_s0 = int_to_ptr.hbm [resolvable:$true] %s1075_s0 }
  0xc4   : > { %s7341_s19 = sshra.s32 %s1076_s0, 4  ;;  %s7342_s19 = int_to_ptr.hbm [resolvable:$true] %s7341_s19 }
  0xc5   : > { %s7343_s17 = scalar_lea.hbm %s7342_s19, 1  ;;  %p7348_p2 = scmp.lt.s32.totalorder %s7342_s19, %s9421_s20 }
  0xc6   : > { %p7344_p13 = scmp.ne.s32.totalorder %s7342_s19, %s7343_s17  ;;  %p7349_p3 = scmp.lt.s32.totalorder %s7347_s5, %s7343_s17 }
  0xc8   : > { %p7345_p0 = pnand %p7344_p13, %p7868_p4  ;;  %p7350_p6 = por %p7349_p3, %p7348_p2 }
  0xca   : > { %p7346_p1 = pneg %p7345_p0 }
  0xcc   : > { %p7351_p7 = pnand %p7350_p6, %p7346_p1 }
  0xce   : > { %7354 = shalt.err (!%p7351_p7)
}
  0xcf   : > { %6676 = dma.hbm_to_vmem [thread:$0]  (%p7868_p4), %s1076_s0, 16, %s1078_s26, %s9359_s4  }
  0xd0   : > { %s6649_s1 = smul.u32 3, %s7924_s15  ;;  %s9422_s21 = sld [smem:[#allocation59_spill]] }
  0xd1   : > { %s6650_s6 = smul.u32 3, %s7667_s30  ;;  %s9423_s23 = sld [smem:[#allocation57_spill]] }
  0xd2   : > { %s870_s11 = scalar_lea.vmem [#allocation14], %s6649_s1 }
  0xd3   : > { %s878_s27 = sshll.u32 %s870_s11, 4  ;;  %s879_s27 = int_to_ptr.vmem [resolvable:$true] %s878_s27 }
  0xd6   : > { %s913_s22 = scalar_lea.hbm %s9422_s21, %s7667_s30 }
  0xd7   : > { %s8064_s19 = sshll.u32 %s913_s22, 4  ;;  %s874_s25 = scalar_lea.hbm %s9423_s23, %s6650_s6  ;;  %s916_s19 = int_to_ptr.hbm [resolvable:$true] %s8064_s19 }
  0xd8   : > { %s876_s3 = sshll.u32 %s874_s25, 4  ;;  %s7375_s22 = scalar_lea.hbm %s9423_s23, 6  ;;  %s877_s3 = int_to_ptr.hbm [resolvable:$true] %s876_s3 }
  0xd9   : > { %s7369_s0 = sshra.s32 %s877_s3, 4  ;;  %s7370_s0 = int_to_ptr.hbm [resolvable:$true] %s7369_s0 }
  0xda   : > { %s7371_s26 = scalar_lea.hbm %s7370_s0, 3  ;;  %p7376_p0 = scmp.lt.s32.totalorder %s7370_s0, %s9423_s23 }
  0xdb   : > { %p7372_p11 = scmp.ne.s32.totalorder %s7370_s0, %s7371_s26  ;;  %p7377_p1 = scmp.lt.s32.totalorder %s7375_s22, %s7371_s26 }
  0xdd   : > { %p7373_p12 = pnand %p7372_p11, %p7868_p4  ;;  %p7378_p2 = por %p7377_p1, %p7376_p0 }
  0xdf   : > { %p7374_p13 = pneg %p7373_p12 }
  0xe1   : > { %p7379_p3 = pnand %p7378_p2, %p7374_p13 }
  0xe3   : > { %7382 = shalt.err (!%p7379_p3)
}
  0xe4   : > { %s9424_s11 = scalar_lea.sflag [#allocation13], %s7921_s13  ;;  %s910_s25 = scalar_lea.vmem [#allocation17], %s7924_s15 }
  0xe5   : > { %6667 = dma.hbm_to_vmem [thread:$0]  (%p7868_p4), %s877_s3, 48, %s879_s27, %s9424_s11  }
  0xe6   : > { %s917_s1 = sshll.u32 %s910_s25, 4  ;;  %s9425_s6 = sshll.u32 %s7978_s7, 4  ;;  %s918_s1 = int_to_ptr.vmem [resolvable:$true] %s917_s1  ;;  %s8089_s6 = int_to_ptr.vmem [resolvable:$true] %s9425_s6 }
  0xe7   : > { %s7397_s0 = sshra.s32 %s916_s19, 4  ;;  %s7403_s3 = scalar_lea.hbm %s9422_s21, 2  ;;  %s7398_s0 = int_to_ptr.hbm [resolvable:$true] %s7397_s0 }
  0xe8   : > { %s7399_s26 = scalar_lea.hbm %s7398_s0, 1  ;;  %p7404_p12 = scmp.lt.s32.totalorder %s7398_s0, %s9422_s21 }
  0xe9   : > { %p7400_p6 = scmp.ne.s32.totalorder %s7398_s0, %s7399_s26  ;;  %p7405_p13 = scmp.lt.s32.totalorder %s7403_s3, %s7399_s26 }
  0xeb   : > { %p7401_p7 = pnand %p7400_p6, %p7868_p4  ;;  %p7406_p0 = por %p7405_p13, %p7404_p12 }
  0xed   : > { %p7402_p11 = pneg %p7401_p7 }
  0xef   : > { %p7407_p1 = pnand %p7406_p0, %p7402_p11 }
  0xf1   : > { %7410 = shalt.err (!%p7407_p1)
}
  0xf2   : > { %s9426_s7 = scalar_lea.sflag [#allocation16], %s7921_s13  ;;  %s7425_s22 = sshra.s32 %s8085_s28, 4  ;;  %s7426_s22 = int_to_ptr.hbm [resolvable:$true] %s7425_s22 }
  0xf3   : > { %6669 = dma.hbm_to_vmem [thread:$0]  (%p7868_p4), %s916_s19, 16, %s918_s1, %s9426_s7  }
  0xf4   : > { %s7427_s17 = scalar_lea.hbm %s7426_s22, 64  ;;  %s7431_s25 = scalar_lea.hbm %s9412_s2, 128 }
  0xf5   : > { %p7428_p2 = scmp.ne.s32.totalorder %s7426_s22, %s7427_s17  ;;  %p7432_p7 = scmp.lt.s32.totalorder %s7426_s22, %s9412_s2 }
  0xf6   : > { %p7433_p11 = scmp.lt.s32.totalorder %s7431_s25, %s7427_s17 }
  0xf7   : > { %p7429_p3 = pnand %p7428_p2, %p7868_p4 }
  0xf8   : > { %p7434_p12 = por %p7433_p11, %p7432_p7 }
  0xf9   : > { %p7430_p6 = pneg %p7429_p3 }
  0xfb   : > { %p7435_p13 = pnand %p7434_p12, %p7430_p6 }
  0xfd   : > { %7438 = shalt.err (!%p7435_p13)
}
  0xfe   : > { %s9427_s19 = smov 4   ;;  %s9428_s1 = smov 64  }
  0xff   : > { %s9429_s24 = scalar_lea.sflag [#allocation19], %s7921_s13  ;;  %s9430_s14 = sld [smem:[#allocation65_spill]] }
 0x100   : > { %6671 = dma.hbm_to_vmem [thread:$0]  (%p7868_p4), %s8085_s28, 1024, %s8089_s6, %s9429_s24, %s9428_s1, %s9428_s1, %s9427_s19  }
 0x101   : > { %s1001_s7 = scalar_lea.vmem [#allocation23], %s7924_s15 }
 0x102   : > { %s1008_s22 = sshll.u32 %s1001_s7, 4  ;;  %s1009_s22 = int_to_ptr.vmem [resolvable:$true] %s1008_s22 }
 0x105   : > { %s1004_s27 = scalar_lea.hbm %s9430_s14, %s7667_s30  ;;  %s7459_s28 = scalar_lea.hbm %s9430_s14, 2 }
 0x106   : > { %s1006_s8 = sshll.u32 %s1004_s27, 4  ;;  %s1007_s8 = int_to_ptr.hbm [resolvable:$true] %s1006_s8 }
 0x107   : > { %s7453_s17 = sshra.s32 %s1007_s8, 4  ;;  %s7454_s17 = int_to_ptr.hbm [resolvable:$true] %s7453_s17 }
 0x108   : > { %s7455_s5 = scalar_lea.hbm %s7454_s17, 1  ;;  %p7460_p3 = scmp.lt.s32.totalorder %s7454_s17, %s9430_s14 }
 0x109   : > { %p7456_p0 = scmp.ne.s32.totalorder %s7454_s17, %s7455_s5  ;;  %p7461_p6 = scmp.lt.s32.totalorder %s7459_s28, %s7455_s5 }
 0x10b   : > { %p7457_p1 = pnand %p7456_p0, %p7868_p4  ;;  %p7462_p7 = por %p7461_p6, %p7460_p3 }
 0x10d   : > { %p7458_p2 = pneg %p7457_p1 }
 0x10f   : > { %p7463_p11 = pnand %p7462_p7, %p7458_p2 }
 0x111   : > { %7466 = shalt.err (!%p7463_p11)
}
 0x112   : > { %s9431_s26 = scalar_lea.sflag [#allocation22], %s7921_s13  ;;  %s9432_s18 = sld [smem:[#allocation69_spill]] }
 0x113   : > { %6673 = dma.hbm_to_vmem [thread:$0]  (%p7868_p4), %s1007_s8, 16, %s1009_s22, %s9431_s26  }
 0x114   : > { %s1047_s7 = scalar_lea.vmem [#allocation26], %s7924_s15 }
 0x115   : > { %s1054_s11 = sshll.u32 %s1047_s7, 4  ;;  %s1055_s11 = int_to_ptr.vmem [resolvable:$true] %s1054_s11 }
 0x118   : > { %s1050_s3 = scalar_lea.hbm %s9432_s18, %s7667_s30  ;;  %s7487_s8 = scalar_lea.hbm %s9432_s18, 2 }
 0x119   : > { %s1052_s27 = sshll.u32 %s1050_s3, 4  ;;  %s1053_s27 = int_to_ptr.hbm [resolvable:$true] %s1052_s27 }
 0x11a   : > { %s7481_s17 = sshra.s32 %s1053_s27, 4  ;;  %s7482_s17 = int_to_ptr.hbm [resolvable:$true] %s7481_s17 }
 0x11b   : > { %s7483_s5 = scalar_lea.hbm %s7482_s17, 1  ;;  %p7488_p1 = scmp.lt.s32.totalorder %s7482_s17, %s9432_s18 }
 0x11c   : > { %p7484_p12 = scmp.ne.s32.totalorder %s7482_s17, %s7483_s5  ;;  %p7489_p2 = scmp.lt.s32.totalorder %s7487_s8, %s7483_s5 }
 0x11e   : > { %p7485_p13 = pnand %p7484_p12, %p7868_p4  ;;  %p7490_p3 = por %p7489_p2, %p7488_p1 }
 0x120   : > { %p7486_p0 = pneg %p7485_p13 }
 0x122   : > { %p7491_p6 = pnand %p7490_p3, %p7486_p0 }
 0x124   : > { %7494 = shalt.err (!%p7491_p6)
}
 0x125   : > { %s9433_s0 = scalar_lea.sflag [#allocation25], %s7921_s13  ;;  %s5745_s26 = sshll.u32 %s7924_s15, 7 }
 0x126   : > { %6675 = dma.hbm_to_vmem [thread:$0]  (%p7868_p4), %s1053_s27, 16, %s1055_s11, %s9433_s0  }
 0x127   : > { %s6483_s24 = sshll.u32 %s7667_s30, 7  ;;  %s9434_s7 = sld [smem:[#allocation72_spill]] }
 0x128   : > { %s1088_s17 = scalar_lea.vmem [#allocation29], %s5745_s26 }
 0x129   : > { %s1096_s5 = sshll.u32 %s1088_s17, 4  ;;  %s1097_s5 = int_to_ptr.vmem [resolvable:$true] %s1096_s5 }
 0x12d   : > { %s9435_s25 = smov %s9434_s7  ;;  %s1093_s28 = scalar_lea.hbm %s9434_s7, %s6483_s24 }
 0x12e   : > { %s1094_s22 = sshll.u32 %s1093_s28, 4  ;;  %s7515_s30 = scalar_lea.hbm %s9435_s25, 256  ;;  %s1095_s22 = int_to_ptr.hbm [resolvable:$true] %s1094_s22 }
 0x12f   : > { %s7509_s8 = sshra.s32 %s1095_s22, 4  ;;  %s7510_s8 = int_to_ptr.hbm [resolvable:$true] %s7509_s8 }
 0x130   : > { %s7511_s6 = scalar_lea.hbm %s7510_s8, 128  ;;  %p7516_p13 = scmp.lt.s32.totalorder %s7510_s8, %s9435_s25 }
 0x131   : > { %p7512_p7 = scmp.ne.s32.totalorder %s7510_s8, %s7511_s6  ;;  %p7517_p0 = scmp.lt.s32.totalorder %s7515_s30, %s7511_s6 }
 0x133   : > { %p7513_p11 = pnand %p7512_p7, %p7868_p4  ;;  %p7518_p1 = por %p7517_p0, %p7516_p13 }
 0x135   : > { %p7514_p12 = pneg %p7513_p11 }
 0x137   : > { %p7519_p2 = pnand %p7518_p1, %p7514_p12 }
 0x139   : > { %7522 = shalt.err (!%p7519_p2)
}
 0x13a   : > { %s7682_s10 = smov 128   ;;  %s7683_s3 = smov 8  }
 0x13b   : > { %s9436_s7 = scalar_lea.sflag [#allocation28], %s7921_s13  ;;  %s9437_s17 = sld [smem:[#allocation74_spill]] }
 0x13c   : > { %6677 = dma.hbm_to_vmem [thread:$0]  (%p7868_p4), %s1095_s22, 2048, %s1097_s5, %s9436_s7, %s7682_s10, %s7682_s10, %s7683_s3  }
 0x13d   : > { %s1117_s2 = scalar_lea.vmem [#allocation30], %s5745_s26  ;;  %s1114_s6 = scalar_lea.sflag [#allocation31], %s7924_s15 }
 0x13e   : > { %s1125_s11 = sshll.u32 %s1117_s2, 4  ;;  %s1126_s11 = int_to_ptr.vmem [resolvable:$true] %s1125_s11 }
 0x141   : > { %s1122_s27 = scalar_lea.hbm %s9437_s17, %s6483_s24  ;;  %s7543_s22 = scalar_lea.hbm %s9437_s17, 256 }
 0x142   : > { %s1123_s8 = sshll.u32 %s1122_s27, 4  ;;  %s1124_s8 = int_to_ptr.hbm [resolvable:$true] %s1123_s8 }
 0x143   : > { %s7537_s30 = sshra.s32 %s1124_s8, 4  ;;  %s7538_s30 = int_to_ptr.hbm [resolvable:$true] %s7537_s30 }
 0x144   : > { %s7539_s0 = scalar_lea.hbm %s7538_s30, 128  ;;  %p7544_p11 = scmp.lt.s32.totalorder %s7538_s30, %s9437_s17 }
 0x145   : > { %p7540_p3 = scmp.ne.s32.totalorder %s7538_s30, %s7539_s0  ;;  %p7545_p12 = scmp.lt.s32.totalorder %s7543_s22, %s7539_s0 }
 0x147   : > { %p7541_p6 = pnand %p7540_p3, %p7868_p4  ;;  %p7546_p13 = por %p7545_p12, %p7544_p11 }
 0x149   : > { %p7542_p7 = pneg %p7541_p6 }
 0x14b   : > { %p7547_p0 = pnand %p7546_p13, %p7542_p7 }
 0x14d   : > { %7550 = shalt.err (!%p7547_p0)
}
 0x14e   : > { %6678 = dma.hbm_to_vmem [thread:$0]  (%p7868_p4), %s1124_s8, 2048, %s1126_s11, %s1114_s6, %s9428_s1, %s9428_s1, %s9427_s19  }
 0x14f PF: > { %1143 = sbr.rel (%p7882_p10) target bundleno = 7030 (0x1b76), region = 128  ;;  %s9439_s9 = sld [smem:[#allocation46_spill]] (!%p7882_p10) }
 0x154   : > { %7610 = dma.done.wait (%p188_p5), [#allocation4], 256  }
 0x155   : > { %7612 = vsyncadd (%p188_p5), [#allocation4], 4294967040 }
 0x156   : > { %7614 = dma.done.wait (%p188_p5), [#allocation7], 512  }
 0x157   : > { %7616 = vsyncadd (%p188_p5), [#allocation7], 4294966784 }
 0x158   : > { %7618 = dma.done.wait (%p188_p5), [#allocation10], 512  }
 0x159   : > { %7620 = vsyncadd (%p188_p5), [#allocation10], 4294966784  ;;  %s9440_s29 = sld [smem:[#allocation44_spill]]  ;;  %s8208_s19 = sand.u32 1, %s9439_s9  }
 0x15a   : > { %s1171_s24 = scalar_lea.sflag [#allocation13], %s8208_s19 }
 0x15f   : > { %s8211_s1 = sand.u32 1, %s9440_s29  }
 0x160   : > { %s6653_s26 = smul.u32 192, %s8211_s1 }
 0x162   : > { %s8215_s3 = scalar_lea.vmem [#allocation12], %s6653_s26 }
 0x163   : > { %7622 = dma.done.wait (%p7877_p8), %s1171_s24, 3120  }
 0x164   : > { %7624 = vsyncadd (%p7877_p8), %s1171_s24, 4294964176  ;;  %s6654_s7 = smul.u32 3, %s8211_s1  ;;  %s5757_s28 = sshll.u32 %s8211_s1, 6 }
 0x165   : > { %s1191_s27 = scalar_lea.sflag [#allocation16], %s8208_s19  ;;  %s8226_s11 = scalar_lea.vmem [#allocation15], %s5757_s28 }
 0x166   : > { %s8223_s4 = scalar_lea.vmem [#allocation14], %s6654_s7 }
 0x167   : > { %7626 = dma.done.wait (%p7877_p8), %s1191_s27, 1040  }
 0x168   : > { %7628 = vsyncadd (%p7877_p8), %s1191_s27, 4294966256  ;;  %s1210_s6 = scalar_lea.sflag [#allocation19], %s8208_s19  ;;  %s8234_s30 = scalar_lea.vmem [#allocation18], %s6653_s26 }
 0x169   : > { %7630 = dma.done.wait (%p7877_p8), %s1210_s6, 4096  }
 0x16a   : > { %7632 = vsyncadd (%p7877_p8), %s1210_s6, 4294963200  ;;  %s8240_s0 = scalar_lea.vmem [#allocation20], %s5757_s28  ;;  %s1230_s13 = scalar_lea.sflag [#allocation22], %s8208_s19 }
 0x16b   : > { %7634 = dma.done.wait (%p7877_p8), %s1230_s13, 32  }
 0x16c   : > { %7636 = vsyncadd (%p7877_p8), %s1230_s13, 4294967264  ;;  %s1248_s10 = scalar_lea.sflag [#allocation25], %s8208_s19 }
 0x16d   : > { %7638 = dma.done.wait (%p7877_p8), %s1248_s10, 32  }
 0x16e   : > { %7640 = vsyncadd (%p7877_p8), %s1248_s10, 4294967264  ;;  %s1266_s26 = scalar_lea.sflag [#allocation28], %s8208_s19 }
 0x16f   : > { %7642 = dma.done.wait (%p7877_p8), %s1266_s26, 2064  }
 0x170   : > { %7644 = vsyncadd (%p7877_p8), %s1266_s26, 4294965232  ;;  %s5759_s7 = sshll.u32 %s8211_s1, 7  ;;  %s1285_s27 = scalar_lea.sflag [#allocation31], %s8211_s1 }
 0x171   : > { %s8263_s28 = scalar_lea.vmem [#allocation29], %s5759_s7  ;;  %s8266_s6 = scalar_lea.vmem [#allocation30], %s5759_s7 }
 0x172   : > { %7646 = dma.done.wait (%p7877_p8), %s1285_s27, 2048  }
 0x173   : > { %7648 = vsyncadd (%p7877_p8), %s1285_s27, 4294965248  ;;  %p1432_p4 = scmp.lt.s32.totalorder %s9439_s9, 1  ;;  %s9442_s7 = sld [smem:[#allocation64_spill]] }
 0x174   : > { %s9443_s27 = sld [smem:[#allocation66_spill]] }
 0x175   : > { %s8274_s19 = scalar_select %p1432_p4, %s9439_s9, 1 }
 0x176   : > { %s9444_s15 = sld [smem:[#allocation68_spill]] }
 0x177   : > { %s6655_s13 = smul.u32 3, %s8274_s19  ;;  %s9445_s17 = sld [smem:[#allocation61_spill]] }
 0x178   : > { %s9446_s23 = sld [smem:[#allocation70_spill]]  ;;  %s5761_s10 = sshll.u32 %s8274_s19, 1 }
 0x179   : > { %s1438_s24 = scalar_lea.vmem %s9442_s7, %s8274_s19  ;;  %s9447_s22 = sld [smem:[#allocation75_spill]] }
 0x17a   : > { %s1441_s29 = scalar_lea.vmem %s9443_s27, %s8274_s19  ;;  %s9448_s5 = sld [smem:[#allocation73_spill]] }
 0x17c   : > { %s8289_s12 = scalar_lea.vmem %s9444_s15, %s8274_s19  ;;  %1459 = sbr.rel (%p5731_p9) target bundleno = 390 (0x186), region = 204 }
 0x17d   : > { %s8294_s18 = scalar_lea.vmem %s9445_s17, %s6655_s13 }
 0x17e   : > { %s8300_s25 = scalar_lea.vmem %s9446_s23, %s8274_s19 }
 0x17f   : > { %s8307_s2 = scalar_lea.vmem %s9447_s22, %s8274_s19 }
 0x180   : > { %s8312_s15 = scalar_lea.vmem %s9448_s5, %s5761_s10 }
 0x181   : > { %v1460_v0 = vld [vmem:[#allocation3] sm:$0xff]  ;;  %v1461_v1 = vld [vmem:[#allocation3 + $0x8] sm:$0xff]  ;;  %v1464_v2 = vld [vmem:[#allocation6] sm:$0xff] }
 0x182   : > { %1462 = vst [vmem:[#allocation32] sm:$0xff] %v1460_v0  ;;  %v1465_v3 = vld [vmem:[#allocation6 + $0x8] sm:$0xff] }
 0x183   : > { %1463 = vst [vmem:[#allocation32 + $0x8] sm:$0xff] %v1461_v1 }
 0x184   : > { %1466 = vst [vmem:[#allocation2] sm:$0xff] %v1464_v2 }
 0x185   : > { %1467 = vst [vmem:[#allocation2 + $0x8] sm:$0xff] %v1465_v3 }
 0x186 PF: > { %v7684_v8 = vmov 128.0   ;;  %v5821_v11 = vld [vmem:[%s8215_s3 + $0xac] sm:$0xf]  ;;  %v6500_v12 = vld [vmem:[%s8215_s3 + $0xb4] sm:$0xf0]  ;;  %s9452_s21 = scalar_lea.vmem [#allocation24], %s8211_s1 }
 0x187   : > { %6834 = vrcp.f32 %v7684_v8  ;;  %v5813_v13 = vld [vmem:[%s8215_s3 + $0x94] sm:$0xf]  ;;  %v5822_v14 = vor.u32 %v6500_v12, %v5821_v11  ;;  %v6498_v15 = vld [vmem:[%s8215_s3 + $0x9c] sm:$0xf0]  ;;  %v5805_v37 = vld [vmem:[%s8215_s3 + $0x7c] sm:$0xf] }
 0x188   : > { %v5814_v17 = vor.u32 %v6498_v15, %v5813_v13  ;;  %v6496_v38 = vld [vmem:[%s8215_s3 + $0x84] sm:$0xf0]  ;;  %v5797_v40 = vld [vmem:[%s8215_s3 + $0x64] sm:$0xf]  ;;  %v6494_v41 = vld [vmem:[%s8215_s3 + $0x6c] sm:$0xf0] }
 0x189   : > { %v1468_v5 = vld [vmem:[#allocation32] sm:$0xff]  ;;  %1687 = vmatpush.bf16.msra.mxu0 %v5822_v14  ;;  %v5806_v39 = vor.u32 %v6496_v38, %v5805_v37  ;;  %v5798_v42 = vor.u32 %v6494_v41, %v5797_v40  ;;  %v5823_v44 = vld [vmem:[%s8215_s3 + $0xb8] sm:$0xf0]  ;;  %v5789_v46 = vld [vmem:[%s8215_s3 + $0x4c] sm:$0xf]  ;;  %vm1961_vm13 = vcmask 261120  }
 0x18a   : > { %1474 = vadd.xlane.f32.xlu1 %v1468_v5  ;;  %v1469_v7 = vld [vmem:[#allocation32 + $0x8] sm:$0xff]  ;;  %v6499_v43 = vld [vmem:[%s8215_s3 + $0xb0] sm:$0xf]  ;;  %v5815_v50 = vld [vmem:[%s8215_s3 + $0xa0] sm:$0xf0]  ;;  %vm2032_vm14 = vcmask 1043456  }
 0x18b   : > { %v8316_v4 = vld [vmem:[#allocation2] sm:$0xff]  ;;  %v5826_v45 = vor.u32 %v6499_v43, %v5823_v44  ;;  %v6492_v47 = vld [vmem:[%s8215_s3 + $0x54] sm:$0xf0]  ;;  %v5781_v52 = vld [vmem:[%s8215_s3 + $0x34] sm:$0xf]  ;;  %s7686_s19 = smov 64  }
 0x18c   : > { %1534 = vadd.xlane.f32.xlu0 %v8316_v4  ;;  %v8319_v6 = vld [vmem:[#allocation2 + $0x8] sm:$0xff]  ;;  %v5790_v48 = vor.u32 %v6492_v47, %v5789_v46  ;;  %v6497_v49 = vld [vmem:[%s8215_s3 + $0x98] sm:$0xf]  ;;  %v6490_v53 = vld [vmem:[%s8215_s3 + $0x3c] sm:$0xf0]  ;;  %s7687_s13 = smov 32  }
 0x18d   : > { %v6835_v9 = vpop.eup %6834  ;;  %1688 = vmatpush.bf16.msra.mxu0 %v5814_v17  ;;  %1701 = vmatpush.bf16.msra.mxu1 %v5826_v45  ;;  %v5818_v51 = vor.u32 %v6497_v49, %v5815_v50  ;;  %v5782_v54 = vor.u32 %v6490_v53, %v5781_v52  ;;  %v6495_v55 = vld [vmem:[%s8215_s3 + $0x80] sm:$0xf]  ;;  %v5807_v56 = vld [vmem:[%s8215_s3 + $0x88] sm:$0xf0]  ;;  %v5773_v58 = vld [vmem:[%s8215_s3 + $0x1c] sm:$0xf] }
 0x18e   : > { %v1479_v10 = vmul.f32 128.0, %v6835_v9  ;;  %vm1483_vm0 = vweird.f32 %v6835_v9  ;;  %v5810_v57 = vor.u32 %v6495_v55, %v5807_v56  ;;  %v6488_v59 = vld [vmem:[%s8215_s3 + $0x24] sm:$0xf0]  ;;  %v5799_v62 = vld [vmem:[%s8215_s3 + $0x70] sm:$0xf0]  ;;  %vm2004_vm15 = vcmask 64512  }
 0x18f   : > { %v5774_v60 = vor.u32 %v6488_v59, %v5773_v58  ;;  %v6493_v61 = vld [vmem:[%s8215_s3 + $0x68] sm:$0xf]  ;;  %v5765_v0 = vld [vmem:[%s8215_s3 + $0x4] sm:$0xf]  ;;  %v6486_v1 = vld [vmem:[%s8215_s3 + $0xc] sm:$0xf0] }
 0x190   : > { %v1480_v16 = vsub.f32 1.0, %v1479_v10  ;;  %v5802_v63 = vor.u32 %v6493_v61, %v5799_v62  ;;  %v5766_v2 = vor.u32 %v6486_v1, %v5765_v0  ;;  %v6491_v3 = vld [vmem:[%s8215_s3 + $0x50] sm:$0xf]  ;;  %v6489_v11 = vld [vmem:[%s8215_s3 + $0x38] sm:$0xf]  ;;  %s9459_s10 = scalar_lea.vmem [#allocation17], %s8211_s1 }
 0x191   : > { %1689 = vmatpush.bf16.msra.mxu0 %v5806_v39  ;;  %1702 = vmatpush.bf16.msra.mxu1 %v5818_v51  ;;  %v5783_v12 = vld [vmem:[%s8215_s3 + $0x40] sm:$0xf0]  ;;  %v5925_v13 = vld [vmem:[%s8215_s3 + $0x90] sm:$0xf]  ;;  %v6525_v15 = vld [vmem:[%s8215_s3 + $0x98] sm:$0xf0] }
 0x192   : > { %1476 = vadd.xlane.f32.xlu1 %v1469_v7  ;;  %v1481_v18 = vmul.f32 %v6835_v9, %v1480_v16  ;;  %v5786_v14 = vor.u32 %v6489_v11, %v5783_v12  ;;  %v5926_v16 = vor.u32 %v6525_v15, %v5925_v13  ;;  %v6487_v17 = vld [vmem:[%s8215_s3 + $0x20] sm:$0xf]  ;;  %v5913_v39 = vld [vmem:[%s8215_s3 + $0x48] sm:$0xf]  ;;  %v6522_v40 = vld [vmem:[%s8215_s3 + $0x50] sm:$0xf0] }
 0x193   : > { %v5909_v43 = vld [vmem:[%s8215_s3 + $0x30] sm:$0xf]  ;;  %v6521_v44 = vld [vmem:[%s8215_s3 + $0x38] sm:$0xf0]  ;;  %v5905_v50 = vld [vmem:[%s8215_s3 + $0x18] sm:$0xf] }
 0x194   : > { %1536 = vadd.xlane.f32.xlu0 %v8319_v6  ;;  %v1482_v19 = vadd.f32 %v6835_v9, %v1481_v18  ;;  %v5775_v18 = vld [vmem:[%s8215_s3 + $0x28] sm:$0xf0]  ;;  %v5910_v49 = vor.u32 %v6521_v44, %v5909_v43  ;;  %v5901_v58 = vld [vmem:[%s8215_s3] sm:$0xf]  ;;  %v5893_v11 = vld [vmem:[%s8234_s30 + $0xac] sm:$0xf] }
 0x195   : > { %1690 = vmatpush.bf16.msra.mxu0 %v5798_v42  ;;  %1703 = vmatpush.bf16.msra.mxu1 %v5810_v57  ;;  %v5914_v42 = vor.u32 %v6522_v40, %v5913_v39  ;;  %v6519_v59 = vld [vmem:[%s8215_s3 + $0x8] sm:$0xf0]  ;;  %v6518_v12 = vld [vmem:[%s8234_s30 + $0xb4] sm:$0xf0]  ;;  %v5885_v13 = vld [vmem:[%s8234_s30 + $0x94] sm:$0xf] }
 0x196   : > { %v8326_v20 = vsel %vm1483_vm0, %v6835_v9, %v1482_v19  ;;  %v6526_v9 = vld [vmem:[%s8215_s3 + $0xb0] sm:$0xf0]  ;;  %v5921_v19 = vld [vmem:[%s8215_s3 + $0x78] sm:$0xf]  ;;  %vm2460_vm0 = vcmask 523264   ;;  %s9460_s26 = scalar_lea.vmem [#allocation26], %s8211_s1 }
 0x197   : > { %v5879_v43 = vld [vmem:[%s8234_s30 + $0x88] sm:$0xf0]  ;;  %s9461_s7 = scalar_lea.vmem [#allocation21], %s8211_s1  ;;  %s9462_s22 = scalar_lea.vmem [#allocation27], %s8211_s1 }
 0x198   : > { %s9463_s27 = sld [smem:[#allocation46_spill]] }
 0x199   : > { %1691 = vmatpush.bf16.msra.mxu0 %v5790_v48  ;;  %1704 = vmatpush.bf16.msra.mxu1 %v5802_v63  ;;  %v5902_v63 = vor.u32 %v6519_v59, %v5901_v58  ;;  %v5861_v58 = vld [vmem:[%s8234_s30 + $0x4c] sm:$0xf]  ;;  %v6510_v59 = vld [vmem:[%s8234_s30 + $0x54] sm:$0xf0] }
 0x19d   : > { %1692 = vmatpush.bf16.msra.mxu0 %v5782_v54  ;;  %v6520_v54 = vld [vmem:[%s8215_s3 + $0x20] sm:$0xf0] }
 0x19e   : > { %v5906_v57 = vor.u32 %v6520_v54, %v5905_v50  ;;  %v6511_v54 = vld [vmem:[%s8234_s30 + $0x68] sm:$0xf]  ;;  %p6187_p5 = scmp.ne.s32.totalorder %s9463_s27, 1 }
 0x19f   : > { %s9464_s14 = sld [smem:[#allocation76_spill]] (!%p6187_p5) }
 0x1a1   : > { %1693 = vmatpush.bf16.msra.mxu0 %v5774_v60 }
 0x1a5   : > { %1694 = vmatpush.bf16.msra.mxu0 %v5766_v2 }
 0x1fd   : > { %v1475_v22 = vpop.xlane.xlu1 %1474 }
 0x1fe   : > { %v1485_v24 = vmul.f32 %v8326_v20, %v1475_v22  ;;  %v6524_v22 = vld [vmem:[%s8215_s3 + $0x80] sm:$0xf0] }
 0x1ff   : > { %v1535_v21 = vpop.xlane.xlu0 %1534 }
 0x200   : > { %v1538_v23 = vmul.f32 %v1535_v21, %v8326_v20  ;;  %v8330_v25 = vsub.f32 %v1468_v5, %v1485_v24  ;;  %v5791_v5 = vld [vmem:[%s8215_s3 + $0x58] sm:$0xf0]  ;;  %v5778_v21 = vor.u32 %v6487_v17, %v5775_v18  ;;  %v5894_v17 = vor.u32 %v6518_v12, %v5893_v11  ;;  %v6516_v18 = vld [vmem:[%s8234_s30 + $0x9c] sm:$0xf0] }
 0x201   : > { %v5794_v8 = vor.u32 %v6491_v3, %v5791_v5 }
 0x202   : > { %v8333_v26 = vsub.f32 %v8316_v4, %v1538_v23  ;;  %v1489_v28 = vmul.f32 %v8330_v25, %v8330_v25  ;;  %1833 = vmatpush.bf16.msra.mxu2 %v5894_v17 }
 0x203   : > { %1705 = vmatpush.bf16.msra.mxu1 %v5794_v8 }
 0x204   : > { %v1542_v27 = vmul.f32 %v8333_v26, %v8333_v26  ;;  %1491 = vadd.xlane.f32.xlu0 %v1489_v28  ;;  %v6485_v28 = vld [vmem:[%s8215_s3 + $0x8] sm:$0xf] }
 0x205   : > { %v1477_v30 = vpop.xlane.xlu1 %1476 }
 0x206   : > { %1544 = vadd.xlane.f32.xlu2 %v1542_v27  ;;  %v1486_v32 = vmul.f32 %v8326_v20, %v1477_v30  ;;  %v5922_v27 = vor.u32 %v6524_v22, %v5921_v19  ;;  %v5917_v30 = vld [vmem:[%s8215_s3 + $0x60] sm:$0xf]  ;;  %v6517_v19 = vld [vmem:[%s8234_s30 + $0xb0] sm:$0xf] }
 0x207   : > { %v1537_v29 = vpop.xlane.xlu0 %1536  ;;  %1706 = vmatpush.bf16.msra.mxu1 %v5786_v14 }
 0x208   : > { %v1539_v31 = vmul.f32 %v1537_v29, %v8326_v20  ;;  %v8344_v34 = vsub.f32 %v1469_v7, %v1486_v32  ;;  %v5929_v7 = vld [vmem:[%s8215_s3 + $0xa8] sm:$0xf]  ;;  %v5767_v29 = vld [vmem:[%s8215_s3 + $0x10] sm:$0xf0] }
 0x209   : > { %v5930_v10 = vor.u32 %v6526_v9, %v5929_v7  ;;  %v5770_v32 = vor.u32 %v6485_v28, %v5767_v29  ;;  %v5877_v29 = vld [vmem:[%s8234_s30 + $0x7c] sm:$0xf] }
 0x20a   : > { %v8342_v33 = vsub.f32 %v8319_v6, %v1539_v31  ;;  %v1490_v36 = vmul.f32 %v8344_v34, %v8344_v34 }
 0x20b   : > { %1941 = vmatpush.bf16.msrb.mxu0 %v5930_v10  ;;  %1707 = vmatpush.bf16.msra.mxu1 %v5778_v21 }
 0x20c   : > { %v1543_v35 = vmul.f32 %v8342_v33, %v8342_v33  ;;  %1493 = vadd.xlane.f32.xlu1 %v1490_v36 }
 0x20e   : > { %1546 = vadd.xlane.f32.xlu2 %v1543_v35  ;;  %v6523_v35 = vld [vmem:[%s8215_s3 + $0x68] sm:$0xf0] }
 0x20f   : > { %1942 = vmatpush.bf16.msrb.mxu0 %v5926_v16  ;;  %v5918_v36 = vor.u32 %v6523_v35, %v5917_v30  ;;  %1708 = vmatpush.bf16.msra.mxu1 %v5770_v32  ;;  %v6514_v30 = vld [vmem:[%s8234_s30 + $0x84] sm:$0xf0]  ;;  %v6515_v32 = vld [vmem:[%s8234_s30 + $0x98] sm:$0xf] }
 0x213   : > { %1943 = vmatpush.bf16.msrb.mxu0 %v5922_v27  ;;  %v5895_v27 = vld [vmem:[%s8234_s30 + $0xb8] sm:$0xf0] }
 0x217   : > { %1944 = vmatpush.bf16.msrb.mxu0 %v5918_v36 }
 0x21b   : > { %1945 = vmatpush.bf16.msrb.mxu0 %v5914_v42  ;;  %v6513_v42 = vld [vmem:[%s8234_s30 + $0x80] sm:$0xf] }
 0x21f   : > { %1946 = vmatpush.bf16.msrb.mxu0 %v5910_v49 }
 0x223   : > { %1947 = vmatpush.bf16.msrb.mxu0 %v5906_v57 }
 0x227   : > { %1948 = vmatpush.bf16.msrb.mxu0 %v5902_v63 }
 0x277   : > { %v1492_v24 = vpop.xlane.xlu0 %1491 }
 0x278   : > { %v1495_v38 = vmul.f32 %v1492_v24, %v8326_v20  ;;  %v5886_v24 = vor.u32 %v6516_v18, %v5885_v13  ;;  %v5863_v18 = vld [vmem:[%s8234_s30 + $0x58] sm:$0xf0] }
 0x279   : > { %v1545_v23 = vpop.xlane.xlu2 %1544 }
 0x27a   : > { %v1548_v31 = vmul.f32 %v1545_v23, %v8326_v20  ;;  %v8390_v41 = vadd.f32 1e-05, %v1495_v38  ;;  %v6821_v23 = vld [vmem:[%s1441_s29] ss:$0 sm:$0xff]  ;;  %1834 = vmatpush.bf16.msra.mxu2 %v5886_v24  ;;  %s9458_s29 = scalar_lea.vmem [#allocation23], %s8211_s1 }
 0x27c   : > { %v1550_v37 = vadd.f32 1e-05, %v1548_v31  ;;  %v5898_v31 = vor.u32 %v6517_v19, %v5895_v27  ;;  %vm1505_vm9 = vweird.f32 %v8390_v41  ;;  %v5855_v27 = vld [vmem:[%s8234_s30 + $0x40] sm:$0xf0] }
 0x27e   : > { %6836 = vrsqrt.f32 %v1550_v37  ;;  %vm1558_vm2 = vweird.f32 %v1550_v37  ;;  %1852 = vmatpush.bf16.msra.mxu3 %v5898_v31 }
 0x27f   : > { %v1494_v46 = vpop.xlane.xlu1 %1493  ;;  %6838 = vrsqrt.f32 %v8390_v41 }
 0x280   : > { %v1496_v48 = vmul.f32 %v1494_v46, %v8326_v20  ;;  %v6822_v46 = vld [vmem:[%s9452_s21] ss:$0 sm:$0xff]  ;;  %s9465_s21 = sld [smem:[#allocation77_spill]] (!%p6187_p5) }
 0x281   : > { %v1547_v45 = vpop.xlane.xlu2 %1546 }
 0x282   : > { %v1549_v47 = vmul.f32 %v1547_v45, %v8326_v20  ;;  %v8398_v53 = vadd.f32 1e-05, %v1496_v48  ;;  %v6512_v48 = vld [vmem:[%s8234_s30 + $0x6c] sm:$0xf0] }
 0x284   : > { %v6837_v51 = vpop.eup %6836  ;;  %v1551_v52 = vadd.f32 1e-05, %v1549_v47  ;;  %v5869_v47 = vld [vmem:[%s8234_s30 + $0x64] sm:$0xf]  ;;  %vm1515_vm7 = vweird.f32 %v8398_v53 }
 0x285   : > { %v1553_v55 = vmul.f32 %v6837_v51, %v1550_v37  ;;  %v8404_v61 = vpop.eup %6838  ;;  %vm1559_vm1 = vweird.f32 %v6837_v51  ;;  %v5887_v37 = vld [vmem:[%s8234_s30 + $0xa0] sm:$0xf0] }
 0x286   : > { %6840 = vrsqrt.f32 %v1551_v52  ;;  %v1500_v3 = vmul.f32 %v8404_v61, %v8390_v41  ;;  %vm8412_vm3 = vmor %vm1558_vm2, %vm1559_vm1  ;;  %vm1568_vm5 = vweird.f32 %v1551_v52  ;;  %v5890_v38 = vor.u32 %v6515_v32, %v5887_v37  ;;  %v6503_v32 = vld [vmem:[%s8234_s30 + $0x8] sm:$0xf]  ;;  %v1601_v37 = vld [vmem:[%s8223_s4 + $0x1] sm:$0x3] }
 0x287   : > { %v1554_v56 = vmul.f32 %v6837_v51, %v1553_v55  ;;  %6842 = vrsqrt.f32 %v8398_v53  ;;  %vm1506_vm10 = vweird.f32 %v8404_v61  ;;  %v5871_v55 = vld [vmem:[%s8234_s30 + $0x70] sm:$0xf0]  ;;  %vm2463_vm1 = vcmask 785408  }
 0x288   : > { %v1501_v14 = vmul.f32 %v8404_v61, %v1500_v3  ;;  %1853 = vmatpush.bf16.msra.mxu3 %v5890_v38  ;;  %vm8458_vm12 = vmor %vm1505_vm9, %vm1506_vm10  ;;  %v5874_v63 = vor.u32 %v6511_v54, %v5871_v55  ;;  %v5853_v3 = vld [vmem:[%s8234_s30 + $0x34] sm:$0xf]  ;;  %v1603_v38 = vperm.slane %v1601_v37, 0 }
 0x289   : > { %v1555_v60 = vmul.f32 0.5, %v1554_v56 }
 0x28a   : > { %v1502_v35 = vmul.f32 0.5, %v1501_v14 }
 0x28b   : > { %v1556_v62 = vsub.f32 1.5, %v1555_v60 }
 0x28c   : > { %v6841_v0 = vpop.eup %6840  ;;  %v1503_v49 = vsub.f32 1.5, %v1502_v35  ;;  %v5839_v35 = vld [vmem:[%s8234_s30 + $0x10] sm:$0xf0] }
 0x28d   : > { %v8406_v1 = vpop.eup %6842  ;;  %v1557_v2 = vmul.f32 %v6837_v51, %v1556_v62  ;;  %v1563_v5 = vmul.f32 %v6841_v0, %v1551_v52  ;;  %vm1569_vm4 = vweird.f32 %v6841_v0  ;;  %v5870_v52 = vor.u32 %v6512_v48, %v5869_v47 }
 0x28e   : > { %v1510_v7 = vmul.f32 %v8406_v1, %v8398_v53  ;;  %vm1570_vm6 = vmor %vm1568_vm5, %vm1569_vm4  ;;  %vm1516_vm8 = vweird.f32 %v8406_v1  ;;  %v1504_v41 = vmul.f32 %v8404_v61, %v1503_v49 }
 0x28f   : > { %v1564_v9 = vmul.f32 %v6841_v0, %v1563_v5  ;;  %v1561_v16 = vsel %vm8412_vm3, %v6837_v51, %v1557_v2  ;;  %v5882_v51 = vor.u32 %v6513_v42, %v5879_v43  ;;  %vm8451_vm11 = vmor %vm1515_vm7, %vm1516_vm8  ;;  %v5862_v2 = vor.u32 %v6510_v59, %v5861_v58  ;;  %v6508_v5 = vld [vmem:[%s8234_s30 + $0x3c] sm:$0xf0]  ;;  %v6825_v58 = vld [vmem:[%s8223_s4] ss:$0 sm:$0xff] }
 0x290   : > { %v1511_v10 = vmul.f32 %v8406_v1, %v1510_v7  ;;  %v1572_v28 = vmul.f32 %v1561_v16, %v8333_v26  ;;  %v5878_v26 = vor.u32 %v6514_v30, %v5877_v29  ;;  %v1508_v7 = vsel %vm8458_vm12, %v8404_v61, %v1504_v41  ;;  %v6509_v16 = vld [vmem:[%s8234_s30 + $0x50] sm:$0xf]  ;;  %v6505_v29 = vld [vmem:[%s8234_s30 + $0x20] sm:$0xf]  ;;  %v5847_v30 = vld [vmem:[%s8234_s30 + $0x28] sm:$0xf0] }
 0x291   : > { %v1565_v15 = vmul.f32 0.5, %v1564_v9  ;;  %1854 = vmatpush.bf16.msra.mxu3 %v5882_v51  ;;  %v1519_v9 = vmul.f32 %v1508_v7, %v8330_v25  ;;  %v6506_v25 = vld [vmem:[%s8234_s30 + $0x24] sm:$0xf0]  ;;  %v5866_v19 = vor.u32 %v6509_v16, %v5863_v18  ;;  %v5850_v31 = vor.u32 %v6505_v29, %v5847_v30  ;;  %v8546_v16 = vld [vmem:[#allocation9] sm:$0xff] }
 0x292   : > { %v1512_v22 = vmul.f32 0.5, %v1511_v10  ;;  %v1577_v45 = vmul.f32 %v6821_v23, %v1572_v28  ;;  %1835 = vmatpush.bf16.msra.mxu2 %v5878_v26  ;;  %v6823_v10 = vld [vmem:[%s1438_s24] ss:$0 sm:$0xff]  ;;  %s7685_s24 = smov 96   ;;  %vm2746_vm8 = vcmask 130048  }
 0x293   : > { %v1566_v21 = vsub.f32 1.5, %v1565_v15  ;;  %v1524_v61 = vmul.f32 %v6823_v10, %v1519_v9  ;;  %v5845_v15 = vld [vmem:[%s8234_s30 + $0x1c] sm:$0xf] }
 0x294   : > { %v1513_v39 = vsub.f32 1.5, %v1512_v22  ;;  %v1582_v53 = vadd.f32 %v6822_v46, %v1577_v45  ;;  %v5846_v17 = vor.u32 %v6506_v25, %v5845_v15  ;;  %v6504_v22 = vld [vmem:[%s8234_s30 + $0xc] sm:$0xf0] }
 0x295   : > { %v1567_v36 = vmul.f32 %v6841_v0, %v1566_v21  ;;  %1855 = vmatpush.bf16.msra.mxu3 %v5874_v63  ;;  %v5837_v21 = vld [vmem:[%s8234_s30 + $0x4] sm:$0xf] }
 0x296   : > { %1836 = vmatpush.bf16.msra.mxu2 %v5870_v52  ;;  %v5838_v24 = vor.u32 %v6504_v22, %v5837_v21 }
 0x297   : > { %v1571_v40 = vsel %vm1570_vm6, %v6841_v0, %v1567_v36  ;;  %v5842_v36 = vor.u32 %v6503_v32, %v5839_v35  ;;  %v8564_v32 = vld [vmem:[#allocation9 + $0x8] sm:$0xff] }
 0x298   : > { %v1573_v44 = vmul.f32 %v1571_v40, %v8342_v33  ;;  %v1514_v33 = vmul.f32 %v8406_v1, %v1513_v39  ;;  %v1604_v39 = vperm.slane %v1601_v37, 1 }
 0x299   : > { %1856 = vmatpush.bf16.msra.mxu3 %v5866_v19 }
 0x29a   : > { %v1578_v50 = vmul.f32 %v6821_v23, %v1573_v44  ;;  %v1518_v0 = vsel %vm8451_vm11, %v8406_v1, %v1514_v33  ;;  %1837 = vmatpush.bf16.msra.mxu2 %v5862_v2  ;;  %v5854_v1 = vor.u32 %v6508_v5, %v5853_v3  ;;  %v6507_v23 = vld [vmem:[%s8234_s30 + $0x38] sm:$0xf] }
 0x29b   : > { %v1520_v8 = vmul.f32 %v1518_v0, %v8344_v34  ;;  %v6824_v34 = vld [vmem:[%s9458_s29] ss:$0 sm:$0xff]  ;;  %v5858_v28 = vor.u32 %v6507_v23, %v5855_v27 }
 0x29c   : > { %v1583_v57 = vadd.f32 %v6822_v46, %v1578_v50  ;;  %v1529_v13 = vadd.f32 %v6824_v34, %v1524_v61 }
 0x29d   : > { %v1525_v11 = vmul.f32 %v6823_v10, %v1520_v8  ;;  %1857 = vmatpush.bf16.msra.mxu3 %v5858_v28 }
 0x29e   : > { %v8462_v62 = vpack.c.bf16 %v1583_v57, %v1582_v53  ;;  %1838 = vmatpush.bf16.msra.mxu2 %v5854_v1 }
 0x29f   : > { %v1530_v12 = vadd.f32 %v6824_v34, %v1525_v11 }
 0x2a0   : > { %1695 = vmatmul.bf16.vlgmr.msra.gmra.mxu0 %v8462_v62  ;;  %1709 = vmatmul.bf16.vlgmr.msra.gmra.mxu1 %v8462_v62 }
 0x2a1   : > { %v1531_v14 = vpack.c.bf16 %v1530_v12, %v1529_v13  ;;  %1858 = vmatpush.bf16.msra.mxu3 %v5850_v31 }
 0x2a2   : > { %1839 = vmatpush.bf16.msra.mxu2 %v5846_v17 }
 0x2a5   : > { %1859 = vmatpush.bf16.msra.mxu3 %v5842_v36 }
 0x2a6   : > { %1840 = vmatpush.bf16.msra.mxu2 %v5838_v24 }
 0x2b0   : > { %1949 = vmatmul.bf16.vlgmr.msrb.gmra.mxu0 %v1531_v14 }
 0x31d   : > { %v1696_v40 = vpop.f32.mrf.mxu0  ;;  %v1710_v26 = vpop.f32.mrf.mxu1 }
 0x31e   : > { %v1697_v42 = vadd.f32 %v1696_v40, %v1603_v38  ;;  %v1711_v43 = vadd.f32 %v1710_v26, %v1604_v39 }
 0x320   : > { %v1957_v44 = vpack.c.bf16 %v1697_v42, %v1697_v42  ;;  %v8496_v45 = vpack.c.bf16 %v1711_v43, %v1711_v43 }
 0x322   : > { %v2074_v46 = vunpack.c.l.b16 %v1957_v44  ;;  %v8499_v47 = vsel %vm1961_vm13, %v1957_v44, 0  ;;  %v8503_v48 = vsel %vm2032_vm14, %v8496_v45, 0 }
 0x323   : > { %1975 = vmatpush.bf16.xpose.msrb.mxu1 %v8499_v47  ;;  %2043 = vmatpush.bf16.msrb.mxu2 %v8503_v48 }
 0x324   : > { %v2075_v49 = vpack.c.b16 %v2074_v46, %v2074_v46 }
 0x325   : > { %v1698_v50 = vpop.f32.mrf.mxu0  ;;  %v1712_v51 = vpop.f32.mrf.mxu1 }
 0x326   : > { %v1699_v33 = vadd.f32 %v1698_v50, %v1603_v38  ;;  %v1713_v52 = vadd.f32 %v1712_v51, %v1604_v39  ;;  %2076 = vrot.lane.b32.xlu2 %v2075_v49, %s7685_s24 }
 0x328   : > { %v1958_v54 = vpack.c.bf16 %v1699_v33, %v1699_v33  ;;  %v8508_v55 = vpack.c.bf16 %v1713_v52, %v1713_v52 }
 0x32a   : > { %v8511_v56 = vsel %vm1961_vm13, %v1958_v54, 0  ;;  %v2103_v53 = vunpack.c.l.b16 %v1958_v54  ;;  %v8515_v57 = vsel %vm2032_vm14, %v8508_v55, 0 }
 0x32b   : > { %1994 = vmatpush.bf16.xpose.msra.mxu1 %v8511_v56  ;;  %2062 = vmatpush.bf16.msrb.mxu3 %v8515_v57 }
 0x32c   : > { %v2104_v59 = vpack.c.b16 %v2103_v53, %v2103_v53 }
 0x32d   : > { %v1950_v41 = vpop.f32.mrf.mxu0 }
 0x32e   : > { %v1951_v60 = vadd.f32 %v6825_v58, %v1950_v41  ;;  %2105 = vrot.lane.b32.xlu1 %v2104_v59, %s7685_s24 }
 0x330   : > { %v1955_v63 = vpack.c.bf16 %v1951_v60, %v1951_v60 }
 0x332   : > { %v2069_v0 = vunpack.c.l.b16 %v1955_v63  ;;  %5931 = vmatmul.msk.bf16.vlgmr.msrb.gmra.mxu1 %vm1961_vm13, %v1955_v63 }
 0x334   : > { %v2070_v2 = vpack.c.b16 %v2069_v0, %v2069_v0 }
 0x335   : > { %v1952_v3 = vpop.f32.mrf.mxu0 }
 0x336   : > { %v1953_v5 = vadd.f32 %v6825_v58, %v1952_v3  ;;  %2202 = vrot.lane.b32.xlu1 %v2070_v2, %s7686_s19  ;;  %2071 = vrot.lane.b32.xlu0 %v2070_v2, %s7685_s24 }
 0x338   : > { %v1956_v7 = vpack.c.bf16 %v1953_v5, %v1953_v5 }
 0x33a   : > { %v2098_v8 = vunpack.c.l.b16 %v1956_v7 }
 0x33c   : > { %v2099_v1 = vpack.c.b16 %v2098_v8, %v2098_v8 }
 0x33e   : > { %2100 = vrot.lane.b32.xlu2 %v2099_v1, %s7685_s24  ;;  %2343 = vrot.lane.b32.xlu1 %v2104_v59, %s7687_s13 }
 0x33f   : > { %2204 = vrot.lane.b32.xlu0 %v2075_v49, %s7686_s19 }
 0x342   : > { %5932 = vmatmul.msk.bf16.vlgmr.msra.gmra.mxu1 %vm1961_vm13, %v1956_v7 }
 0x346   : > { %2227 = vrot.lane.b32.xlu2 %v2104_v59, %s7686_s19 }
 0x347   : > { %2225 = vrot.lane.b32.xlu0 %v2099_v1, %s7686_s19 }
 0x34e   : > { %2320 = vrot.lane.b32.xlu2 %v2075_v49, %s7687_s13 }
 0x34f   : > { %2318 = vrot.lane.b32.xlu0 %v2070_v2, %s7687_s13 }
 0x356   : > { %2341 = vrot.lane.b32.xlu2 %v2099_v1, %s7687_s13 }
 0x380   : > { %v2077_v9 = vpop.permute.xlu2 %2076 }
 0x381   : > { %v8534_v10 = vsel %vm1961_vm13, %v2077_v9, 0 }
 0x382   : > { %2091 = vmatpush.bf16.xpose.msrb.mxu1 %v8534_v10 }
 0x398   : > { %v2101_v11 = vpop.permute.xlu2 %2100 }
 0x3a0   : > { %v2106_v61 = vpop.permute.xlu1 %2105  ;;  %v2228_v12 = vpop.permute.xlu2 %2227 }
 0x3a1   : > { %v8538_v34 = vsel %vm1961_vm13, %v2106_v61, 0  ;;  %v8542_v14 = vsel %vm1961_vm13, %v2228_v12, 0 }
 0x3a2   : > { %2120 = vmatpush.bf16.xpose.msra.mxu1 %v8538_v34 }
 0x3a8   : > { %v2072_v13 = vpop.permute.xlu0 %2071  ;;  %v2203_v15 = vpop.permute.xlu1 %2202 }
 0x3a9   : > { %5935 = vmatmul.msk.bf16.vlgmr.msrb.gmra.mxu1 %vm1961_vm13, %v2072_v13  ;;  %v2321_v17 = vpop.permute.xlu2 %2320 }
 0x3aa   : > { %2242 = vmatpush.bf16.xpose.msrb.mxu1 %v8542_v14  ;;  %v8553_v23 = vsel %vm1961_vm13, %v2321_v17, 0 }
 0x3af   : > { %v1977_v25 = vpop.f32.mrf.mxu1 }
 0x3b0   : > { %v2000_v18 = vmul.f32 0.17677669, %v1977_v25  ;;  %v2344_v27 = vpop.permute.xlu1 %2343 }
 0x3b1   : > { %v2205_v19 = vpop.permute.xlu0 %2204  ;;  %v8559_v29 = vsel %vm1961_vm13, %v2344_v27, 0  ;;  %v2342_v40 = vpop.permute.xlu2 %2341  ;;  %v6501_v27 = vld [vmem:[#allocation8] sm:$0xff] }
 0x3b2   : > { %v8549_v21 = vsel %vm1961_vm13, %v2205_v19, 0  ;;  %v2002_v22 = vadd.f32 %v2000_v18, %v8546_v16  ;;  %1841 = vmatmul.bf16.vlgmr.msra.gmra.mxu2 %v6501_v27  ;;  %1860 = vmatmul.bf16.vlgmr.msra.gmra.mxu3 %v6501_v27 }
 0x3b3   : > { %2219 = vmatpush.bf16.xpose.msra.mxu0 %v8549_v21 }
 0x3b4   : > { %v2005_v24 = vsel %vm2004_vm15, %v2002_v22, -inf }
 0x3b5   : > { %2006 = vmax.xlane.f32.xlu1 %v2005_v24 }
 0x3b7   : > { %v1979_v28 = vpop.f32.mrf.mxu1 }
 0x3b8   : > { %v2155_v28 = vunpack.c.l.b16 %v8496_v45 }
 0x3b9   : > { %5936 = vmatmul.msk.bf16.vlgmr.msra.gmra.mxu1 %vm1961_vm13, %v2101_v11  ;;  %v2226_v30 = vpop.permute.xlu0 %2225 }
 0x3ba   : > { %5939 = vmatmul.msk.bf16.vlgmr.msra.gmra.mxu0 %vm1961_vm13, %v2203_v15  ;;  %2358 = vmatpush.bf16.xpose.msra.mxu1 %v8559_v29  ;;  %v2179_v15 = vunpack.c.l.b16 %v8508_v55 }
 0x3bb   : > { %2335 = vmatpush.bf16.xpose.msrb.mxu0 %v8553_v23 }
 0x3bc   : > { %v8589_v19 = vpack.c.b16 %v2179_v15, %v2179_v15 }
 0x3bf   : > { %v1996_v31 = vpop.f32.mrf.mxu1 }
 0x3c0   : > { %v2001_v35 = vmul.f32 0.17677669, %v1996_v31  ;;  %v8598_v31 = vpack.c.b16 %v2155_v28, %v2155_v28 }
 0x3c1   : > { %v2319_v39 = vpop.permute.xlu0 %2318 }
 0x3c2   : > { %v2003_v36 = vadd.f32 %v2001_v35, %v8564_v32 }
 0x3c4   : > { %v2008_v37 = vsel %vm2004_vm15, %v2003_v36, -inf }
 0x3c5   : > { %2009 = vmax.xlane.f32.xlu0 %v2008_v37 }
 0x3c7   : > { %v1998_v38 = vpop.f32.mrf.mxu1 }
 0x3c8   : > { %v6502_v38 = vld [vmem:[#allocation8 + $0x8] sm:$0xff] }
 0x3c9   : > { %5940 = vmatmul.msk.bf16.vlgmr.msrb.gmra.mxu1 %vm1961_vm13, %v2226_v30  ;;  %1846 = vmatmul.bf16.gmra.mxu2 %v6502_v38 }
 0x3ca   : > { %5943 = vmatmul.msk.bf16.vlgmr.msrb.gmra.mxu0 %vm1961_vm13, %v2319_v39  ;;  %1865 = vmatmul.bf16.gmra.mxu3 %v6502_v38 }
 0x3d9   : > { %5944 = vmatmul.msk.bf16.vlgmr.msra.gmra.mxu1 %vm1961_vm13, %v2342_v40 }
 0x426   : > { %v2093_v26 = vpop.f32.mrf.mxu1 }
 0x427   : > { %v2126_v42 = vmul.f32 0.17677669, %v2093_v26 }
 0x428   : > { %v2007_v43 = vpop.xlane.xlu1 %2006 }
 0x429   : > { %v2011_v44 = vsub.f32 %v2002_v22, %v2007_v43  ;;  %v2128_v46 = vadd.f32 %v2126_v42, %v8546_v16 }
 0x42b   : > { %v2013_v49 = vmul.f32 1.442695, %v2011_v44  ;;  %v2130_v50 = vsel %vm2004_vm15, %v2128_v46, -inf }
 0x42c   : > { %2131 = vmax.xlane.f32.xlu2 %v2130_v50 }
 0x42d   : > { %6844 = vpow2.f32 %v2013_v49 }
 0x42e   : > { %v2095_v51 = vpop.f32.mrf.mxu1 }
 0x433   : > { %v8573_v33 = vpop.eup %6844 }
 0x434   : > { %v2017_v52 = vsel %vm2004_vm15, %v8573_v33, 0.0 }
 0x435   : > { %2018 = vadd.xlane.f32.xlu2 %v2017_v52 }
 0x436   : > { %v2122_v54 = vpop.f32.mrf.mxu1 }
 0x437   : > { %v2127_v53 = vmul.f32 0.17677669, %v2122_v54  ;;  %v2221_v58 = vpop.f32.mrf.mxu0 }
 0x438   : > { %v2248_v59 = vmul.f32 0.17677669, %v2221_v58  ;;  %v2010_v5 = vpop.xlane.xlu0 %2009 }
 0x439   : > { %v8578_v41 = vadd.f32 %v2127_v53, %v8564_v32  ;;  %v2012_v7 = vsub.f32 %v2003_v36, %v2010_v5 }
 0x43a   : > { %v2250_v60 = vadd.f32 %v2248_v59, %v8546_v16 }
 0x43b   : > { %v2133_v63 = vsel %vm2004_vm15, %v8578_v41, -inf  ;;  %v2015_v1 = vmul.f32 1.442695, %v2012_v7 }
 0x43c   : > { %2134 = vmax.xlane.f32.xlu1 %v2133_v63  ;;  %v2252_v0 = vsel %vm2004_vm15, %v2250_v60, -inf }
 0x43d   : > { %2253 = vmax.xlane.f32.xlu0 %v2252_v0  ;;  %6846 = vpow2.f32 %v2015_v1 }
 0x43e   : > { %v2124_v2 = vpop.f32.mrf.mxu1 }
 0x43f   : > { %v2223_v3 = vpop.f32.mrf.mxu0 }
 0x443   : > { %v8591_v24 = vpop.eup %6846 }
 0x446   : > { %v2244_v8 = vpop.f32.mrf.mxu1 }
 0x447   : > { %v2249_v9 = vmul.f32 0.17677669, %v2244_v8  ;;  %v2337_v11 = vpop.f32.mrf.mxu0 }
 0x448   : > { %v2364_v61 = vmul.f32 0.17677669, %v2337_v11 }
 0x449   : > { %v2251_v12 = vadd.f32 %v2249_v9, %v8564_v32 }
 0x44a   : > { %v2366_v13 = vadd.f32 %v2364_v61, %v8546_v16  ;;  %v2020_v16 = vsel %vm2004_vm15, %v8591_v24, 0.0 }
 0x44b   : > { %v2255_v25 = vsel %vm2004_vm15, %v2251_v12, -inf }
 0x44c   : > { %v2368_v17 = vsel %vm2004_vm15, %v2366_v13, -inf  ;;  %2256 = vmax.xlane.f32.xlu2 %v2255_v25 }
 0x44d   : > { %2369 = vmax.xlane.f32.xlu1 %v2368_v17  ;;  %v1735_v17 = vld [vmem:[%s8294_s18 + $0x1] sm:$0x3] }
 0x44e   : > { %v2246_v18 = vpop.f32.mrf.mxu1 }
 0x44f   : > { %v2339_v22 = vpop.f32.mrf.mxu0 }
 0x450   : > { %v1737_v22 = vperm.slane %v1735_v17, 0 }
 0x451   : > { %2181 = vrot.lane.b32.xlu0 %v8589_v19, %s7685_s24 }
 0x455   : > { %2021 = vadd.xlane.f32.xlu1 %v2020_v16 }
 0x456   : > { %v2360_v55 = vpop.f32.mrf.mxu1 }
 0x457   : > { %v2365_v35 = vmul.f32 0.17677669, %v2360_v55  ;;  %v1842_v55 = vpop.f32.mrf.mxu2 }
 0x459   : > { %v8605_v36 = vadd.f32 %v2365_v35, %v8564_v32 }
 0x45b   : > { %v2371_v37 = vsel %vm2004_vm15, %v8605_v36, -inf }
 0x45e   : > { %v2362_v30 = vpop.f32.mrf.mxu1 }
 0x45f   : > { %v1843_v30 = vadd.f32 %v1842_v55, %v1737_v22  ;;  %v1844_v35 = vpop.f32.mrf.mxu2 }
 0x464   : > { %2276 = vrot.lane.b32.xlu2 %v8598_v31, %s7686_s19 }
 0x46e   : > { %2157 = vrot.lane.b32.xlu1 %v8598_v31, %s7685_s24 }
 0x47b   : > { %2372 = vmax.xlane.f32.xlu0 %v2371_v37  ;;  %v1845_v37 = vadd.f32 %v1844_v35, %v1737_v22 }
 0x49f   : > { %v2132_v45 = vpop.xlane.xlu2 %2131 }
 0x4a0   : > { %v2136_v39 = vsub.f32 %v2128_v46, %v2132_v45  ;;  %v2689_v45 = vpack.c.bf16 %v1845_v37, %v1845_v37 }
 0x4a2   : > { %v2138_v40 = vmul.f32 1.442695, %v2136_v39  ;;  %v2699_v39 = vunpack.c.l.b16 %v2689_v45 }
 0x4a4   : > { %6848 = vpow2.f32 %v2138_v40 }
 0x4a8   : > { %v2019_v26 = vpop.xlane.xlu2 %2018 }
 0x4a9   : > { %6850 = vrcp.f32 %v2019_v26 }
 0x4aa   : > { %v8609_v42 = vpop.eup %6848 }
 0x4ab   : > { %v2142_v43 = vsel %vm2004_vm15, %v8609_v42, 0.0 }
 0x4ac   : > { %2143 = vadd.xlane.f32.xlu0 %v2142_v43 }
 0x4af   : > { %v6851_v32 = vpop.eup %6850  ;;  %v2135_v50 = vpop.xlane.xlu1 %2134 }
 0x4b0   : > { %v2025_v44 = vmul.f32 %v6851_v32, %v8573_v33  ;;  %v2254_v49 = vpop.xlane.xlu0 %2253  ;;  %v2137_v46 = vsub.f32 %v8578_v41, %v2135_v50 }
 0x4b1   : > { %v2258_v51 = vsub.f32 %v2250_v60, %v2254_v49  ;;  %v1847_v49 = vpop.f32.mrf.mxu2 }
 0x4b2   : > { %v2027_v52 = vpack.c.bf16 %v2025_v44, %v2025_v44  ;;  %v2140_v53 = vmul.f32 1.442695, %v2137_v46  ;;  %v1848_v50 = vadd.f32 %v1847_v49, %v1737_v22 }
 0x4b3   : > { %v2260_v54 = vmul.f32 1.442695, %v2258_v51 }
 0x4b4   : > { %5933 = vmatmul.msk.bf16.vlgmr.msrb.gmra.mxu2 %vm2004_vm15, %v2027_v52  ;;  %v2690_v51 = vpack.c.bf16 %v1848_v50, %v1848_v50 }
 0x4b5   : > { %6852 = vpow2.f32 %v2260_v54 }
 0x4b6   : > { %6854 = vpow2.f32 %v2140_v53 }
 0x4b9   : > { %v1849_v52 = vpop.f32.mrf.mxu2 }
 0x4ba   : > { %v1850_v54 = vadd.f32 %v1849_v52, %v1737_v22 }
 0x4bb   : > { %v8616_v58 = vpop.eup %6852 }
 0x4bc   : > { %v2264_v59 = vsel %vm2004_vm15, %v8616_v58, 0.0  ;;  %v8622_v60 = vpop.eup %6854  ;;  %v2691_v46 = vpack.c.bf16 %v1850_v54, %v1850_v54 }
 0x4bd   : > { %2265 = vadd.xlane.f32.xlu2 %v2264_v59  ;;  %v2145_v8 = vsel %vm2004_vm15, %v8622_v60, 0.0 }
 0x4be   : > { %v2723_v53 = vunpack.c.l.b16 %v2691_v46 }
 0x4bf   : > { %v2257_v63 = vpop.xlane.xlu2 %2256 }
 0x4c0   : > { %v2259_v33 = vsub.f32 %v2251_v12, %v2257_v63  ;;  %v2370_v0 = vpop.xlane.xlu1 %2369  ;;  %2297 = vrot.lane.b32.xlu0 %v8589_v19, %s7686_s19  ;;  %v1738_v63 = vperm.slane %v1735_v17, 1 }
 0x4c1   : > { %v2374_v41 = vsub.f32 %v2366_v13, %v2370_v0 }
 0x4c2   : > { %v2262_v2 = vmul.f32 1.442695, %v2259_v33 }
 0x4c3   : > { %v2376_v3 = vmul.f32 1.442695, %v2374_v41  ;;  %v2182_v5 = vpop.permute.xlu0 %2181 }
 0x4c4   : > { %6856 = vpow2.f32 %v2262_v2  ;;  %v8625_v7 = vsel %vm2032_vm14, %v2182_v5, 0 }
 0x4c5   : > { %6858 = vpow2.f32 %v2376_v3  ;;  %2196 = vmatpush.bf16.msra.mxu3 %v8625_v7  ;;  %2146 = vadd.xlane.f32.xlu2 %v2145_v8 }
 0x4c7   : > { %v2277_v18 = vpop.permute.xlu2 %2276 }
 0x4c8   : > { %v2022_v1 = vpop.xlane.xlu1 %2021  ;;  %v8645_v28 = vsel %vm2032_vm14, %v2277_v18, 0 }
 0x4c9   : > { %6860 = vrcp.f32 %v2022_v1 }
 0x4ca   : > { %v8630_v9 = vpop.eup %6856 }
 0x4cb   : > { %v8632_v11 = vpop.eup %6858  ;;  %v2267_v61 = vsel %vm2004_vm15, %v8630_v9, 0.0 }
 0x4cc   : > { %v2380_v12 = vsel %vm2004_vm15, %v8632_v11, 0.0 }
 0x4cd   : > { %2268 = vadd.xlane.f32.xlu2 %v2267_v61  ;;  %2381 = vadd.xlane.f32.xlu1 %v2380_v12 }
 0x4cf   : > { %v6861_v13 = vpop.eup %6860 }
 0x4d0   : > { %v2026_v15 = vmul.f32 %v6861_v13, %v8591_v24  ;;  %v2688_v24 = vpack.c.bf16 %v1843_v30, %v1843_v30 }
 0x4d2   : > { %v2028_v25 = vpack.c.bf16 %v2026_v15, %v2026_v15  ;;  %v2698_v38 = vunpack.c.l.b16 %v2688_v24 }
 0x4d4   : > { %5934 = vmatmul.msk.bf16.vlgmr.msrb.gmra.mxu3 %vm2004_vm15, %v2028_v25  ;;  %v8654_v43 = vpack.c.b16 %v2699_v39, %v2698_v38 }
 0x4e0   : > { %v2158_v16 = vpop.permute.xlu1 %2157 }
 0x4e1   : > { %v8642_v27 = vsel %vm2032_vm14, %v2158_v16, 0 }
 0x4e2   : > { %2172 = vmatpush.bf16.msra.mxu2 %v8642_v27 }
 0x4e5   : > { %2392 = vrot.lane.b32.xlu2 %v8598_v31, %s7687_s13 }
 0x4e6   : > { %2291 = vmatpush.bf16.msrb.mxu2 %v8645_v28 }
 0x4ed   : > { %2413 = vrot.lane.b32.xlu2 %v8589_v19, %s7687_s13  ;;  %v2722_v19 = vunpack.c.l.b16 %v2690_v51 }
 0x4ee   : > { %v2373_v40 = vpop.xlane.xlu0 %2372 }
 0x4ef   : > { %v2375_v26 = vsub.f32 %v8605_v36, %v2373_v40  ;;  %v8660_v59 = vpack.c.b16 %v2723_v53, %v2722_v19  ;;  %v1861_v36 = vpop.f32.mrf.mxu3 }
 0x4f0   : > { %v1862_v33 = vadd.f32 %v1861_v36, %v1738_v63 }
 0x4f1   : > { %v2378_v32 = vmul.f32 1.442695, %v2375_v26 }
 0x4f2   : > { %v2692_v2 = vpack.c.bf16 %v1862_v33, %v1862_v33 }
 0x4f3   : > { %6862 = vpow2.f32 %v2378_v32 }
 0x4f4   : > { %v2773_v5 = vunpack.c.l.b16 %v2692_v2 }
 0x4f7   : > { %v1863_v41 = vpop.f32.mrf.mxu3 }
 0x4f8   : > { %v1864_v3 = vadd.f32 %v1863_v41, %v1738_v63 }
 0x4f9   : > { %v8656_v44 = vpop.eup %6862 }
 0x4fa   : > { %v2383_v31 = vsel %vm2004_vm15, %v8656_v44, 0.0  ;;  %v2693_v8 = vpack.c.bf16 %v1864_v3, %v1864_v3 }
 0x4fb   : > { %2384 = vadd.xlane.f32.xlu0 %v2383_v31 }
 0x4fc   : > { %v2774_v61 = vunpack.c.l.b16 %v2693_v8 }
 0x4fe   : > { %v8663_v13 = vpack.c.b16 %v2774_v61, %v2773_v5  ;;  %v8700_v61 = vsel %vm1961_vm13, %v8660_v59, 0 }
 0x4ff   : > { %v1866_v15 = vpop.f32.mrf.mxu3 }
 0x500   : > { %v1867_v18 = vadd.f32 %v1866_v15, %v1738_v63 }
 0x502   : > { %v2694_v17 = vpack.c.bf16 %v1867_v18, %v1867_v18 }
 0x504   : > { %v2795_v35 = vunpack.c.l.b16 %v2694_v17 }
 0x507   : > { %v1868_v16 = vpop.f32.mrf.mxu3 }
 0x508   : > { %v1869_v55 = vadd.f32 %v1868_v16, %v1738_v63 }
 0x50a   : > { %v2695_v37 = vpack.c.bf16 %v1869_v55, %v1869_v55 }
 0x51f   : > { %v2144_v0 = vpop.xlane.xlu0 %2143 }
 0x520   : > { %6864 = vrcp.f32 %v2144_v0 }
 0x526   : > { %v6865_v1 = vpop.eup %6864 }
 0x527   : > { %v2150_v12 = vmul.f32 %v6865_v1, %v8609_v42  ;;  %v2796_v42 = vunpack.c.l.b16 %v2695_v37 }
 0x529   : > { %v2152_v25 = vpack.c.bf16 %v2150_v12, %v2150_v12  ;;  %v8672_v39 = vpack.c.b16 %v2796_v42, %v2795_v35 }
 0x52b   : > { %5937 = vmatmul.msk.bf16.vlgmr.msra.gmra.mxu2 %vm2004_vm15, %v2152_v25 }
 0x530   : > { %v2266_v22 = vpop.xlane.xlu2 %2265 }
 0x531   : > { %6866 = vrcp.f32 %v2266_v22 }
 0x532   : > { %v2298_v30 = vpop.permute.xlu0 %2297 }
 0x533   : > { %v8667_v24 = vsel %vm2032_vm14, %v2298_v30, 0 }
 0x534   : > { %2312 = vmatpush.bf16.msrb.mxu3 %v8667_v24 }
 0x537   : > { %v6867_v38 = vpop.eup %6866  ;;  %v8670_v45 = vpop.f32.mrf.mxu2 }
 0x538   : > { %v2272_v40 = vmul.f32 %v6867_v38, %v8616_v58  ;;  %v2147_v26 = vpop.xlane.xlu2 %2146 }
 0x539   : > { %6868 = vrcp.f32 %v2147_v26  ;;  %v6534_v26 = vld [vmem:[%s8226_s11 + $0x38] sm:$0xff] }
 0x53a   : > { %v2274_v32 = vpack.c.bf16 %v2272_v40, %v2272_v40  ;;  %2535 = vmatpush.bf16.msra.mxu0 %v6534_v26 }
 0x53c   : > { %5941 = vmatmul.msk.bf16.vlgmr.msrb.gmra.mxu2 %vm2004_vm15, %v2274_v32  ;;  %v6533_v32 = vld [vmem:[%s8226_s11 + $0x30] sm:$0xff] }
 0x53e   : > { %2536 = vmatpush.bf16.msra.mxu0 %v6533_v32 }
 0x53f   : > { %v6869_v31 = vpop.eup %6868  ;;  %v2047_v49 = vpop.f32.mrf.mxu2 }
 0x540   : > { %v2151_v50 = vmul.f32 %v6869_v31, %v8622_v60  ;;  %v2269_v51 = vpop.xlane.xlu2 %2268  ;;  %v2382_v52 = vpop.xlane.xlu1 %2381  ;;  %v6532_v31 = vld [vmem:[%s8226_s11 + $0x28] sm:$0xff]  ;;  %v6531_v49 = vld [vmem:[%s8226_s11 + $0x20] sm:$0xff] }
 0x541   : > { %6870 = vrcp.f32 %v2382_v52  ;;  %v6528_v52 = vld [vmem:[%s8226_s11 + $0x8] sm:$0xff] }
 0x542   : > { %v2153_v54 = vpack.c.bf16 %v2151_v50, %v2151_v50  ;;  %6872 = vrcp.f32 %v2269_v51  ;;  %2537 = vmatpush.bf16.msra.mxu0 %v6532_v31  ;;  %v6530_v50 = vld [vmem:[%s8226_s11 + $0x18] sm:$0xff]  ;;  %v6529_v51 = vld [vmem:[%s8226_s11 + $0x10] sm:$0xff] }
 0x544   : > { %5938 = vmatmul.msk.bf16.vlgmr.msra.gmra.mxu3 %vm2004_vm15, %v2153_v54  ;;  %v6527_v54 = vld [vmem:[%s8226_s11] sm:$0xff] }
 0x546   : > { %2538 = vmatpush.bf16.msra.mxu0 %v6531_v49 }
 0x547   : > { %v6871_v19 = vpop.eup %6870 }
 0x548   : > { %v2393_v46 = vpop.permute.xlu2 %2392  ;;  %v2388_v58 = vmul.f32 %v6871_v19, %v8632_v11  ;;  %v6873_v36 = vpop.eup %6872 }
 0x549   : > { %v8680_v53 = vsel %vm2032_vm14, %v2393_v46, 0  ;;  %v2273_v60 = vmul.f32 %v6873_v36, %v8630_v9  ;;  %v8694_v9 = vsel %vm1961_vm13, %v8654_v43, 0 }
 0x54a   : > { %2407 = vmatpush.bf16.msra.mxu2 %v8680_v53  ;;  %v2390_v63 = vpack.c.bf16 %v2388_v58, %v2388_v58  ;;  %2539 = vmatpush.bf16.msra.mxu0 %v6530_v50 }
 0x54b   : > { %v2275_v41 = vpack.c.bf16 %v2273_v60, %v2273_v60 }
 0x54d   : > { %5945 = vmatmul.msk.bf16.vlgmr.msra.gmra.mxu2 %vm2004_vm15, %v2390_v63 }
 0x54e   : > { %2714 = vmatpush.bf16.xpose.msrb.mxu2 %v8694_v9  ;;  %2540 = vmatpush.bf16.msra.mxu0 %v6529_v51  ;;  %v6009_v51 = vld [vmem:[%s8234_s30 + $0xa8] sm:$0xf] }
 0x550   : > { %v2414_v33 = vpop.permute.xlu2 %2413 }
 0x551   : > { %v8686_v0 = vsel %vm2032_vm14, %v2414_v33, 0 }
 0x552   : > { %2428 = vmatpush.bf16.msra.mxu3 %v8686_v0  ;;  %2541 = vmatpush.bf16.msra.mxu0 %v6528_v52  ;;  %v6542_v52 = vld [vmem:[%s8234_s30 + $0xb0] sm:$0xf0] }
 0x554   : > { %5942 = vmatmul.msk.bf16.vlgmr.msrb.gmra.mxu3 %vm2004_vm15, %v2275_v41 }
 0x556   : > { %2787 = vmatpush.bf16.msra.mxu2 %v8663_v13  ;;  %2738 = vmatpush.bf16.xpose.msrb.mxu3 %v8700_v61 }
 0x557   : > { %v2064_v11 = vpop.f32.mrf.mxu3  ;;  %2542 = vmatpush.bf16.msra.mxu0 %v6527_v54  ;;  %v6010_v54 = vor.u32 %v6542_v52, %v6009_v51 }
 0x559   : > { %2672 = vmatpush.bf16.msrb.mxu1 %v6010_v54 }
 0x55f   : > { %v2066_v2 = vpop.f32.mrf.mxu3 }
 0x56e   : > { %v2385_v3 = vpop.xlane.xlu0 %2384 }
 0x56f   : > { %6874 = vrcp.f32 %v2385_v3 }
 0x575   : > { %v6875_v5 = vpop.eup %6874 }
 0x576   : > { %v2389_v8 = vmul.f32 %v6875_v5, %v8656_v44 }
 0x578   : > { %v2391_v1 = vpack.c.bf16 %v2389_v8, %v2389_v8 }
 0x57a   : > { %5946 = vmatmul.msk.bf16.vlgmr.msra.gmra.mxu3 %vm2004_vm15, %v2391_v1 }
 0x57b   : > { %2809 = vmatpush.bf16.msra.mxu3 %v8672_v39 }
 0x5ae   : > { %v2174_v44 = vpop.f32.mrf.mxu2 }
 0x5b6   : > { %v2176_v12 = vpop.f32.mrf.mxu2 }
 0x5bf   : > { %v2293_v15 = vpop.f32.mrf.mxu2 }
 0x5c7   : > { %v2198_v25 = vpop.f32.mrf.mxu3  ;;  %v2295_v18 = vpop.f32.mrf.mxu2 }
 0x5c8   : > { %v6791_v17 = vpack.i.bf16 %v2198_v25, %v2174_v44 }
 0x5ca   : > { %6792 = vrot.lane.b32.xlu2 %v6791_v17, %s7687_s13  ;;  %v6826_v17 = vld [vmem:[%s9459_s10] ss:$0 sm:$0xff] }
 0x5cf   : > { %v2200_v22 = vpop.f32.mrf.mxu3 }
 0x5d0   : > { %v2409_v16 = vpop.f32.mrf.mxu2 }
 0x5d7   : > { %v2314_v55 = vpop.f32.mrf.mxu3 }
 0x5d8   : > { %v6796_v30 = vpack.i.bf16 %v2314_v55, %v2293_v15  ;;  %v2411_v35 = vpop.f32.mrf.mxu2 }
 0x5d9   : > { %v6925_v35 = vld [vmem:[#allocation32 + $0x8] sm:$0xff] }
 0x5da   : > { %6797 = vrot.lane.b32.xlu1 %v6796_v30, %s7686_s19 }
 0x5df   : > { %v2316_v37 = vpop.f32.mrf.mxu3 }
 0x5e2   : > { %2820 = vrot.lane.b32.xlu1 %v8654_v43, %s7685_s24 }
 0x5fd   : > { %v2430_v42 = vpop.f32.mrf.mxu3 }
 0x5fe   : > { %v6801_v38 = vpack.i.bf16 %v2430_v42, %v2409_v16 }
 0x600   : > { %6802 = vrot.lane.b32.xlu2 %v6801_v38, %s7685_s24 }
 0x605   : > { %v2432_v40 = vpop.f32.mrf.mxu3 }
 0x624   : > { %v6793_v46 = vpop.permute.xlu2 %6792 }
 0x625   : > { %v6795_v63 = vunpack.i.h.bf16 %v6793_v46  ;;  %v6794_v60 = vunpack.i.l.bf16 %v6793_v46  ;;  %v6541_v46 = vld [vmem:[%s8234_s30 + $0x98] sm:$0xf0] }
 0x627   : > { %v2459_v3 = vsel %vm1961_vm13, %v2064_v11, %v6795_v63  ;;  %v2458_v5 = vsel %vm1961_vm13, %v8670_v45, %v6794_v60  ;;  %v6924_v11 = vld [vmem:[#allocation32] sm:$0xff]  ;;  %v6001_v63 = vld [vmem:[%s8234_s30 + $0x78] sm:$0xf]  ;;  %v6540_v60 = vld [vmem:[%s8234_s30 + $0x80] sm:$0xf0] }
 0x64c   : > { %v6798_v19 = vpop.permute.xlu1 %6797 }
 0x64d   : > { %v6800_v33 = vunpack.i.h.bf16 %v6798_v19  ;;  %v6799_v41 = vunpack.i.l.bf16 %v6798_v19  ;;  %v6005_v19 = vld [vmem:[%s8234_s30 + $0x90] sm:$0xf] }
 0x64f   : > { %v2462_v44 = vsel %vm2460_vm0, %v2459_v3, %v6800_v33  ;;  %v2461_v12 = vsel %vm2460_vm0, %v2458_v5, %v6799_v41  ;;  %v6002_v33 = vor.u32 %v6540_v60, %v6001_v63  ;;  %v5997_v41 = vld [vmem:[%s8234_s30 + $0x60] sm:$0xf]  ;;  %v5993_v5 = vld [vmem:[%s8234_s30 + $0x48] sm:$0xf] }
 0x654   : > { %v2821_v58 = vpop.permute.xlu1 %2820 }
 0x655   : > { %v8718_v36 = vsel %vm1961_vm13, %v2821_v58, 0  ;;  %v6006_v58 = vor.u32 %v6541_v46, %v6005_v19 }
 0x656   : > { %2835 = vmatpush.bf16.xpose.msrb.mxu0 %v8718_v36 }
 0x657   : > { %2673 = vmatpush.bf16.msrb.mxu1 %v6006_v58 }
 0x65a   : > { %v6803_v2 = vpop.permute.xlu2 %6802 }
 0x65b   : > { %v6805_v8 = vunpack.i.h.bf16 %v6803_v2  ;;  %v6804_v1 = vunpack.i.l.bf16 %v6803_v2  ;;  %2674 = vmatpush.bf16.msrb.mxu1 %v6002_v33  ;;  %v6539_v2 = vld [vmem:[%s8234_s30 + $0x68] sm:$0xf0] }
 0x65c   : > { %v5998_v3 = vor.u32 %v6539_v2, %v5997_v41 }
 0x65d   : > { %v2464_v15 = vsel %vm2463_vm1, %v2461_v12, %v6804_v1  ;;  %v2465_v25 = vsel %vm2463_vm1, %v2462_v44, %v6805_v8  ;;  %v6538_v8 = vld [vmem:[%s8234_s30 + $0x50] sm:$0xf0]  ;;  %v5989_v44 = vld [vmem:[%s8234_s30 + $0x30] sm:$0xf]  ;;  %v6537_v12 = vld [vmem:[%s8234_s30 + $0x38] sm:$0xf0] }
 0x65e   : > { %v2466_v18 = vpack.c.bf16 %v2465_v25, %v2464_v15  ;;  %v5994_v1 = vor.u32 %v6538_v8, %v5993_v5  ;;  %v5990_v15 = vor.u32 %v6537_v12, %v5989_v44  ;;  %v5985_v25 = vld [vmem:[%s8234_s30 + $0x18] sm:$0xf] }
 0x65f   : > { %2675 = vmatpush.bf16.msrb.mxu1 %v5998_v3  ;;  %v6827_v3 = vld [vmem:[%s8289_s12] ss:$0 sm:$0xff] }
 0x660   : > { %2543 = vmatmul.bf16.vlgmr.msra.gmra.mxu0 %v2466_v18  ;;  %v6536_v18 = vld [vmem:[%s8234_s30 + $0x20] sm:$0xf0] }
 0x663   : > { %2676 = vmatpush.bf16.msrb.mxu1 %v5994_v1 }
 0x667   : > { %2677 = vmatpush.bf16.msrb.mxu1 %v5990_v15  ;;  %v6828_v15 = vld [vmem:[%s9460_s26] ss:$0 sm:$0xff] }
 0x6dd   : > { %v2544_v22 = vpop.f32.mrf.mxu0 }
 0x6de   : > { %v2545_v16 = vadd.f32 %v6826_v17, %v2544_v22  ;;  %v5981_v22 = vld [vmem:[%s8234_s30] sm:$0xf] }
 0x6e0   : > { %v8730_v55 = vadd.f32 %v6924_v11, %v2545_v16  ;;  %v6535_v16 = vld [vmem:[%s8234_s30 + $0x8] sm:$0xf0] }
 0x6e1   : > { %v5982_v11 = vor.u32 %v6535_v16, %v5981_v22 }
 0x6e2   : > { %2553 = vadd.xlane.f32.xlu0 %v8730_v55 }
 0x6e5   : > { %v2546_v45 = vpop.f32.mrf.mxu0 }
 0x6e6   : > { %v2547_v30 = vadd.f32 %v6826_v17, %v2546_v45  ;;  %v5986_v17 = vor.u32 %v6536_v18, %v5985_v25 }
 0x6e8   : > { %v8733_v37 = vadd.f32 %v6925_v35, %v2547_v30  ;;  %2678 = vmatpush.bf16.msrb.mxu1 %v5986_v17 }
 0x6ea   : > { %2555 = vadd.xlane.f32.xlu2 %v8733_v37 }
 0x6ec   : > { %2679 = vmatpush.bf16.msrb.mxu1 %v5982_v11  ;;  %v6829_v11 = vld [vmem:[%s8294_s18] ss:$0 sm:$0xff] }
 0x755   : > { %v2554_v42 = vpop.xlane.xlu0 %2553 }
 0x756   : > { %v2557_v38 = vmul.f32 %v2554_v42, %v8326_v20 }
 0x758   : > { %v8738_v40 = vsub.f32 %v8730_v55, %v2557_v38 }
 0x75a   : > { %v2561_v26 = vmul.f32 %v8738_v40, %v8738_v40 }
 0x75c   : > { %2563 = vadd.xlane.f32.xlu0 %v2561_v26 }
 0x75d   : > { %v2556_v32 = vpop.xlane.xlu2 %2555 }
 0x75e   : > { %v2558_v31 = vmul.f32 %v2556_v32, %v8326_v20 }
 0x760   : > { %v8744_v49 = vsub.f32 %v8733_v37, %v2558_v31 }
 0x762   : > { %v2562_v50 = vmul.f32 %v8744_v49, %v8744_v49 }
 0x764   : > { %2565 = vadd.xlane.f32.xlu0 %v2562_v50 }
 0x778   : > { %2846 = vrot.lane.b32.xlu0 %v8660_v59, %s7685_s24 }
 0x780   : > { %2956 = vrot.lane.b32.xlu0 %v8660_v59, %s7686_s19 }
 0x788   : > { %3043 = vrot.lane.b32.xlu0 %v8654_v43, %s7687_s13 }
 0x7cf   : > { %v2564_v45 = vpop.xlane.xlu0 %2563 }
 0x7d0   : > { %v2567_v30 = vmul.f32 %v2564_v45, %v8326_v20 }
 0x7d2   : > { %v2569_v35 = vadd.f32 1e-05, %v2567_v30 }
 0x7d4   : > { %6876 = vrsqrt.f32 %v2569_v35  ;;  %vm2577_vm3 = vweird.f32 %v2569_v35 }
 0x7d7   : > { %v2566_v42 = vpop.xlane.xlu0 %2565 }
 0x7d8   : > { %v2568_v38 = vmul.f32 %v2566_v42, %v8326_v20 }
 0x7da   : > { %v6877_v26 = vpop.eup %6876  ;;  %v2570_v32 = vadd.f32 1e-05, %v2568_v38 }
 0x7db   : > { %v2572_v31 = vmul.f32 %v6877_v26, %v2569_v35  ;;  %vm2578_vm2 = vweird.f32 %v6877_v26 }
 0x7dc   : > { %6878 = vrsqrt.f32 %v2570_v32  ;;  %vm2579_vm4 = vmor %vm2577_vm3, %vm2578_vm2  ;;  %vm2587_vm6 = vweird.f32 %v2570_v32 }
 0x7dd   : > { %v2573_v50 = vmul.f32 %v6877_v26, %v2572_v31 }
 0x7df   : > { %v2574_v51 = vmul.f32 0.5, %v2573_v50 }
 0x7e1   : > { %v2575_v52 = vsub.f32 1.5, %v2574_v51 }
 0x7e2   : > { %v6879_v54 = vpop.eup %6878 }
 0x7e3   : > { %v2576_v19 = vmul.f32 %v6877_v26, %v2575_v52  ;;  %v2582_v46 = vmul.f32 %v6879_v54, %v2570_v32  ;;  %vm2588_vm5 = vweird.f32 %v6879_v54 }
 0x7e4   : > { %vm2589_vm7 = vmor %vm2587_vm6, %vm2588_vm5 }
 0x7e5   : > { %v2583_v58 = vmul.f32 %v6879_v54, %v2582_v46  ;;  %v2580_v63 = vsel %vm2579_vm4, %v6877_v26, %v2576_v19 }
 0x7e6   : > { %v2591_v41 = vmul.f32 %v2580_v63, %v8738_v40 }
 0x7e7   : > { %v2584_v60 = vmul.f32 0.5, %v2583_v58 }
 0x7e8   : > { %v2596_v12 = vmul.f32 %v6827_v3, %v2591_v41 }
 0x7e9   : > { %v2585_v33 = vsub.f32 1.5, %v2584_v60 }
 0x7ea   : > { %v2847_v2 = vpop.permute.xlu0 %2846  ;;  %v2601_v18 = vadd.f32 %v6828_v15, %v2596_v12 }
 0x7eb   : > { %v2586_v5 = vmul.f32 %v6879_v54, %v2585_v33  ;;  %v8775_v8 = vsel %vm1961_vm13, %v2847_v2, 0 }
 0x7ec   : > { %2861 = vmatpush.bf16.xpose.msra.mxu1 %v8775_v8 }
 0x7ed   : > { %v2590_v1 = vsel %vm2589_vm7, %v6879_v54, %v2586_v5 }
 0x7ee   : > { %v2592_v44 = vmul.f32 %v2590_v1, %v8744_v49 }
 0x7f0   : > { %v2597_v25 = vmul.f32 %v6827_v3, %v2592_v44 }
 0x7f2   : > { %v2602_v40 = vadd.f32 %v6828_v15, %v2597_v25  ;;  %v2957_v17 = vpop.permute.xlu0 %2956 }
 0x7f3   : > { %v8782_v16 = vsel %vm1961_vm13, %v2957_v17, 0 }
 0x7f4   : > { %v2603_v22 = vpack.c.bf16 %v2602_v40, %v2601_v18 }
 0x7f6   : > { %2680 = vmatmul.bf16.vlgmr.msrb.gmra.mxu1 %v2603_v22 }
 0x7f7   : > { %2971 = vmatpush.bf16.xpose.msrb.mxu1 %v8782_v16 }
 0x7fa   : > { %v3044_v46 = vpop.permute.xlu0 %3043 }
 0x873   : > { %v2681_v45 = vpop.f32.mrf.mxu1 }
 0x874   : > { %v2682_v30 = vadd.f32 %v6829_v11, %v2681_v45 }
 0x876   : > { %v2686_v35 = vpack.c.bf16 %v2682_v30, %v2682_v30 }
 0x878   : > { %v2816_v42 = vunpack.c.l.b16 %v2686_v35  ;;  %6011 = vmatmul.msk.bf16.vlgmr.msrb.gmra.mxu2 %vm1961_vm13, %v2686_v35 }
 0x87a   : > { %v2817_v49 = vpack.c.b16 %v2816_v42, %v2816_v42 }
 0x87b   : > { %v2683_v38 = vpop.f32.mrf.mxu1 }
 0x87c   : > { %v2684_v26 = vadd.f32 %v6829_v11, %v2683_v38  ;;  %3041 = vrot.lane.b32.xlu0 %v2817_v49, %s7687_s13  ;;  %2931 = vrot.lane.b32.xlu2 %v2817_v49, %s7686_s19 }
 0x87d   : > { %2818 = vrot.lane.b32.xlu1 %v2817_v49, %s7685_s24 }
 0x87e   : > { %v2687_v32 = vpack.c.bf16 %v2684_v26, %v2684_v26 }
 0x880   : > { %v2842_v31 = vunpack.c.l.b16 %v2687_v32  ;;  %6012 = vmatmul.msk.bf16.vlgmr.msrb.gmra.mxu3 %vm1961_vm13, %v2687_v32 }
 0x882   : > { %v2843_v50 = vpack.c.b16 %v2842_v31, %v2842_v31 }
 0x885   : > { %2844 = vrot.lane.b32.xlu1 %v2843_v50, %s7685_s24 }
 0x88d   : > { %2933 = vrot.lane.b32.xlu1 %v8654_v43, %s7686_s19 }
 0x895   : > { %2954 = vrot.lane.b32.xlu1 %v2843_v50, %s7686_s19 }
 0x89d   : > { %3066 = vrot.lane.b32.xlu1 %v8660_v59, %s7687_s13  ;;  %v8805_v59 = vsel %vm1961_vm13, %v3044_v46, 0 }
 0x8a5   : > { %3064 = vrot.lane.b32.xlu1 %v2843_v50, %s7687_s13 }
 0x8d6   : > { %v2932_v3 = vpop.permute.xlu2 %2931 }
 0x8ee   : > { %v3042_v15 = vpop.permute.xlu0 %3041 }
 0x8ef   : > { %v2819_v51 = vpop.permute.xlu1 %2818 }
 0x8f0   : > { %6015 = vmatmul.msk.bf16.vlgmr.msrb.gmra.mxu0 %vm1961_vm13, %v2819_v51 }
 0x8f7   : > { %v2845_v52 = vpop.permute.xlu1 %2844 }
 0x8f8   : > { %6016 = vmatmul.msk.bf16.vlgmr.msra.gmra.mxu1 %vm1961_vm13, %v2845_v52 }
 0x8fb   : > { %v2716_v54 = vpop.f32.mrf.mxu2 }
 0x8fc   : > { %v2744_v19 = vmul.f32 0.17677669, %v2716_v54 }
 0x8fe   : > { %v2747_v58 = vsel %vm2746_vm8, %v2744_v19, -inf }
 0x8ff   : > { %v2934_v43 = vpop.permute.xlu1 %2933  ;;  %2748 = vmax.xlane.f32.xlu0 %v2747_v58 }
 0x900   : > { %v8802_v63 = vsel %vm1961_vm13, %v2934_v43, 0 }
 0x901   : > { %2948 = vmatpush.bf16.xpose.msra.mxu0 %v8802_v63 }
 0x903   : > { %v2718_v60 = vpop.f32.mrf.mxu2  ;;  %v2740_v33 = vpop.f32.mrf.mxu3 }
 0x904   : > { %v2745_v41 = vmul.f32 0.17677669, %v2740_v33 }
 0x906   : > { %v2750_v2 = vsel %vm2746_vm8, %v2745_v41, -inf }
 0x907   : > { %v2955_v5 = vpop.permute.xlu1 %2954  ;;  %2751 = vmax.xlane.f32.xlu2 %v2750_v2 }
 0x908   : > { %6019 = vmatmul.msk.bf16.vlgmr.msra.gmra.mxu0 %vm1961_vm13, %v2932_v3  ;;  %6020 = vmatmul.msk.bf16.vlgmr.msrb.gmra.mxu1 %vm1961_vm13, %v2955_v5 }
 0x909   : > { %3058 = vmatpush.bf16.xpose.msrb.mxu0 %v8805_v59 }
 0x90b   : > { %v2742_v1 = vpop.f32.mrf.mxu3 }
 0x90f   : > { %v3067_v44 = vpop.permute.xlu1 %3066 }
 0x910   : > { %v8813_v12 = vsel %vm1961_vm13, %v3067_v44, 0 }
 0x911   : > { %3081 = vmatpush.bf16.xpose.msra.mxu1 %v8813_v12 }
 0x917   : > { %v3065_v25 = vpop.permute.xlu1 %3064 }
 0x918   : > { %6023 = vmatmul.msk.bf16.vlgmr.msrb.gmra.mxu0 %vm1961_vm13, %v3042_v15  ;;  %6024 = vmatmul.msk.bf16.vlgmr.msra.gmra.mxu1 %vm1961_vm13, %v3065_v25 }
 0x96d   : > { %v2837_v18 = vpop.f32.mrf.mxu0 }
 0x96e   : > { %v2867_v40 = vmul.f32 0.17677669, %v2837_v18 }
 0x970   : > { %v2869_v17 = vsel %vm2746_vm8, %v2867_v40, -inf }
 0x971   : > { %2870 = vmax.xlane.f32.xlu1 %v2869_v17 }
 0x972   : > { %v2749_v22 = vpop.xlane.xlu0 %2748 }
 0x973   : > { %v2753_v11 = vsub.f32 %v2744_v19, %v2749_v22 }
 0x975   : > { %v2755_v45 = vmul.f32 1.442695, %v2753_v11  ;;  %v2839_v30 = vpop.f32.mrf.mxu0  ;;  %v2863_v35 = vpop.f32.mrf.mxu1 }
 0x976   : > { %v2868_v42 = vmul.f32 0.17677669, %v2863_v35 }
 0x977   : > { %6880 = vpow2.f32 %v2755_v45 }
 0x978   : > { %v2872_v49 = vsel %vm2746_vm8, %v2868_v42, -inf }
 0x979   : > { %2873 = vmax.xlane.f32.xlu0 %v2872_v49 }
 0x97a   : > { %v2752_v1 = vpop.xlane.xlu2 %2751 }
 0x97b   : > { %v2754_v44 = vsub.f32 %v2745_v41, %v2752_v1 }
 0x97d   : > { %v6881_v38 = vpop.eup %6880  ;;  %v2865_v26 = vpop.f32.mrf.mxu1  ;;  %v2757_v15 = vmul.f32 1.442695, %v2754_v44 }
 0x97e   : > { %v2759_v32 = vsel %vm2746_vm8, %v6881_v38, 0.0 }
 0x97f   : > { %2760 = vadd.xlane.f32.xlu1 %v2759_v32  ;;  %6882 = vpow2.f32 %v2757_v15 }
 0x985   : > { %v2950_v31 = vpop.f32.mrf.mxu0  ;;  %v2973_v50 = vpop.f32.mrf.mxu1 }
 0x986   : > { %v2977_v51 = vmul.f32 0.17677669, %v2950_v31  ;;  %v2978_v52 = vmul.f32 0.17677669, %v2973_v50  ;;  %v6883_v25 = vpop.eup %6882 }
 0x987   : > { %v2762_v18 = vsel %vm2746_vm8, %v6883_v25, 0.0 }
 0x988   : > { %v2979_v54 = vsel %vm2746_vm8, %v2977_v51, -inf  ;;  %v2982_v19 = vsel %vm2746_vm8, %v2978_v52, -inf }
 0x989   : > { %2980 = vmax.xlane.f32.xlu2 %v2979_v54  ;;  %2983 = vmax.xlane.f32.xlu1 %v2982_v19 }
 0x98d   : > { %v2952_v46 = vpop.f32.mrf.mxu0  ;;  %2893 = vrot.lane.b32.xlu0 %v8663_v13, %s7685_s24  ;;  %v2975_v58 = vpop.f32.mrf.mxu1 }
 0x995   : > { %v3060_v43 = vpop.f32.mrf.mxu0  ;;  %v3083_v60 = vpop.f32.mrf.mxu1 }
 0x996   : > { %v3088_v33 = vmul.f32 0.17677669, %v3083_v60  ;;  %v3087_v17 = vmul.f32 0.17677669, %v3060_v43 }
 0x998   : > { %v3092_v2 = vsel %vm2746_vm8, %v3088_v33, -inf  ;;  %v3089_v22 = vsel %vm2746_vm8, %v3087_v17, -inf }
 0x999   : > { %3093 = vmax.xlane.f32.xlu2 %v3092_v2 }
 0x99d   : > { %v3062_v3 = vpop.f32.mrf.mxu0  ;;  %v3085_v5 = vpop.f32.mrf.mxu1 }
 0x9a2   : > { %3022 = vrot.lane.b32.xlu1 %v8672_v39, %s7686_s19 }
 0x9b7   : > { %2763 = vadd.xlane.f32.xlu0 %v2762_v18 }
 0x9bf   : > { %3090 = vmax.xlane.f32.xlu0 %v3089_v22 }
 0x9d3   : > { %3003 = vrot.lane.b32.xlu0 %v8663_v13, %s7686_s19 }
 0x9e4   : > { %v2871_v11 = vpop.xlane.xlu1 %2870 }
 0x9e5   : > { %v2875_v45 = vsub.f32 %v2867_v40, %v2871_v11 }
 0x9e7   : > { %v2877_v30 = vmul.f32 1.442695, %v2875_v45 }
 0x9e9   : > { %6884 = vpow2.f32 %v2877_v30 }
 0x9ec   : > { %v2874_v35 = vpop.xlane.xlu0 %2873 }
 0x9ed   : > { %v2876_v49 = vsub.f32 %v2868_v42, %v2874_v35 }
 0x9ef   : > { %v6885_v41 = vpop.eup %6884  ;;  %v2879_v26 = vmul.f32 1.442695, %v2876_v49 }
 0x9f0   : > { %v2881_v32 = vsel %vm2746_vm8, %v6885_v41, 0.0 }
 0x9f1   : > { %6886 = vpow2.f32 %v2879_v26  ;;  %2882 = vadd.xlane.f32.xlu2 %v2881_v32 }
 0x9f2   : > { %v2761_v31 = vpop.xlane.xlu1 %2760 }
 0x9f3   : > { %6888 = vrcp.f32 %v2761_v31 }
 0x9f7   : > { %v6887_v50 = vpop.eup %6886 }
 0x9f8   : > { %v2884_v54 = vsel %vm2746_vm8, %v6887_v50, 0.0 }
 0x9f9   : > { %v6889_v19 = vpop.eup %6888  ;;  %2885 = vadd.xlane.f32.xlu1 %v2884_v54 }
 0x9fa   : > { %v2767_v46 = vmul.f32 %v6889_v19, %v6881_v38 }
 0x9fc   : > { %v2769_v58 = vpack.c.bf16 %v2767_v46, %v2767_v46  ;;  %v2981_v40 = vpop.xlane.xlu2 %2980  ;;  %v2984_v43 = vpop.xlane.xlu1 %2983 }
 0x9fd   : > { %v2985_v60 = vsub.f32 %v2977_v51, %v2981_v40  ;;  %v2986_v2 = vsub.f32 %v2978_v52, %v2984_v43 }
 0x9fe   : > { %6013 = vmatmul.msk.bf16.vlgmr.msra.gmra.mxu2 %vm2746_vm8, %v2769_v58 }
 0x9ff   : > { %v2987_v42 = vmul.f32 1.442695, %v2985_v60  ;;  %v8835_v3 = vpop.permute.xlu0 %2893  ;;  %v2989_v5 = vmul.f32 1.442695, %v2986_v2 }
 0xa00   : > { %2906 = vmatpush.bf16.msrb.mxu2 %v8835_v3 }
 0xa01   : > { %6890 = vpow2.f32 %v2987_v42 }
 0xa02   : > { %6892 = vpow2.f32 %v2989_v5 }
 0xa07   : > { %v6891_v1 = vpop.eup %6890 }
 0xa08   : > { %v2991_v44 = vsel %vm2746_vm8, %v6891_v1, 0.0  ;;  %v6893_v51 = vpop.eup %6892 }
 0xa09   : > { %2912 = vrot.lane.b32.xlu2 %v8672_v39, %s7685_s24  ;;  %2992 = vadd.xlane.f32.xlu1 %v2991_v44  ;;  %v2994_v52 = vsel %vm2746_vm8, %v6893_v51, 0.0 }
 0xa0c   : > { %v3094_v38 = vpop.xlane.xlu2 %3093 }
 0xa0d   : > { %v3096_v15 = vsub.f32 %v3088_v33, %v3094_v38 }
 0xa0f   : > { %v3099_v18 = vmul.f32 1.442695, %v3096_v15 }
 0xa11   : > { %6894 = vpow2.f32 %v3099_v18  ;;  %2995 = vadd.xlane.f32.xlu1 %v2994_v52 }
 0xa14   : > { %v8852_v46 = vpop.permute.xlu1 %3022 }
 0xa17   : > { %v6895_v22 = vpop.eup %6894 }
 0xa18   : > { %v3104_v11 = vsel %vm2746_vm8, %v6895_v22, 0.0 }
 0xa19   : > { %3105 = vadd.xlane.f32.xlu0 %v3104_v11 }
 0xa2a   : > { %3113 = vrot.lane.b32.xlu1 %v8663_v13, %s7687_s13  ;;  %v2764_v45 = vpop.xlane.xlu0 %2763 }
 0xa2b   : > { %6896 = vrcp.f32 %v2764_v45 }
 0xa31   : > { %v6897_v30 = vpop.eup %6896 }
 0xa32   : > { %v2768_v35 = vmul.f32 %v6897_v30, %v6883_v25  ;;  %3132 = vrot.lane.b32.xlu1 %v8672_v39, %s7687_s13  ;;  %v3091_v33 = vpop.xlane.xlu0 %3090 }
 0xa33   : > { %v3095_v49 = vsub.f32 %v3087_v17, %v3091_v33 }
 0xa34   : > { %v2770_v26 = vpack.c.bf16 %v2768_v35, %v2768_v35 }
 0xa35   : > { %v3097_v32 = vmul.f32 1.442695, %v3095_v49 }
 0xa36   : > { %6014 = vmatmul.msk.bf16.vlgmr.msra.gmra.mxu3 %vm2746_vm8, %v2770_v26 }
 0xa37   : > { %6898 = vpow2.f32 %v3097_v32 }
 0xa3d   : > { %v6899_v31 = vpop.eup %6898 }
 0xa3e   : > { %v3101_v54 = vsel %vm2746_vm8, %v6899_v31, 0.0 }
 0xa3f   : > { %3102 = vadd.xlane.f32.xlu2 %v3101_v54 }
 0xa45   : > { %v8849_v19 = vpop.permute.xlu0 %3003 }
 0xa46   : > { %3016 = vmatpush.bf16.msra.mxu2 %v8849_v19 }
 0xa64   : > { %v2883_v25 = vpop.xlane.xlu2 %2882 }
 0xa65   : > { %6900 = vrcp.f32 %v2883_v25 }
 0xa6b   : > { %v6901_v58 = vpop.eup %6900 }
 0xa6c   : > { %v2889_v40 = vmul.f32 %v6901_v58, %v6885_v41  ;;  %v8854_v17 = vpop.permute.xlu2 %2912  ;;  %v2886_v43 = vpop.xlane.xlu1 %2885 }
 0xa6d   : > { %6902 = vrcp.f32 %v2886_v43  ;;  %2925 = vmatpush.bf16.msrb.mxu3 %v8854_v17 }
 0xa6e   : > { %v2891_v60 = vpack.c.bf16 %v2889_v40, %v2889_v40 }
 0xa70   : > { %6017 = vmatmul.msk.bf16.vlgmr.msrb.gmra.mxu2 %vm2746_vm8, %v2891_v60 }
 0xa71   : > { %3035 = vmatpush.bf16.msra.mxu3 %v8852_v46 }
 0xa73   : > { %v6903_v42 = vpop.eup %6902 }
 0xa74   : > { %v2890_v2 = vmul.f32 %v6903_v42, %v6887_v50 }
 0xa76   : > { %v2892_v5 = vpack.c.bf16 %v2890_v2, %v2890_v2 }
 0xa78   : > { %6018 = vmatmul.msk.bf16.vlgmr.msrb.gmra.mxu3 %vm2746_vm8, %v2892_v5 }
 0xa7c   : > { %v2993_v44 = vpop.xlane.xlu1 %2992 }
 0xa7d   : > { %6904 = vrcp.f32 %v2993_v44 }
 0xa81   : > { %v8860_v38 = vpop.f32.mrf.mxu2 }
 0xa83   : > { %v6905_v41 = vpop.eup %6904 }
 0xa84   : > { %v2999_v15 = vmul.f32 %v6905_v41, %v6891_v1  ;;  %v2996_v18 = vpop.xlane.xlu1 %2995 }
 0xa85   : > { %6906 = vrcp.f32 %v2996_v18 }
 0xa86   : > { %v3001_v52 = vpack.c.bf16 %v2999_v15, %v2999_v15 }
 0xa88   : > { %6021 = vmatmul.msk.bf16.vlgmr.msra.gmra.mxu2 %vm2746_vm8, %v3001_v52 }
 0xa89   : > { %v2791_v11 = vpop.f32.mrf.mxu2 }
 0xa8b   : > { %v6907_v45 = vpop.eup %6906 }
 0xa8c   : > { %v3000_v30 = vmul.f32 %v6907_v45, %v6893_v51  ;;  %v3106_v50 = vpop.xlane.xlu0 %3105 }
 0xa8d   : > { %6908 = vrcp.f32 %v3106_v50  ;;  %v6550_v50 = vld [vmem:[%s8240_s0 + $0x38] sm:$0xff] }
 0xa8e   : > { %v3002_v35 = vpack.c.bf16 %v3000_v30, %v3000_v30  ;;  %3250 = vmatpush.bf16.msra.mxu0 %v6550_v50  ;;  %v6830_v50 = vld [vmem:[%s9461_s7] ss:$0 sm:$0xff] }
 0xa90   : > { %6022 = vmatmul.msk.bf16.vlgmr.msra.gmra.mxu3 %vm2746_vm8, %v3002_v35 }
 0xa93   : > { %v6909_v49 = vpop.eup %6908 }
 0xa94   : > { %v3110_v26 = vmul.f32 %v6909_v49, %v6895_v22  ;;  %v6549_v49 = vld [vmem:[%s8240_s0 + $0x30] sm:$0xff] }
 0xa95   : > { %3251 = vmatpush.bf16.msra.mxu0 %v6549_v49 }
 0xa96   : > { %v3112_v32 = vpack.c.bf16 %v3110_v26, %v3110_v26  ;;  %v6548_v26 = vld [vmem:[%s8240_s0 + $0x28] sm:$0xff] }
 0xa99   : > { %3252 = vmatpush.bf16.msra.mxu0 %v6548_v26 }
 0xa9c   : > { %v8864_v33 = vpop.permute.xlu1 %3113 }
 0xa9d   : > { %3126 = vmatpush.bf16.msrb.mxu2 %v8864_v33 }
 0xaa4   : > { %v8867_v1 = vpop.permute.xlu1 %3132 }
 0xaa5   : > { %3145 = vmatpush.bf16.msrb.mxu3 %v8867_v1 }
 0xaa8   : > { %6026 = vmatmul.msk.bf16.vlgmr.msrb.gmra.mxu3 %vm2746_vm8, %v3112_v32  ;;  %v6547_v32 = vld [vmem:[%s8240_s0 + $0x20] sm:$0xff] }
 0xaa9   : > { %3253 = vmatpush.bf16.msra.mxu0 %v6547_v32 }
 0xab2   : > { %v3103_v54 = vpop.xlane.xlu2 %3102 }
 0xab3   : > { %6910 = vrcp.f32 %v3103_v54  ;;  %v6546_v54 = vld [vmem:[%s8240_s0 + $0x18] sm:$0xff] }
 0xab4   : > { %3254 = vmatpush.bf16.msra.mxu0 %v6546_v54 }
 0xab9   : > { %v6911_v51 = vpop.eup %6910  ;;  %v2811_v25 = vpop.f32.mrf.mxu3 }
 0xaba   : > { %v3109_v58 = vmul.f32 %v6911_v51, %v6899_v31  ;;  %v6545_v51 = vld [vmem:[%s8240_s0 + $0x10] sm:$0xff] }
 0xabb   : > { %3255 = vmatpush.bf16.msra.mxu0 %v6545_v51 }
 0xabc   : > { %v3111_v40 = vpack.c.bf16 %v3109_v58, %v3109_v58  ;;  %v6544_v58 = vld [vmem:[%s8240_s0 + $0x8] sm:$0xff] }
 0xabe   : > { %6025 = vmatmul.msk.bf16.vlgmr.msrb.gmra.mxu2 %vm2746_vm8, %v3111_v40  ;;  %v6543_v40 = vld [vmem:[%s8240_s0] sm:$0xff] }
 0xabf   : > { %3256 = vmatpush.bf16.msra.mxu0 %v6544_v58 }
 0xac1   : > { %v2813_v43 = vpop.f32.mrf.mxu3 }
 0xac3   : > { %3257 = vmatpush.bf16.msra.mxu0 %v6543_v40 }
 0xaf3   : > { %v2908_v60 = vpop.f32.mrf.mxu2 }
 0xafb   : > { %v2910_v42 = vpop.f32.mrf.mxu2  ;;  %v2927_v2 = vpop.f32.mrf.mxu3 }
 0xafc   : > { %v6806_v22 = vpack.i.bf16 %v2927_v2, %v2908_v60 }
 0xafe   : > { %6807 = vrot.lane.b32.xlu1 %v6806_v22, %s7687_s13 }
 0xb03   : > { %v2929_v5 = vpop.f32.mrf.mxu3 }
 0xb0b   : > { %v3018_v44 = vpop.f32.mrf.mxu2 }
 0xb13   : > { %v3020_v41 = vpop.f32.mrf.mxu2  ;;  %v3037_v15 = vpop.f32.mrf.mxu3 }
 0xb14   : > { %v6811_v18 = vpack.i.bf16 %v3037_v15, %v3018_v44 }
 0xb16   : > { %6812 = vrot.lane.b32.xlu2 %v6811_v18, %s7686_s19 }
 0xb1b   : > { %v3039_v31 = vpop.f32.mrf.mxu3 }
 0xb2b   : > { %v3147_v52 = vpop.f32.mrf.mxu3 }
 0xb33   : > { %v3149_v11 = vpop.f32.mrf.mxu3 }
 0xb41   : > { %v3128_v45 = vpop.f32.mrf.mxu2 }
 0xb42   : > { %v6816_v30 = vpack.i.bf16 %v3147_v52, %v3128_v45 }
 0xb44   : > { %6817 = vrot.lane.b32.xlu0 %v6816_v30, %s7685_s24 }
 0xb49   : > { %v3130_v35 = vpop.f32.mrf.mxu2 }
 0xb70   : > { %v6808_v43 = vpop.permute.xlu1 %6807  ;;  %v6813_v2 = vpop.permute.xlu2 %6812 }
 0xb71   : > { %v6810_v60 = vunpack.i.h.bf16 %v6808_v43  ;;  %v6809_v42 = vunpack.i.l.bf16 %v6808_v43  ;;  %v6815_v22 = vunpack.i.h.bf16 %v6813_v2  ;;  %v6814_v5 = vunpack.i.l.bf16 %v6813_v2  ;;  %v6117_v2 = vld [vmem:[%s8263_s28 + $0x70] sm:$0xf] }
 0xb73   : > { %v3176_v44 = vsel %vm1961_vm13, %v2811_v25, %v6810_v60  ;;  %v3175_v41 = vsel %vm1961_vm13, %v8860_v38, %v6809_v42 }
 0xb74   : > { %v3178_v52 = vsel %vm2460_vm0, %v3176_v44, %v6815_v22  ;;  %v3177_v11 = vsel %vm2460_vm0, %v3175_v41, %v6814_v5  ;;  %v6566_v22 = vld [vmem:[%s8263_s28 + $0x74] sm:$0xf0]  ;;  %v6565_v5 = vld [vmem:[%s8263_s28 + $0x74] sm:$0xf]  ;;  %v6119_v41 = vld [vmem:[%s8263_s28 + $0x78] sm:$0xf0] }
 0xb75   : > { %v6118_v44 = vor.u32 %v6566_v22, %v6117_v2  ;;  %v6085_v2 = vld [vmem:[%s8263_s28 + $0x30] sm:$0xf]  ;;  %v6558_v22 = vld [vmem:[%s8263_s28 + $0x34] sm:$0xf0] }
 0xb77   : > { %3421 = vmatpush.bf16.msrb.mxu1 %v6118_v44  ;;  %v6086_v44 = vor.u32 %v6558_v22, %v6085_v2 }
 0xbb6   : > { %v6818_v15 = vpop.permute.xlu0 %6817 }
 0xbb7   : > { %v6820_v18 = vunpack.i.h.bf16 %v6818_v15  ;;  %v6819_v31 = vunpack.i.l.bf16 %v6818_v15  ;;  %v6122_v15 = vor.u32 %v6565_v5, %v6119_v41  ;;  %v6557_v5 = vld [vmem:[%s8263_s28 + $0x34] sm:$0xf]  ;;  %v6087_v41 = vld [vmem:[%s8263_s28 + $0x38] sm:$0xf0] }
 0xbb9   : > { %v3180_v45 = vsel %vm2463_vm1, %v3178_v52, %v6820_v18  ;;  %v3179_v30 = vsel %vm2463_vm1, %v3177_v11, %v6819_v31  ;;  %3435 = vmatpush.bf16.msra.mxu2 %v6122_v15  ;;  %v6109_v18 = vld [vmem:[%s8263_s28 + $0x60] sm:$0xf]  ;;  %v6564_v31 = vld [vmem:[%s8263_s28 + $0x64] sm:$0xf0]  ;;  %v6563_v52 = vld [vmem:[%s8263_s28 + $0x64] sm:$0xf]  ;;  %v6090_v15 = vor.u32 %v6557_v5, %v6087_v41 }
 0xbba   : > { %v3181_v35 = vpack.c.bf16 %v3180_v45, %v3179_v30  ;;  %v6110_v11 = vor.u32 %v6564_v31, %v6109_v18  ;;  %v6111_v45 = vld [vmem:[%s8263_s28 + $0x68] sm:$0xf0]  ;;  %v6077_v18 = vld [vmem:[%s8263_s28 + $0x20] sm:$0xf]  ;;  %v6556_v31 = vld [vmem:[%s8263_s28 + $0x24] sm:$0xf0] }
 0xbbb   : > { %v6114_v30 = vor.u32 %v6563_v52, %v6111_v45  ;;  %v6555_v52 = vld [vmem:[%s8263_s28 + $0x24] sm:$0xf]  ;;  %v6079_v45 = vld [vmem:[%s8263_s28 + $0x28] sm:$0xf0] }
 0xbbc   : > { %3258 = vmatmul.bf16.vlgmr.msra.gmra.mxu0 %v3181_v35  ;;  %3422 = vmatpush.bf16.msrb.mxu1 %v6110_v11  ;;  %v6101_v35 = vld [vmem:[%s8263_s28 + $0x50] sm:$0xf]  ;;  %v6078_v11 = vor.u32 %v6556_v31, %v6077_v18 }
 0xbbd   : > { %3436 = vmatpush.bf16.msra.mxu2 %v6114_v30  ;;  %v6082_v30 = vor.u32 %v6555_v52, %v6079_v45 }
 0xc39   : > { %v3259_v49 = vpop.f32.mrf.mxu0 }
 0xc3a   : > { %v3260_v25 = vadd.f32 %v6830_v50, %v3259_v49  ;;  %v6561_v49 = vld [vmem:[%s8263_s28 + $0x54] sm:$0xf] }
 0xc3c   : > { %v8893_v26 = vadd.f32 %v3260_v25, %v8730_v55 }
 0xc3e   : > { %3268 = vadd.xlane.f32.xlu1 %v8893_v26 }
 0xc41   : > { %v3261_v38 = vpop.f32.mrf.mxu0 }
 0xc42   : > { %v3262_v32 = vadd.f32 %v6830_v50, %v3261_v38  ;;  %v6562_v50 = vld [vmem:[%s8263_s28 + $0x54] sm:$0xf0]  ;;  %v6103_v38 = vld [vmem:[%s8263_s28 + $0x58] sm:$0xf0] }
 0xc43   : > { %v6102_v25 = vor.u32 %v6562_v50, %v6101_v35  ;;  %v6069_v35 = vld [vmem:[%s8263_s28 + $0x10] sm:$0xf]  ;;  %v6554_v50 = vld [vmem:[%s8263_s28 + $0x14] sm:$0xf0] }
 0xc44   : > { %v8897_v54 = vadd.f32 %v3262_v32, %v8733_v37  ;;  %v6106_v32 = vor.u32 %v6561_v49, %v6103_v38  ;;  %v6553_v49 = vld [vmem:[%s8263_s28 + $0x14] sm:$0xf]  ;;  %v6071_v38 = vld [vmem:[%s8263_s28 + $0x18] sm:$0xf0] }
 0xc45   : > { %3423 = vmatpush.bf16.msrb.mxu1 %v6102_v25  ;;  %v6070_v25 = vor.u32 %v6554_v50, %v6069_v35 }
 0xc46   : > { %3270 = vadd.xlane.f32.xlu0 %v8897_v54  ;;  %3437 = vmatpush.bf16.msra.mxu2 %v6106_v32  ;;  %v6061_v32 = vld [vmem:[%s8263_s28] sm:$0xf] }
 0xcb1   : > { %v3269_v51 = vpop.xlane.xlu1 %3268 }
 0xcb2   : > { %v3272_v58 = vmul.f32 %v3269_v51, %v8326_v20  ;;  %v6093_v51 = vld [vmem:[%s8263_s28 + $0x40] sm:$0xf] }
 0xcb4   : > { %v8902_v40 = vsub.f32 %v8893_v26, %v3272_v58  ;;  %v6560_v58 = vld [vmem:[%s8263_s28 + $0x44] sm:$0xf0] }
 0xcb6   : > { %v3276_v55 = vmul.f32 %v8902_v40, %v8902_v40 }
 0xcb8   : > { %3278 = vadd.xlane.f32.xlu2 %v3276_v55  ;;  %v6559_v55 = vld [vmem:[%s8263_s28 + $0x44] sm:$0xf] }
 0xcb9   : > { %v3271_v43 = vpop.xlane.xlu0 %3270 }
 0xcba   : > { %v3273_v37 = vmul.f32 %v3271_v43, %v8326_v20  ;;  %v6094_v43 = vor.u32 %v6560_v58, %v6093_v51  ;;  %v6552_v51 = vld [vmem:[%s8263_s28 + $0x4] sm:$0xf0] }
 0xcbb   : > { %v6062_v2 = vor.u32 %v6552_v51, %v6061_v32 }
 0xcbc   : > { %v8908_v60 = vsub.f32 %v8897_v54, %v3273_v37  ;;  %v6095_v37 = vld [vmem:[%s8263_s28 + $0x48] sm:$0xf0]  ;;  %3424 = vmatpush.bf16.msrb.mxu1 %v6094_v43  ;;  %v6551_v43 = vld [vmem:[%s8263_s28 + $0x4] sm:$0xf] }
 0xcbe   : > { %v3277_v42 = vmul.f32 %v8908_v60, %v8908_v60 }
 0xcc0   : > { %3280 = vadd.xlane.f32.xlu1 %v3277_v42  ;;  %v6098_v42 = vor.u32 %v6559_v55, %v6095_v37  ;;  %3425 = vmatpush.bf16.msrb.mxu1 %v6086_v44  ;;  %v6074_v55 = vor.u32 %v6553_v49, %v6071_v38  ;;  %v6063_v37 = vld [vmem:[%s8263_s28 + $0x8] sm:$0xf0] }
 0xcc1   : > { %v6066_v22 = vor.u32 %v6551_v43, %v6063_v37 }
 0xcc2   : > { %3438 = vmatpush.bf16.msra.mxu2 %v6098_v42 }
 0xcc4   : > { %3426 = vmatpush.bf16.msrb.mxu1 %v6078_v11 }
 0xcc6   : > { %3439 = vmatpush.bf16.msra.mxu2 %v6090_v15 }
 0xcc8   : > { %3427 = vmatpush.bf16.msrb.mxu1 %v6070_v25 }
 0xcca   : > { %3440 = vmatpush.bf16.msra.mxu2 %v6082_v30 }
 0xccc   : > { %3428 = vmatpush.bf16.msrb.mxu1 %v6062_v2  ;;  %v6832_v2 = vld [vmem:[%s9462_s22] ss:$0 sm:$0xff] }
 0xcce   : > { %3441 = vmatpush.bf16.msra.mxu2 %v6074_v55 }
 0xcd2   : > { %3442 = vmatpush.bf16.msra.mxu2 %v6066_v22 }
 0xd2b   : > { %v3279_v58 = vpop.xlane.xlu2 %3278 }
 0xd2c   : > { %v3282_v42 = vmul.f32 %v3279_v58, %v8326_v20  ;;  %v6831_v58 = vld [vmem:[%s8300_s25] ss:$0 sm:$0xff] }
 0xd2e   : > { %v3284_v5 = vadd.f32 1e-05, %v3282_v42 }
 0xd30   : > { %6912 = vrsqrt.f32 %v3284_v5  ;;  %vm3292_vm10 = vweird.f32 %v3284_v5 }
 0xd33   : > { %v3281_v44 = vpop.xlane.xlu1 %3280 }
 0xd34   : > { %v3283_v41 = vmul.f32 %v3281_v44, %v8326_v20 }
 0xd36   : > { %v6913_v15 = vpop.eup %6912  ;;  %v3285_v18 = vadd.f32 1e-05, %v3283_v41  ;;  %v6574_v41 = vld [vmem:[%s8266_s6 + $0x38] sm:$0xff] }
 0xd37   : > { %v3287_v31 = vmul.f32 %v6913_v15, %v3284_v5  ;;  %vm3293_vm9 = vweird.f32 %v6913_v15  ;;  %3619 = vmatpush.bf16.msra.mxu3 %v6574_v41 }
 0xd38   : > { %6914 = vrsqrt.f32 %v3285_v18  ;;  %vm3294_vm11 = vmor %vm3292_vm10, %vm3293_vm9  ;;  %vm3302_vm14 = vweird.f32 %v3285_v18 }
 0xd39   : > { %v3288_v52 = vmul.f32 %v6913_v15, %v3287_v31  ;;  %v6581_v31 = vld [vmem:[%s8266_s6 + $0x70] sm:$0xff] }
 0xd3b   : > { %v3289_v11 = vmul.f32 0.5, %v3288_v52  ;;  %v6571_v52 = vld [vmem:[%s8266_s6 + $0x20] sm:$0xff] }
 0xd3d   : > { %v3290_v45 = vsub.f32 1.5, %v3289_v11  ;;  %v6580_v11 = vld [vmem:[%s8266_s6 + $0x68] sm:$0xff] }
 0xd3e   : > { %v6915_v30 = vpop.eup %6914 }
 0xd3f   : > { %v3291_v35 = vmul.f32 %v6913_v15, %v3290_v45  ;;  %v3297_v50 = vmul.f32 %v6915_v30, %v3285_v18  ;;  %vm3303_vm12 = vweird.f32 %v6915_v30  ;;  %v6572_v18 = vld [vmem:[%s8266_s6 + $0x28] sm:$0xff]  ;;  %v6570_v45 = vld [vmem:[%s8266_s6 + $0x18] sm:$0xff] }
 0xd40   : > { %vm3304_vm2 = vmor %vm3302_vm14, %vm3303_vm12 }
 0xd41   : > { %v3298_v49 = vmul.f32 %v6915_v30, %v3297_v50  ;;  %v3295_v25 = vsel %vm3294_vm11, %v6913_v15, %v3291_v35  ;;  %v6573_v15 = vld [vmem:[%s8266_s6 + $0x30] sm:$0xff]  ;;  %v6578_v50 = vld [vmem:[%s8266_s6 + $0x58] sm:$0xff] }
 0xd42   : > { %v3306_v51 = vmul.f32 %v3295_v25, %v8902_v40  ;;  %3620 = vmatpush.bf16.msra.mxu3 %v6573_v15  ;;  %v6569_v35 = vld [vmem:[%s8266_s6 + $0x10] sm:$0xff]  ;;  %v3335_v25 = vld [vmem:[%s8312_s15] sm:$0x3] }
 0xd43   : > { %v3299_v38 = vmul.f32 0.5, %v3298_v49  ;;  %v6568_v49 = vld [vmem:[%s8266_s6 + $0x8] sm:$0xff] }
 0xd44   : > { %v3311_v42 = vmul.f32 %v6831_v58, %v3306_v51  ;;  %v3337_v51 = vperm.slane %v3335_v25, 0 }
 0xd45   : > { %v3300_v32 = vsub.f32 1.5, %v3299_v38  ;;  %v6577_v38 = vld [vmem:[%s8266_s6 + $0x50] sm:$0xff] }
 0xd46   : > { %v3316_v5 = vadd.f32 %v6832_v2, %v3311_v42  ;;  %3621 = vmatpush.bf16.msra.mxu3 %v6572_v18 }
 0xd47   : > { %v3301_v55 = vmul.f32 %v6915_v30, %v3300_v32  ;;  %v6567_v32 = vld [vmem:[%s8266_s6] sm:$0xff] }
 0xd49   : > { %v3305_v43 = vsel %vm3304_vm2, %v6915_v30, %v3301_v55  ;;  %v6579_v30 = vld [vmem:[%s8266_s6 + $0x60] sm:$0xff] }
 0xd4a   : > { %v3307_v37 = vmul.f32 %v3305_v43, %v8908_v60  ;;  %v6582_v60 = vld [vmem:[%s8266_s6 + $0x78] sm:$0xff]  ;;  %3622 = vmatpush.bf16.msra.mxu3 %v6571_v52 }
 0xd4b   : > { %3633 = vmatpush.bf16.msrb.mxu0 %v6582_v60 }
 0xd4c   : > { %v3312_v22 = vmul.f32 %v6831_v58, %v3307_v37  ;;  %v6576_v58 = vld [vmem:[%s8266_s6 + $0x48] sm:$0xff]  ;;  %v6575_v37 = vld [vmem:[%s8266_s6 + $0x40] sm:$0xff] }
 0xd4e   : > { %v3317_v44 = vadd.f32 %v6832_v2, %v3312_v22  ;;  %3623 = vmatpush.bf16.msra.mxu3 %v6570_v45  ;;  %v3338_v2 = vperm.slane %v3335_v25, 1 }
 0xd4f   : > { %3634 = vmatpush.bf16.msrb.mxu0 %v6581_v31 }
 0xd50   : > { %v3318_v40 = vpack.c.bf16 %v3317_v44, %v3316_v5 }
 0xd52   : > { %3429 = vmatmul.bf16.vlgmr.msrb.gmra.mxu1 %v3318_v40  ;;  %3443 = vmatmul.bf16.vlgmr.msra.gmra.mxu2 %v3318_v40 }
 0xd53   : > { %3635 = vmatpush.bf16.msrb.mxu0 %v6580_v11  ;;  %3624 = vmatpush.bf16.msra.mxu3 %v6569_v35 }
 0xd57   : > { %3636 = vmatpush.bf16.msrb.mxu0 %v6579_v30  ;;  %3625 = vmatpush.bf16.msra.mxu3 %v6568_v49 }
 0xd5b   : > { %3637 = vmatpush.bf16.msrb.mxu0 %v6578_v50  ;;  %3626 = vmatpush.bf16.msra.mxu3 %v6567_v32 }
 0xd5f   : > { %3638 = vmatpush.bf16.msrb.mxu0 %v6577_v38 }
 0xd63   : > { %3639 = vmatpush.bf16.msrb.mxu0 %v6576_v58 }
 0xd67   : > { %3640 = vmatpush.bf16.msrb.mxu0 %v6575_v37 }
 0xdcf   : > { %v3430_v55 = vpop.f32.mrf.mxu1 }
 0xdd0   : > { %v3431_v43 = vadd.f32 %v3430_v55, %v3337_v51 }
 0xdd2   : > { %v3453_v42 = vmul.f32 0.044715, %v3431_v43 }
 0xdd4   : > { %v3457_v22 = vmul.f32 %v3453_v42, %v3431_v43 }
 0xdd5   : > { %v3444_v5 = vpop.f32.mrf.mxu2 }
 0xdd6   : > { %v3461_v44 = vmul.f32 %v3457_v22, %v3431_v43  ;;  %v3445_v40 = vadd.f32 %v3444_v5, %v3338_v2 }
 0xdd7   : > { %v3432_v41 = vpop.f32.mrf.mxu1 }
 0xdd8   : > { %v3465_v15 = vadd.f32 %v3461_v44, %v3431_v43  ;;  %v3454_v60 = vmul.f32 0.044715, %v3445_v40  ;;  %v3433_v18 = vadd.f32 %v3432_v41, %v3337_v51 }
 0xdda   : > { %v3458_v31 = vmul.f32 %v3454_v60, %v3445_v40  ;;  %v3455_v52 = vmul.f32 0.044715, %v3433_v18  ;;  %v3469_v11 = vmul.f32 0.7978846, %v3465_v15  ;;  %v3449_v15 = vmul.f32 0.5, %v3431_v43 }
 0xddb   : > { %v3451_v60 = vmul.f32 0.5, %v3433_v18 }
 0xddc   : > { %v3462_v45 = vmul.f32 %v3458_v31, %v3445_v40  ;;  %v3459_v30 = vmul.f32 %v3455_v52, %v3433_v18  ;;  %6916 = vtanh.f32 %v3469_v11 }
 0xddd   : > { %v3446_v35 = vpop.f32.mrf.mxu2 }
 0xdde   : > { %v3466_v50 = vadd.f32 %v3462_v45, %v3445_v40  ;;  %v3463_v49 = vmul.f32 %v3459_v30, %v3433_v18  ;;  %v3447_v38 = vadd.f32 %v3446_v35, %v3338_v2 }
 0xde0   : > { %v3467_v32 = vadd.f32 %v3463_v49, %v3433_v18  ;;  %v3456_v25 = vmul.f32 0.044715, %v3447_v38  ;;  %v3470_v58 = vmul.f32 0.7978846, %v3466_v50  ;;  %v3450_v50 = vmul.f32 0.5, %v3445_v40 }
 0xde1   : > { %v3452_v49 = vmul.f32 0.5, %v3447_v38 }
 0xde2   : > { %v3471_v55 = vmul.f32 0.7978846, %v3467_v32  ;;  %v3460_v37 = vmul.f32 %v3456_v25, %v3447_v38  ;;  %v6917_v22 = vpop.eup %6916 }
 0xde3   : > { %v3477_v44 = vadd.f32 1.0, %v6917_v22 }
 0xde4   : > { %v3464_v42 = vmul.f32 %v3460_v37, %v3447_v38  ;;  %6918 = vtanh.f32 %v3471_v55  ;;  %v6833_v37 = vld [vmem:[%s8307_s2] ss:$0 sm:$0xff] }
 0xde5   : > { %6920 = vtanh.f32 %v3470_v58  ;;  %v3481_v52 = vmul.f32 %v3477_v44, %v3449_v15 }
 0xde6   : > { %v3468_v5 = vadd.f32 %v3464_v42, %v3447_v38 }
 0xde8   : > { %v3472_v51 = vmul.f32 0.7978846, %v3468_v5 }
 0xdea   : > { %v6919_v41 = vpop.eup %6918  ;;  %6922 = vtanh.f32 %v3472_v51 }
 0xdeb   : > { %v3479_v31 = vadd.f32 1.0, %v6919_v41  ;;  %v6921_v2 = vpop.eup %6920 }
 0xdec   : > { %v3478_v30 = vadd.f32 1.0, %v6921_v2 }
 0xded   : > { %v3483_v45 = vmul.f32 %v3479_v31, %v3451_v60 }
 0xdee   : > { %v3482_v25 = vmul.f32 %v3478_v30, %v3450_v50 }
 0xdef   : > { %v3485_v11 = vpack.c.bf16 %v3483_v45, %v3481_v52 }
 0xdf0   : > { %v6923_v35 = vpop.eup %6922 }
 0xdf1   : > { %3627 = vmatmul.bf16.vlgmr.msra.gmra.mxu3 %v3485_v11  ;;  %v3480_v32 = vadd.f32 1.0, %v6923_v35 }
 0xdf3   : > { %v3484_v58 = vmul.f32 %v3480_v32, %v3452_v49 }
 0xdf5   : > { %v3486_v55 = vpack.c.bf16 %v3484_v58, %v3482_v25 }
 0xdf7   : > { %3641 = vmatmul.bf16.vlgmr.msrb.gmra.mxu0 %v3486_v55 }
 0xe74   : > { %v3628_v42 = vpop.f32.mrf.mxu3  ;;  %v3642_v43 = vpop.f32.mrf.mxu0 }
 0xe75   : > { %v3629_v18 = vadd.f32 %v6833_v37, %v3628_v42 }
 0xe77   : > { %v3643_v22 = vadd.f32 %v3642_v43, %v3629_v18 }
 0xe79   : > { %v3647_v5 = vadd.f32 %v3643_v22, %v8893_v26 }
 0xe7c   : > { %v3630_v51 = vpop.f32.mrf.mxu3  ;;  %v3644_v41 = vpop.f32.mrf.mxu0 }
 0xe7d   : > { %v3631_v44 = vadd.f32 %v6833_v37, %v3630_v51  ;;  %3652 = sbr.rel (%p6187_p5) target bundleno = 3989 (0xf95), region = 208 }
 0xe7f   : > { %v3645_v15 = vadd.f32 %v3644_v41, %v3631_v44 }
 0xe81   : > { %v3648_v60 = vadd.f32 %v3645_v15, %v8897_v54 }
 0xe82   : > { %3655 = vadd.xlane.f32.xlu0 %v3647_v5  ;;  %v6926_v51 = vld [vmem:[%s9464_s14] ss:$0 sm:$0xff] }
 0xe8a   : > { %3657 = vadd.xlane.f32.xlu0 %v3648_v60 }
 0xef5   : > { %v3656_v40 = vpop.xlane.xlu0 %3655 }
 0xef6   : > { %v3659_v38 = vmul.f32 %v3656_v40, %v8326_v20  ;;  %v6927_v40 = vld [vmem:[%s9465_s21] ss:$0 sm:$0xff] }
 0xef8   : > { %v3661_v31 = vsub.f32 %v3647_v5, %v3659_v38 }
 0xefa   : > { %v3663_v2 = vmul.f32 %v3661_v31, %v3661_v31 }
 0xefc   : > { %3665 = vadd.xlane.f32.xlu1 %v3663_v2 }
 0xefd   : > { %v3658_v52 = vpop.xlane.xlu0 %3657 }
 0xefe   : > { %v3660_v26 = vmul.f32 %v3658_v52, %v8326_v20 }
 0xf00   : > { %v3662_v45 = vsub.f32 %v3648_v60, %v3660_v26 }
 0xf02   : > { %v3664_v11 = vmul.f32 %v3662_v45, %v3662_v45 }
 0xf04   : > { %3667 = vadd.xlane.f32.xlu1 %v3664_v11 }
 0xf6f   : > { %v3666_v30 = vpop.xlane.xlu1 %3665 }
 0xf70   : > { %v3669_v54 = vmul.f32 %v3666_v30, %v8326_v20 }
 0xf72   : > { %v3671_v35 = vadd.f32 1e-05, %v3669_v54 }
 0xf74   : > { %6928 = vrsqrt.f32 %v3671_v35  ;;  %vm3679_vm4 = vweird.f32 %v3671_v35 }
 0xf77   : > { %v3668_v50 = vpop.xlane.xlu1 %3667 }
 0xf78   : > { %v3670_v49 = vmul.f32 %v3668_v50, %v8326_v20 }
 0xf7a   : > { %v6929_v32 = vpop.eup %6928  ;;  %v3672_v25 = vadd.f32 1e-05, %v3670_v49 }
 0xf7b   : > { %v3674_v58 = vmul.f32 %v6929_v32, %v3671_v35  ;;  %vm3680_vm3 = vweird.f32 %v6929_v32 }
 0xf7c   : > { %6930 = vrsqrt.f32 %v3672_v25  ;;  %vm3681_vm5 = vmor %vm3679_vm4, %vm3680_vm3  ;;  %vm3689_vm7 = vweird.f32 %v3672_v25 }
 0xf7d   : > { %v3675_v55 = vmul.f32 %v6929_v32, %v3674_v58 }
 0xf7f   : > { %v3676_v37 = vmul.f32 0.5, %v3675_v55 }
 0xf81   : > { %v3677_v42 = vsub.f32 1.5, %v3676_v37 }
 0xf82   : > { %v6931_v43 = vpop.eup %6930 }
 0xf83   : > { %v3678_v18 = vmul.f32 %v6929_v32, %v3677_v42  ;;  %v3684_v22 = vmul.f32 %v6931_v43, %v3672_v25  ;;  %vm3690_vm6 = vweird.f32 %v6931_v43 }
 0xf84   : > { %vm3691_vm9 = vmor %vm3689_vm7, %vm3690_vm6 }
 0xf85   : > { %v3682_v44 = vsel %vm3681_vm5, %v6929_v32, %v3678_v18  ;;  %v3685_v41 = vmul.f32 %v6931_v43, %v3684_v22 }
 0xf86   : > { %v3693_v15 = vmul.f32 %v3682_v44, %v3661_v31 }
 0xf87   : > { %v3686_v38 = vmul.f32 0.5, %v3685_v41 }
 0xf88   : > { %v3698_v2 = vmul.f32 %v6926_v51, %v3693_v15 }
 0xf89   : > { %v3687_v52 = vsub.f32 1.5, %v3686_v38 }
 0xf8a   : > { %v3703_v26 = vadd.f32 %v6927_v40, %v3698_v2 }
 0xf8b   : > { %v3688_v11 = vmul.f32 %v6931_v43, %v3687_v52 }
 0xf8c   : > { %3705 = vst [vmem:[#allocation32] sm:$0xff] %v3703_v26 }
 0xf8d   : > { %v3692_v30 = vsel %vm3691_vm9, %v6931_v43, %v3688_v11 }
 0xf8e   : > { %v3694_v54 = vmul.f32 %v3692_v30, %v3662_v45 }
 0xf90   : > { %v3699_v35 = vmul.f32 %v6926_v51, %v3694_v54 }
 0xf92   : > { %v3704_v50 = vadd.f32 %v6927_v40, %v3699_v35 }
 0xf94   : > { %3706 = vst [vmem:[#allocation32 + $0x8] sm:$0xff] %v3704_v50 }
 0xf95 PF: > { %s9466_s23 = sld [smem:[#allocation46_spill]] }
 0xf9b   : > { %p6188_p8 = scmp.ge.s32.totalorder %s9466_s23, 1 }
 0xf9c   : > { %s7689_s17 = smov (!%p6188_p8), 64  }
 0xf9d   : > { %3710 = sbr.rel (%p6188_p8) target bundleno = 7019 (0x1b6b), region = 212 }
 0xfa2   : > { %3711 = vst [vmem:[#allocation32] sm:$0xff] %v3647_v5  ;;  %v6219_v31 = vld [vmem:[%s8215_s3 + $0xa8] sm:$0xf]  ;;  %v6590_v49 = vld [vmem:[%s8215_s3 + $0xb0] sm:$0xf0]  ;;  %3809 = vmatpush.bf16.xpose.msra.mxu1 %v8499_v47  ;;  %3927 = vmatpush.bf16.xpose.msra.mxu2 %v8538_v34 }
 0xfa3   : > { %3712 = vst [vmem:[#allocation32 + $0x8] sm:$0xff] %v3648_v60  ;;  %v6220_v45 = vor.u32 %v6590_v49, %v6219_v31  ;;  %v6215_v32 = vld [vmem:[%s8215_s3 + $0x90] sm:$0xf]  ;;  %v6589_v25 = vld [vmem:[%s8215_s3 + $0x98] sm:$0xf0]  ;;  %3869 = vmatpush.bf16.msra.mxu3 %v8503_v48 }
 0xfa4   : > { %v6216_v5 = vor.u32 %v6589_v25, %v6215_v32  ;;  %v6211_v47 = vld [vmem:[%s8215_s3 + $0x78] sm:$0xf]  ;;  %v6588_v34 = vld [vmem:[%s8215_s3 + $0x80] sm:$0xf0]  ;;  %v6207_v60 = vld [vmem:[%s8215_s3 + $0x60] sm:$0xf] }
 0xfa5   : > { %3783 = vmatpush.bf16.msra.mxu0 %v6220_v45  ;;  %v6587_v58 = vld [vmem:[%s8215_s3 + $0x68] sm:$0xf0]  ;;  %v6212_v55 = vor.u32 %v6588_v34, %v6211_v47  ;;  %v6586_v48 = vld [vmem:[%s8215_s3 + $0x50] sm:$0xf0]  ;;  %v6199_v42 = vld [vmem:[%s8215_s3 + $0x30] sm:$0xf] }
 0xfa6   : > { %v6585_v43 = vld [vmem:[%s8215_s3 + $0x38] sm:$0xf0]  ;;  %v6195_v18 = vld [vmem:[%s8215_s3 + $0x18] sm:$0xf]  ;;  %v6584_v22 = vld [vmem:[%s8215_s3 + $0x20] sm:$0xf0] }
 0xfa7   : > { %3885 = vmatpush.bf16.msrb.mxu3 %v8515_v57  ;;  %v6200_v57 = vor.u32 %v6585_v43, %v6199_v42  ;;  %v6196_v51 = vor.u32 %v6584_v22, %v6195_v18  ;;  %v6191_v44 = vld [vmem:[%s8215_s3] sm:$0xf]  ;;  %v6583_v41 = vld [vmem:[%s8215_s3 + $0x8] sm:$0xf0]  ;;  %v9019_v50 = vld [vmem:[#allocation11] sm:$0xff] }
 0xfa8   : > { %v6192_v15 = vor.u32 %v6583_v41, %v6191_v44  ;;  %v6962_v40 = vld [vmem:[%s8223_s4] ss:$0 sm:$0xff]  ;;  %s7690_s4 = smov 96   ;;  %v3714_v34 = vld [vmem:[#allocation11 + $0x8] sm:$0xff] }
 0xfa9   : > { %3784 = vmatpush.bf16.msra.mxu0 %v6216_v5 }
 0xfaa   : > { %3906 = vmatpush.bf16.xpose.msrb.mxu1 %v8534_v10  ;;  %4005 = vmatpush.bf16.xpose.msrb.mxu2 %v8549_v21  ;;  %v6208_v10 = vor.u32 %v6587_v58, %v6207_v60  ;;  %v6203_v21 = vld [vmem:[%s8215_s3 + $0x48] sm:$0xf]  ;;  %s7688_s3 = smov 32  }
 0xfab   : > { %v6204_v37 = vor.u32 %v6586_v48, %v6203_v21 }
 0xfad   : > { %3785 = vmatpush.bf16.msra.mxu0 %v6212_v55 }
 0xfb1   : > { %3786 = vmatpush.bf16.msra.mxu0 %v6208_v10 }
 0xfb5   : > { %3787 = vmatpush.bf16.msra.mxu0 %v6204_v37 }
 0xfb9   : > { %3788 = vmatpush.bf16.msra.mxu0 %v6200_v57 }
 0xfbd   : > { %3789 = vmatpush.bf16.msra.mxu0 %v6196_v51 }
 0xfc1   : > { %3790 = vmatpush.bf16.msra.mxu0 %v6192_v15 }
 0xfc4   : > { %3791 = vmatmul.bf16.vlgmr.msra.gmra.mxu0 %v8462_v62 }
 0xfc5   : > { %3825 = vmatpush.bf16.xpose.msrb.mxu0 %v8511_v56 }
 0xfcd   : > { %4023 = vmatpush.bf16.xpose.msra.mxu0 %v8542_v14 }
0x1041   : > { %v3792_v38 = vpop.f32.mrf.mxu0 }
0x1042   : > { %v3793_v2 = vadd.f32 %v6962_v40, %v3792_v38 }
0x1044   : > { %v3797_v52 = vpack.c.bf16 %v3793_v2, %v3793_v2 }
0x1046   : > { %v3892_v26 = vunpack.c.l.b16 %v3797_v52  ;;  %6221 = vmatmul.msk.bf16.vlgmr.msra.gmra.mxu1 %vm1961_vm13, %v3797_v52 }
0x1047   : > { %3987 = vmatpush.bf16.msra.mxu1 %v8625_v7 }
0x1048   : > { %v3893_v11 = vpack.c.b16 %v3892_v26, %v3892_v26 }
0x1049   : > { %v3794_v30 = vpop.f32.mrf.mxu0 }
0x104a   : > { %v3795_v54 = vadd.f32 %v6962_v40, %v3794_v30  ;;  %4089 = vrot.lane.b32.xlu2 %v3893_v11, %s7688_s3  ;;  %3993 = vrot.lane.b32.xlu1 %v3893_v11, %s7689_s17 }
0x104c   : > { %v3798_v62 = vpack.c.bf16 %v3795_v54, %v3795_v54 }
0x104e   : > { %v3913_v56 = vunpack.c.l.b16 %v3798_v62  ;;  %6222 = vmatmul.msk.bf16.vlgmr.msrb.gmra.mxu0 %vm1961_vm13, %v3798_v62 }
0x104f   : > { %4119 = vmatpush.bf16.xpose.msrb.mxu0 %v8559_v29 }
0x1050   : > { %v3914_v14 = vpack.c.b16 %v3913_v56, %v3913_v56 }
0x1052   : > { %3915 = vrot.lane.b32.xlu0 %v3914_v14, %s7690_s4  ;;  %4107 = vrot.lane.b32.xlu2 %v3914_v14, %s7688_s3 }
0x1053   : > { %4011 = vrot.lane.b32.xlu1 %v3914_v14, %s7689_s17 }
0x105a   : > { %3894 = vrot.lane.b32.xlu0 %v3893_v11, %s7690_s4 }
0x10a4   : > { %v4090_v25 = vpop.permute.xlu2 %4089 }
0x10ac   : > { %v4108_v48 = vpop.permute.xlu2 %4107 }
0x10bc   : > { %v3994_v7 = vpop.permute.xlu1 %3993 }
0x10c3   : > { %v3811_v35 = vpop.f32.mrf.mxu1 }
0x10c4   : > { %v3831_v31 = vmul.f32 0.17677669, %v3811_v35  ;;  %v3916_v49 = vpop.permute.xlu0 %3915 }
0x10c5   : > { %v4012_v45 = vpop.permute.xlu1 %4011  ;;  %6226 = vmatmul.msk.bf16.vlgmr.msra.gmra.mxu2 %vm1961_vm13, %v3916_v49 }
0x10c6   : > { %6230 = vmatmul.msk.bf16.vlgmr.msra.gmra.mxu0 %vm1961_vm13, %v4012_v45  ;;  %v3833_v29 = vadd.f32 %v3831_v31, %v9019_v50  ;;  %4101 = vmatpush.bf16.xpose.msra.mxu2 %v8553_v23 }
0x10c8   : > { %v3835_v32 = vsel %vm2004_vm15, %v3833_v29, -inf }
0x10c9   : > { %3836 = vmax.xlane.f32.xlu0 %v3835_v32 }
0x10cb   : > { %v3813_v5 = vpop.f32.mrf.mxu1  ;;  %v3827_v47 = vpop.f32.mrf.mxu0 }
0x10cc   : > { %v3832_v60 = vmul.f32 0.17677669, %v3827_v47  ;;  %v3895_v58 = vpop.permute.xlu0 %3894 }
0x10cd   : > { %6225 = vmatmul.msk.bf16.vlgmr.msrb.gmra.mxu1 %vm1961_vm13, %v3895_v58 }
0x10ce   : > { %v3834_v55 = vadd.f32 %v3832_v60, %v3714_v34  ;;  %4083 = vmatpush.bf16.msrb.mxu1 %v8667_v24 }
0x10d0   : > { %v3838_v10 = vsel %vm2004_vm15, %v3834_v55, -inf }
0x10d1   : > { %3839 = vmax.xlane.f32.xlu1 %v3838_v10 }
0x10d3   : > { %v3829_v21 = vpop.f32.mrf.mxu0 }
0x10d5   : > { %6229 = vmatmul.msk.bf16.vlgmr.msrb.gmra.mxu2 %vm1961_vm13, %v3994_v7 }
0x10d6   : > { %6234 = vmatmul.msk.bf16.vlgmr.msrb.gmra.mxu0 %vm1961_vm13, %v4108_v48 }
0x10e5   : > { %6233 = vmatmul.msk.bf16.vlgmr.msra.gmra.mxu2 %vm1961_vm13, %v4090_v25 }
0x113c   : > { %v3837_v23 = vpop.xlane.xlu0 %3836 }
0x113d   : > { %v3841_v37 = vsub.f32 %v3833_v29, %v3837_v23 }
0x113f   : > { %v3843_v42 = vmul.f32 1.442695, %v3841_v37 }
0x1141   : > { %6971 = vpow2.f32 %v3843_v42 }
0x1143   : > { %v4025_v43 = vpop.f32.mrf.mxu0 }
0x1144   : > { %v3840_v57 = vpop.xlane.xlu1 %3839  ;;  %v4030_v14 = vmul.f32 0.17677669, %v4025_v43 }
0x1145   : > { %v3842_v18 = vsub.f32 %v3834_v55, %v3840_v57 }
0x1146   : > { %v4032_v29 = vadd.f32 %v4030_v14, %v3714_v34 }
0x1147   : > { %v6972_v22 = vpop.eup %6971  ;;  %v3845_v24 = vmul.f32 1.442695, %v3842_v18 }
0x1148   : > { %v3929_v51 = vpop.f32.mrf.mxu2  ;;  %v3847_v44 = vsel %vm2004_vm15, %v6972_v22, 0.0  ;;  %v4036_v5 = vsel %vm2004_vm15, %v4032_v29, -inf }
0x1149   : > { %6973 = vpow2.f32 %v3845_v24  ;;  %3848 = vadd.xlane.f32.xlu1 %v3847_v44  ;;  %v3934_v52 = vmul.f32 0.17677669, %v3929_v51 }
0x114a   : > { %v3908_v41 = vpop.f32.mrf.mxu1 }
0x114b   : > { %v3933_v15 = vmul.f32 0.17677669, %v3908_v41  ;;  %v4027_v40 = vpop.f32.mrf.mxu0  ;;  %v3936_v56 = vadd.f32 %v3934_v52, %v3714_v34 }
0x114d   : > { %v3935_v38 = vadd.f32 %v3933_v15, %v9019_v50  ;;  %v3940_v7 = vsel %vm2004_vm15, %v3936_v56, -inf }
0x114f   : > { %v6974_v2 = vpop.eup %6973  ;;  %v3937_v26 = vsel %vm2004_vm15, %v3935_v38, -inf }
0x1150   : > { %v3931_v11 = vpop.f32.mrf.mxu2  ;;  %3938 = vmax.xlane.f32.xlu2 %v3937_v26  ;;  %v3850_v30 = vsel %vm2004_vm15, %v6974_v2, 0.0 }
0x1151   : > { %3851 = vadd.xlane.f32.xlu1 %v3850_v30 }
0x1152   : > { %v3910_v54 = vpop.f32.mrf.mxu1 }
0x1153   : > { %v4121_v62 = vpop.f32.mrf.mxu0 }
0x1154   : > { %v4126_v25 = vmul.f32 0.17677669, %v4121_v62 }
0x1156   : > { %v4128_v60 = vadd.f32 %v4126_v25, %v3714_v34 }
0x1158   : > { %v4007_v35 = vpop.f32.mrf.mxu2  ;;  %3941 = vmax.xlane.f32.xlu2 %v3940_v7  ;;  %v4132_v58 = vsel %vm2004_vm15, %v4128_v60, -inf }
0x1159   : > { %v4029_v31 = vmul.f32 0.17677669, %v4007_v35 }
0x115b   : > { %v4123_v49 = vpop.f32.mrf.mxu0  ;;  %v4031_v45 = vadd.f32 %v4029_v31, %v9019_v50 }
0x115d   : > { %v4033_v32 = vsel %vm2004_vm15, %v4031_v45, -inf }
0x115e   : > { %4034 = vmax.xlane.f32.xlu0 %v4033_v32 }
0x1160   : > { %v4009_v47 = vpop.f32.mrf.mxu2  ;;  %4037 = vmax.xlane.f32.xlu2 %v4036_v5 }
0x1168   : > { %v4103_v55 = vpop.f32.mrf.mxu2  ;;  %4133 = vmax.xlane.f32.xlu2 %v4132_v58 }
0x1169   : > { %v4125_v10 = vmul.f32 0.17677669, %v4103_v55 }
0x116b   : > { %v4127_v21 = vadd.f32 %v4125_v10, %v9019_v50 }
0x116d   : > { %v4129_v48 = vsel %vm2004_vm15, %v4127_v21, -inf }
0x116e   : > { %4130 = vmax.xlane.f32.xlu0 %v4129_v48 }
0x1170   : > { %v4105_v23 = vpop.f32.mrf.mxu2 }
0x11bc   : > { %v3849_v37 = vpop.xlane.xlu1 %3848 }
0x11bd   : > { %6975 = vrcp.f32 %v3849_v37 }
0x11c3   : > { %v6976_v42 = vpop.eup %6975  ;;  %v3939_v43 = vpop.xlane.xlu2 %3938 }
0x11c4   : > { %v3943_v57 = vsub.f32 %v3935_v38, %v3939_v43  ;;  %v3855_v18 = vmul.f32 %v6976_v42, %v6972_v22  ;;  %v3852_v51 = vpop.xlane.xlu1 %3851 }
0x11c6   : > { %v3945_v24 = vmul.f32 1.442695, %v3943_v57  ;;  %v3857_v34 = vpack.c.bf16 %v3855_v18, %v3855_v18 }
0x11c8   : > { %6977 = vpow2.f32 %v3945_v24  ;;  %6223 = vmatmul.msk.bf16.vlgmr.msra.gmra.mxu3 %vm2004_vm15, %v3857_v34 }
0x11c9   : > { %6979 = vrcp.f32 %v3852_v51  ;;  %3971 = vmatpush.bf16.msra.mxu3 %v8642_v27 }
0x11cb   : > { %v3942_v50 = vpop.xlane.xlu2 %3941 }
0x11cc   : > { %v3944_v44 = vsub.f32 %v3936_v56, %v3942_v50 }
0x11ce   : > { %v6978_v41 = vpop.eup %6977  ;;  %v3947_v15 = vmul.f32 1.442695, %v3944_v44 }
0x11cf   : > { %v6980_v40 = vpop.eup %6979  ;;  %v3949_v52 = vsel %vm2004_vm15, %v6978_v41, 0.0 }
0x11d0   : > { %6981 = vpow2.f32 %v3947_v15  ;;  %3950 = vadd.xlane.f32.xlu0 %v3949_v52  ;;  %v3856_v26 = vmul.f32 %v6980_v40, %v6974_v2 }
0x11d1   : > { %v4035_v38 = vpop.xlane.xlu0 %4034 }
0x11d2   : > { %v4039_v22 = vsub.f32 %v4031_v45, %v4035_v38  ;;  %v3858_v7 = vpack.c.bf16 %v3856_v26, %v3856_v26 }
0x11d3   : > { %v4038_v11 = vpop.xlane.xlu2 %4037 }
0x11d4   : > { %v4041_v30 = vmul.f32 1.442695, %v4039_v22  ;;  %v4040_v54 = vsub.f32 %v4032_v29, %v4038_v11 }
0x11d6   : > { %v6982_v62 = vpop.eup %6981  ;;  %6983 = vpow2.f32 %v4041_v30  ;;  %v4043_v14 = vmul.f32 1.442695, %v4040_v54 }
0x11d7   : > { %v3952_v27 = vsel %vm2004_vm15, %v6982_v62, 0.0 }
0x11d8   : > { %6985 = vpow2.f32 %v4043_v14  ;;  %3953 = vadd.xlane.f32.xlu1 %v3952_v27  ;;  %6224 = vmatmul.msk.bf16.vlgmr.msrb.gmra.mxu3 %vm2004_vm15, %v3858_v7 }
0x11d9   : > { %4067 = vmatpush.bf16.msrb.mxu3 %v8645_v28 }
0x11db   : > { %v4134_v56 = vpop.xlane.xlu2 %4133 }
0x11dc   : > { %v6984_v35 = vpop.eup %6983  ;;  %v4136_v31 = vsub.f32 %v4128_v60, %v4134_v56  ;;  %v6598_v56 = vld [vmem:[%s8226_s11 + $0x38] sm:$0xff] }
0x11dd   : > { %v4045_v2 = vsel %vm2004_vm15, %v6984_v35, 0.0  ;;  %4284 = vmatpush.bf16.msrb.mxu2 %v6598_v56  ;;  %v6605_v56 = vld [vmem:[%s8234_s30 + $0x98] sm:$0xf0] }
0x11de   : > { %v6986_v49 = vpop.eup %6985  ;;  %v4139_v45 = vmul.f32 1.442695, %v4136_v31  ;;  %4046 = vadd.xlane.f32.xlu2 %v4045_v2 }
0x11df   : > { %v4048_v29 = vsel %vm2004_vm15, %v6986_v49, 0.0 }
0x11e0   : > { %6987 = vpow2.f32 %v4139_v45  ;;  %4049 = vadd.xlane.f32.xlu0 %v4048_v29 }
0x11e1   : > { %v4131_v32 = vpop.xlane.xlu0 %4130 }
0x11e2   : > { %v4135_v25 = vsub.f32 %v4127_v21, %v4131_v32 }
0x11e4   : > { %v4137_v5 = vmul.f32 1.442695, %v4135_v25 }
0x11e6   : > { %v6988_v47 = vpop.eup %6987  ;;  %6989 = vpow2.f32 %v4137_v5 }
0x11e7   : > { %v4144_v58 = vsel %vm2004_vm15, %v6988_v47, 0.0 }
0x11e8   : > { %4145 = vadd.xlane.f32.xlu2 %v4144_v58  ;;  %v6595_v58 = vld [vmem:[%s8226_s11 + $0x20] sm:$0xff] }
0x11ec   : > { %v6990_v28 = vpop.eup %6989 }
0x11ed   : > { %v4141_v60 = vsel %vm2004_vm15, %v6990_v28, 0.0 }
0x11ee   : > { %4142 = vadd.xlane.f32.xlu1 %v4141_v60  ;;  %v6593_v60 = vld [vmem:[%s8226_s11 + $0x10] sm:$0xff] }
0x1243   : > { %v3951_v55 = vpop.xlane.xlu0 %3950 }
0x1244   : > { %6991 = vrcp.f32 %v3951_v55  ;;  %v6592_v55 = vld [vmem:[%s8226_s11 + $0x8] sm:$0xff] }
0x124a   : > { %v6992_v10 = vpop.eup %6991 }
0x124b   : > { %v3957_v48 = vmul.f32 %v6992_v10, %v6978_v41  ;;  %v9053_v23 = vpop.f32.mrf.mxu3  ;;  %v3954_v37 = vpop.xlane.xlu1 %3953  ;;  %v6591_v10 = vld [vmem:[%s8226_s11] sm:$0xff] }
0x124c   : > { %6993 = vrcp.f32 %v3954_v37 }
0x124d   : > { %v3959_v42 = vpack.c.bf16 %v3957_v48, %v3957_v48 }
0x124f   : > { %6227 = vmatmul.msk.bf16.vlgmr.msra.gmra.mxu3 %vm2004_vm15, %v3959_v42 }
0x1250   : > { %4163 = vmatpush.bf16.msra.mxu3 %v8680_v53 }
0x1251   : > { %v4047_v21 = vpop.xlane.xlu2 %4046 }
0x1252   : > { %v6994_v43 = vpop.eup %6993  ;;  %6995 = vrcp.f32 %v4047_v21 }
0x1253   : > { %v3958_v57 = vmul.f32 %v6994_v43, %v6982_v62  ;;  %v3873_v18 = vpop.f32.mrf.mxu3  ;;  %v4050_v24 = vpop.xlane.xlu0 %4049 }
0x1254   : > { %6997 = vrcp.f32 %v4050_v24 }
0x1255   : > { %v3960_v51 = vpack.c.bf16 %v3958_v57, %v3958_v57 }
0x1257   : > { %6228 = vmatmul.msk.bf16.vlgmr.msra.gmra.mxu1 %vm2004_vm15, %v3960_v51 }
0x1258   : > { %v6996_v34 = vpop.eup %6995  ;;  %4179 = vmatpush.bf16.msra.mxu1 %v8686_v0 }
0x1259   : > { %v4053_v50 = vmul.f32 %v6996_v34, %v6984_v35  ;;  %v6597_v35 = vld [vmem:[%s8226_s11 + $0x30] sm:$0xff] }
0x125a   : > { %v6998_v15 = vpop.eup %6997  ;;  %4285 = vmatpush.bf16.msrb.mxu2 %v6597_v35 }
0x125b   : > { %v9059_v44 = vpop.f32.mrf.mxu3  ;;  %v4055_v41 = vpack.c.bf16 %v4053_v50, %v4053_v50  ;;  %v4054_v53 = vmul.f32 %v6998_v15, %v6986_v49  ;;  %v4146_v38 = vpop.xlane.xlu2 %4145 }
0x125d   : > { %v4056_v22 = vpack.c.bf16 %v4054_v53, %v4054_v53 }
0x125f   : > { %6231 = vmatmul.msk.bf16.vlgmr.msrb.gmra.mxu3 %vm2004_vm15, %v4055_v41 }
0x1260   : > { %4447 = vmatpush.bf16.xpose.msrb.mxu3 %v8694_v9 }
0x1261   : > { %v4143_v40 = vpop.xlane.xlu1 %4142 }
0x1262   : > { %6999 = vrcp.f32 %v4143_v40 }
0x1263   : > { %v3889_v52 = vpop.f32.mrf.mxu3  ;;  %7001 = vrcp.f32 %v4146_v38 }
0x1267   : > { %6232 = vmatmul.msk.bf16.vlgmr.msrb.gmra.mxu1 %vm2004_vm15, %v4056_v22 }
0x1268   : > { %v7000_v26 = vpop.eup %6999  ;;  %4463 = vmatpush.bf16.xpose.msrb.mxu1 %v8700_v61 }
0x1269   : > { %v4149_v0 = vmul.f32 %v7000_v26, %v6990_v28  ;;  %v7002_v30 = vpop.eup %7001  ;;  %v6594_v28 = vld [vmem:[%s8226_s11 + $0x18] sm:$0xff] }
0x126a   : > { %v4150_v9 = vmul.f32 %v7002_v30, %v6988_v47 }
0x126b   : > { %v4151_v11 = vpack.c.bf16 %v4149_v0, %v4149_v0 }
0x126c   : > { %v4152_v54 = vpack.c.bf16 %v4150_v9, %v4150_v9 }
0x126f   : > { %6235 = vmatmul.msk.bf16.vlgmr.msra.gmra.mxu3 %vm2004_vm15, %v4151_v11 }
0x1270   : > { %4505 = vmatpush.bf16.msra.mxu3 %v8663_v13  ;;  %v6596_v13 = vld [vmem:[%s8226_s11 + $0x28] sm:$0xff]  ;;  %s9467_s11 = scalar_lea.vmem [#allocation17], %s8211_s1 }
0x1271   : > { %4286 = vmatpush.bf16.msrb.mxu2 %v6596_v13  ;;  %v6963_v52 = vld [vmem:[%s9467_s11] ss:$0 sm:$0xff]  ;;  %v6604_v13 = vld [vmem:[%s8234_s30 + $0x80] sm:$0xf0] }
0x1275   : > { %4287 = vmatpush.bf16.msrb.mxu2 %v6595_v58 }
0x1277   : > { %6236 = vmatmul.msk.bf16.vlgmr.msra.gmra.mxu1 %vm2004_vm15, %v4152_v54 }
0x1278   : > { %4521 = vmatpush.bf16.msra.mxu1 %v8672_v39 }
0x1279   : > { %4288 = vmatpush.bf16.msrb.mxu2 %v6594_v28  ;;  %v6275_v28 = vld [vmem:[%s8234_s30 + $0x18] sm:$0xf] }
0x127d   : > { %4289 = vmatpush.bf16.msrb.mxu2 %v6593_v60  ;;  %v6600_v60 = vld [vmem:[%s8234_s30 + $0x20] sm:$0xf0] }
0x1281   : > { %4290 = vmatpush.bf16.msrb.mxu2 %v6592_v55  ;;  %v6276_v55 = vor.u32 %v6600_v60, %v6275_v28 }
0x1285   : > { %4291 = vmatpush.bf16.msrb.mxu2 %v6591_v10  ;;  %v6271_v10 = vld [vmem:[%s8234_s30] sm:$0xf] }
0x1289   : > { %4542 = vmatpush.bf16.xpose.msra.mxu2 %v8718_v36 }
0x12d2   : > { %v3973_v62 = vpop.f32.mrf.mxu3 }
0x12d4   : > { %v3989_v14 = vpop.f32.mrf.mxu1 }
0x12d5   : > { %v6932_v7 = vpack.i.bf16 %v3989_v14, %v3973_v62  ;;  %v6299_v14 = vld [vmem:[%s8234_s30 + $0xa8] sm:$0xf] }
0x12d7   : > { %6933 = vrot.lane.b32.xlu0 %v6932_v7, %s7688_s3  ;;  %v6606_v7 = vld [vmem:[%s8234_s30 + $0xb0] sm:$0xf0] }
0x12da   : > { %v3975_v61 = vpop.f32.mrf.mxu3 }
0x12db   : > { %v6300_v61 = vor.u32 %v6606_v7, %v6299_v14 }
0x12dc   : > { %v3991_v27 = vpop.f32.mrf.mxu1 }
0x12dd   : > { %4421 = vmatpush.bf16.msra.mxu0 %v6300_v61  ;;  %v6295_v27 = vld [vmem:[%s8234_s30 + $0x90] sm:$0xf] }
0x12de   : > { %v6296_v35 = vor.u32 %v6605_v56, %v6295_v27  ;;  %v6966_v27 = vld [vmem:[%s8294_s18] ss:$0 sm:$0xff]  ;;  %s9470_s18 = scalar_lea.vmem [#allocation27], %s8211_s1 }
0x12e1   : > { %4422 = vmatpush.bf16.msra.mxu0 %v6296_v35 }
0x12e2   : > { %v4069_v31 = vpop.f32.mrf.mxu3 }
0x12e4   : > { %v4085_v2 = vpop.f32.mrf.mxu1 }
0x12e5   : > { %v6937_v49 = vpack.i.bf16 %v4085_v2, %v4069_v31  ;;  %v6291_v31 = vld [vmem:[%s8234_s30 + $0x78] sm:$0xf] }
0x12e6   : > { %v6292_v2 = vor.u32 %v6604_v13, %v6291_v31 }
0x12e7   : > { %6938 = vrot.lane.b32.xlu1 %v6937_v49, %s7689_s17  ;;  %v6287_v49 = vld [vmem:[%s8234_s30 + $0x60] sm:$0xf] }
0x12e8   : > { %4423 = vmatpush.bf16.msra.mxu0 %v6292_v2 }
0x12ea   : > { %v4071_v39 = vpop.f32.mrf.mxu3 }
0x12eb   : > { %v6603_v39 = vld [vmem:[%s8234_s30 + $0x68] sm:$0xf0] }
0x12ec   : > { %v4087_v45 = vpop.f32.mrf.mxu1 }
0x12ed   : > { %v6288_v45 = vor.u32 %v6603_v39, %v6287_v49 }
0x12ef   : > { %4424 = vmatpush.bf16.msra.mxu0 %v6288_v45 }
0x12f2   : > { %v4165_v29 = vpop.f32.mrf.mxu3 }
0x12f4   : > { %v4181_v32 = vpop.f32.mrf.mxu1 }
0x12f5   : > { %v6942_v25 = vpack.i.bf16 %v4181_v32, %v4165_v29  ;;  %v6283_v29 = vld [vmem:[%s8234_s30 + $0x48] sm:$0xf]  ;;  %v6602_v32 = vld [vmem:[%s8234_s30 + $0x50] sm:$0xf0] }
0x12f7   : > { %6943 = vrot.lane.b32.xlu2 %v6942_v25, %s7690_s4  ;;  %v6284_v25 = vor.u32 %v6602_v32, %v6283_v29 }
0x12f9   : > { %4425 = vmatpush.bf16.msra.mxu0 %v6284_v25 }
0x12fa   : > { %v4167_v5 = vpop.f32.mrf.mxu3 }
0x12fb   : > { %v6279_v5 = vld [vmem:[%s8234_s30 + $0x30] sm:$0xf] }
0x12fc   : > { %v4183_v47 = vpop.f32.mrf.mxu1 }
0x12fd   : > { %v6601_v47 = vld [vmem:[%s8234_s30 + $0x38] sm:$0xf0] }
0x12fe   : > { %v6280_v58 = vor.u32 %v6601_v47, %v6279_v5 }
0x1300   : > { %4426 = vmatpush.bf16.msra.mxu0 %v6280_v58 }
0x1304   : > { %4427 = vmatpush.bf16.msra.mxu0 %v6276_v55 }
0x1349   : > { %v6934_v48 = vpop.permute.xlu0 %6933 }
0x134a   : > { %v6936_v37 = vunpack.i.h.bf16 %v6934_v48  ;;  %v6935_v42 = vunpack.i.l.bf16 %v6934_v48  ;;  %v6599_v48 = vld [vmem:[%s8234_s30 + $0x8] sm:$0xf0]  ;;  %s9468_s30 = scalar_lea.vmem [#allocation26], %s8211_s1 }
0x134c   : > { %v4210_v24 = vsel %vm1961_vm13, %v9059_v44, %v6936_v37  ;;  %v4209_v51 = vsel %vm1961_vm13, %v9053_v23, %v6935_v42 }
0x1351   : > { %v6944_v21 = vpop.permute.xlu2 %6943 }
0x1352   : > { %v6946_v34 = vunpack.i.h.bf16 %v6944_v21  ;;  %v6945_v50 = vunpack.i.l.bf16 %v6944_v21  ;;  %v6272_v21 = vor.u32 %v6599_v48, %v6271_v10 }
0x1354   : > { %4428 = vmatpush.bf16.msra.mxu0 %v6272_v21 }
0x1358   : > { %4563 = vmatpush.bf16.xpose.msrb.mxu0 %v8775_v8 }
0x1359   : > { %v6939_v43 = vpop.permute.xlu1 %6938 }
0x135a   : > { %v6941_v57 = vunpack.i.h.bf16 %v6939_v43  ;;  %v6940_v18 = vunpack.i.l.bf16 %v6939_v43 }
0x135c   : > { %v4211_v41 = vsel %vm2460_vm0, %v4209_v51, %v6940_v18  ;;  %v4212_v36 = vsel %vm2460_vm0, %v4210_v24, %v6941_v57 }
0x135d   : > { %v4213_v15 = vsel %vm2463_vm1, %v4211_v41, %v6945_v50  ;;  %v4214_v53 = vsel %vm2463_vm1, %v4212_v36, %v6946_v34 }
0x135e   : > { %v4215_v40 = vpack.c.bf16 %v4214_v53, %v4213_v15 }
0x1360   : > { %4292 = vmatmul.bf16.vlgmr.msrb.gmra.mxu2 %v4215_v40 }
0x1361   : > { %4639 = vmatpush.bf16.xpose.msrb.mxu2 %v8802_v63 }
0x13e3   : > { %v4293_v44 = vpop.f32.mrf.mxu2 }
0x13e4   : > { %v4294_v38 = vadd.f32 %v6963_v52, %v4293_v44 }
0x13e6   : > { %v9093_v23 = vadd.f32 %v4294_v38, %v8316_v4 }
0x13e8   : > { %4302 = vadd.xlane.f32.xlu0 %v9093_v23 }
0x13eb   : > { %v4295_v22 = vpop.f32.mrf.mxu2 }
0x13ec   : > { %v4296_v26 = vadd.f32 %v6963_v52, %v4295_v22 }
0x13ee   : > { %v9097_v0 = vadd.f32 %v4296_v26, %v8319_v6  ;;  %v6964_v26 = vld [vmem:[%s8289_s12] ss:$0 sm:$0xff]  ;;  %s9469_s12 = scalar_lea.vmem [#allocation21], %s8211_s1 }
0x13f0   : > { %4304 = vadd.xlane.f32.xlu1 %v9097_v0 }
0x145b   : > { %v4303_v63 = vpop.xlane.xlu0 %4302 }
0x145c   : > { %v4306_v11 = vmul.f32 %v4303_v63, %v8326_v20 }
0x145e   : > { %v9102_v30 = vsub.f32 %v9093_v23, %v4306_v11 }
0x1460   : > { %v4310_v4 = vmul.f32 %v9102_v30, %v9102_v30 }
0x1462   : > { %4312 = vadd.xlane.f32.xlu2 %v4310_v4 }
0x1463   : > { %v4305_v9 = vpop.xlane.xlu1 %4304 }
0x1464   : > { %v4307_v6 = vmul.f32 %v4305_v9, %v8326_v20 }
0x1466   : > { %v9108_v54 = vsub.f32 %v9097_v0, %v4307_v6  ;;  %v6965_v6 = vld [vmem:[%s9468_s30] ss:$0 sm:$0xff] }
0x1468   : > { %v4311_v62 = vmul.f32 %v9108_v54, %v9108_v54 }
0x146a   : > { %4314 = vadd.xlane.f32.xlu0 %v4311_v62 }
0x14d5   : > { %v4313_v37 = vpop.xlane.xlu2 %4312 }
0x14d6   : > { %v4316_v42 = vmul.f32 %v4313_v37, %v8326_v20 }
0x14d8   : > { %v4318_v43 = vadd.f32 1e-05, %v4316_v42 }
0x14da   : > { %7003 = vrsqrt.f32 %v4318_v43  ;;  %vm4326_vm10 = vweird.f32 %v4318_v43 }
0x14dd   : > { %v4315_v57 = vpop.xlane.xlu0 %4314 }
0x14de   : > { %v4317_v18 = vmul.f32 %v4315_v57, %v8326_v20 }
0x14e0   : > { %v7004_v24 = vpop.eup %7003  ;;  %v4319_v51 = vadd.f32 1e-05, %v4317_v18 }
0x14e1   : > { %v4321_v34 = vmul.f32 %v7004_v24, %v4318_v43  ;;  %vm4327_vm15 = vweird.f32 %v7004_v24 }
0x14e2   : > { %7005 = vrsqrt.f32 %v4319_v51  ;;  %vm4328_vm11 = vmor %vm4326_vm10, %vm4327_vm15  ;;  %vm4336_vm14 = vweird.f32 %v4319_v51 }
0x14e3   : > { %v4322_v50 = vmul.f32 %v7004_v24, %v4321_v34 }
0x14e5   : > { %v4323_v41 = vmul.f32 0.5, %v4322_v50 }
0x14e7   : > { %v4324_v36 = vsub.f32 1.5, %v4323_v41 }
0x14e8   : > { %v7006_v15 = vpop.eup %7005 }
0x14e9   : > { %v4325_v53 = vmul.f32 %v7004_v24, %v4324_v36  ;;  %v4331_v40 = vmul.f32 %v7006_v15, %v4319_v51  ;;  %vm4337_vm12 = vweird.f32 %v7006_v15 }
0x14ea   : > { %vm4338_vm2 = vmor %vm4336_vm14, %vm4337_vm12 }
0x14eb   : > { %v4332_v52 = vmul.f32 %v7006_v15, %v4331_v40  ;;  %v4329_v8 = vsel %vm4328_vm11, %v7004_v24, %v4325_v53 }
0x14ec   : > { %v4340_v22 = vmul.f32 %v4329_v8, %v9102_v30 }
0x14ed   : > { %v4333_v44 = vmul.f32 0.5, %v4332_v52 }
0x14ee   : > { %v4345_v9 = vmul.f32 %v6964_v26, %v4340_v22 }
0x14ef   : > { %v4334_v38 = vsub.f32 1.5, %v4333_v44 }
0x14f0   : > { %v4350_v14 = vadd.f32 %v6965_v6, %v4345_v9 }
0x14f1   : > { %v4335_v63 = vmul.f32 %v7006_v15, %v4334_v38 }
0x14f3   : > { %v4339_v11 = vsel %vm4338_vm2, %v7006_v15, %v4335_v63 }
0x14f4   : > { %v4341_v4 = vmul.f32 %v4339_v11, %v9108_v54 }
0x14f6   : > { %v4346_v62 = vmul.f32 %v6964_v26, %v4341_v4 }
0x14f8   : > { %v4351_v7 = vadd.f32 %v6965_v6, %v4346_v62 }
0x14fa   : > { %v4352_v61 = vpack.c.bf16 %v4351_v7, %v4350_v14 }
0x14fc   : > { %4429 = vmatmul.bf16.vlgmr.msra.gmra.mxu0 %v4352_v61 }
0x14fd   : > { %4657 = vmatpush.bf16.xpose.msra.mxu0 %v8782_v16 }
0x1579   : > { %v4430_v56 = vpop.f32.mrf.mxu0 }
0x157a   : > { %v4431_v30 = vadd.f32 %v6966_v27, %v4430_v56 }
0x157c   : > { %v4435_v35 = vpack.c.bf16 %v4431_v30, %v4431_v30 }
0x157e   : > { %v4528_v31 = vunpack.c.l.b16 %v4435_v35  ;;  %6301 = vmatmul.msk.bf16.vlgmr.msrb.gmra.mxu3 %vm1961_vm13, %v4435_v35 }
0x157f   : > { %4605 = vmatpush.bf16.msrb.mxu3 %v8835_v3 }
0x1580   : > { %v4529_v54 = vpack.c.b16 %v4528_v31, %v4528_v31 }
0x1581   : > { %v4432_v13 = vpop.f32.mrf.mxu0 }
0x1582   : > { %v4433_v2 = vadd.f32 %v6966_v27, %v4432_v13  ;;  %4627 = vrot.lane.b32.xlu2 %v4529_v54, %s7689_s17  ;;  %4530 = vrot.lane.b32.xlu1 %v4529_v54, %s7690_s4 }
0x1584   : > { %v4436_v49 = vpack.c.bf16 %v4433_v2, %v4433_v2 }
0x1586   : > { %v4549_v39 = vunpack.c.l.b16 %v4436_v49  ;;  %6302 = vmatmul.msk.bf16.vlgmr.msrb.gmra.mxu1 %vm1961_vm13, %v4436_v49 }
0x1587   : > { %4621 = vmatpush.bf16.msrb.mxu1 %v8854_v17 }
0x1588   : > { %v4550_v16 = vpack.c.b16 %v4549_v39, %v4549_v39 }
0x158a   : > { %4551 = vrot.lane.b32.xlu0 %v4550_v16, %s7690_s4  ;;  %4739 = vrot.lane.b32.xlu2 %v4550_v16, %s7688_s3 }
0x158b   : > { %4721 = vrot.lane.b32.xlu1 %v4529_v54, %s7688_s3 }
0x1592   : > { %4645 = vrot.lane.b32.xlu0 %v4550_v16, %s7689_s17 }
0x15dc   : > { %v4628_v25 = vpop.permute.xlu2 %4627 }
0x15f4   : > { %v4531_v3 = vpop.permute.xlu1 %4530 }
0x15f5   : > { %6305 = vmatmul.msk.bf16.vlgmr.msra.gmra.mxu2 %vm1961_vm13, %v4531_v3 }
0x15f6   : > { %4733 = vmatpush.bf16.xpose.msra.mxu2 %v8805_v59 }
0x15fc   : > { %v4552_v45 = vpop.permute.xlu0 %4551 }
0x15fd   : > { %6306 = vmatmul.msk.bf16.vlgmr.msrb.gmra.mxu0 %vm1961_vm13, %v4552_v45  ;;  %v4722_v55 = vpop.permute.xlu1 %4721 }
0x15fe   : > { %4751 = vmatpush.bf16.xpose.msrb.mxu0 %v8813_v12  ;;  %v4740_v12 = vpop.permute.xlu2 %4739 }
0x1601   : > { %v4449_v17 = vpop.f32.mrf.mxu3 }
0x1602   : > { %v4469_v29 = vmul.f32 0.17677669, %v4449_v17 }
0x1603   : > { %v4465_v32 = vpop.f32.mrf.mxu1 }
0x1604   : > { %v4470_v5 = vmul.f32 0.17677669, %v4465_v32  ;;  %v4471_v47 = vsel %vm2746_vm8, %v4469_v29, -inf  ;;  %v4646_v60 = vpop.permute.xlu0 %4645 }
0x1605   : > { %6309 = vmatmul.msk.bf16.vlgmr.msrb.gmra.mxu2 %vm1961_vm13, %v4628_v25  ;;  %4472 = vmax.xlane.f32.xlu0 %v4471_v47 }
0x1606   : > { %v4474_v58 = vsel %vm2746_vm8, %v4470_v5, -inf }
0x1607   : > { %4475 = vmax.xlane.f32.xlu1 %v4474_v58 }
0x1609   : > { %v4451_v28 = vpop.f32.mrf.mxu3 }
0x160b   : > { %v4467_v59 = vpop.f32.mrf.mxu1 }
0x160d   : > { %6310 = vmatmul.msk.bf16.vlgmr.msra.gmra.mxu0 %vm1961_vm13, %v4646_v60 }
0x1615   : > { %6313 = vmatmul.msk.bf16.vlgmr.msra.gmra.mxu2 %vm1961_vm13, %v4722_v55 }
0x161d   : > { %6314 = vmatmul.msk.bf16.vlgmr.msrb.gmra.mxu0 %vm1961_vm13, %v4740_v12 }
0x1678   : > { %v4544_v10 = vpop.f32.mrf.mxu2  ;;  %v4473_v57 = vpop.xlane.xlu0 %4472 }
0x1679   : > { %v4569_v48 = vmul.f32 0.17677669, %v4544_v10  ;;  %v4477_v24 = vsub.f32 %v4469_v29, %v4473_v57 }
0x167a   : > { %v4565_v37 = vpop.f32.mrf.mxu0  ;;  %v4476_v52 = vpop.xlane.xlu1 %4475 }
0x167b   : > { %v4570_v42 = vmul.f32 0.17677669, %v4565_v37  ;;  %v4571_v21 = vsel %vm2746_vm8, %v4569_v48, -inf  ;;  %v4479_v34 = vmul.f32 1.442695, %v4477_v24  ;;  %v4478_v38 = vsub.f32 %v4470_v5, %v4476_v52 }
0x167c   : > { %4572 = vmax.xlane.f32.xlu2 %v4571_v21 }
0x167d   : > { %v4574_v43 = vsel %vm2746_vm8, %v4570_v42, -inf  ;;  %7007 = vpow2.f32 %v4479_v34  ;;  %v4481_v63 = vmul.f32 1.442695, %v4478_v38 }
0x167e   : > { %4575 = vmax.xlane.f32.xlu0 %v4574_v43 }
0x167f   : > { %7009 = vpow2.f32 %v4481_v63 }
0x1680   : > { %v4546_v18 = vpop.f32.mrf.mxu2 }
0x1682   : > { %v4567_v51 = vpop.f32.mrf.mxu0 }
0x1683   : > { %v7008_v8 = vpop.eup %7007 }
0x1684   : > { %v4483_v26 = vsel %vm2746_vm8, %v7008_v8, 0.0 }
0x1685   : > { %v7010_v7 = vpop.eup %7009 }
0x1686   : > { %v4486_v56 = vsel %vm2746_vm8, %v7010_v7, 0.0 }
0x1688   : > { %v4641_v50 = vpop.f32.mrf.mxu2 }
0x1689   : > { %v4663_v41 = vmul.f32 0.17677669, %v4641_v50 }
0x168a   : > { %v4659_v36 = vpop.f32.mrf.mxu0 }
0x168b   : > { %v4664_v15 = vmul.f32 0.17677669, %v4659_v36  ;;  %v4665_v53 = vsel %vm2746_vm8, %v4663_v41, -inf }
0x168c   : > { %4666 = vmax.xlane.f32.xlu1 %v4665_v53 }
0x168d   : > { %v4668_v40 = vsel %vm2746_vm8, %v4664_v15, -inf }
0x168e   : > { %4669 = vmax.xlane.f32.xlu2 %v4668_v40 }
0x1690   : > { %v4643_v44 = vpop.f32.mrf.mxu2 }
0x1692   : > { %v4661_v22 = vpop.f32.mrf.mxu0 }
0x1694   : > { %4484 = vadd.xlane.f32.xlu1 %v4483_v26 }
0x1698   : > { %v4735_v11 = vpop.f32.mrf.mxu2 }
0x1699   : > { %v4757_v4 = vmul.f32 0.17677669, %v4735_v11 }
0x169a   : > { %v4753_v9 = vpop.f32.mrf.mxu0 }
0x169b   : > { %v4758_v6 = vmul.f32 0.17677669, %v4753_v9  ;;  %v4759_v62 = vsel %vm2746_vm8, %v4757_v4, -inf }
0x169c   : > { %4760 = vmax.xlane.f32.xlu0 %v4759_v62 }
0x169d   : > { %v4762_v14 = vsel %vm2746_vm8, %v4758_v6, -inf }
0x169e   : > { %4763 = vmax.xlane.f32.xlu2 %v4762_v14 }
0x16a0   : > { %v4737_v61 = vpop.f32.mrf.mxu2 }
0x16a2   : > { %v4755_v27 = vpop.f32.mrf.mxu0 }
0x16a4   : > { %4487 = vadd.xlane.f32.xlu0 %v4486_v56 }
0x16ef   : > { %v4573_v30 = vpop.xlane.xlu2 %4572 }
0x16f0   : > { %v4577_v35 = vsub.f32 %v4569_v48, %v4573_v30 }
0x16f1   : > { %v4576_v31 = vpop.xlane.xlu0 %4575 }
0x16f2   : > { %v4579_v54 = vmul.f32 1.442695, %v4577_v35  ;;  %v4578_v13 = vsub.f32 %v4570_v42, %v4576_v31 }
0x16f4   : > { %7011 = vpow2.f32 %v4579_v54  ;;  %v4581_v2 = vmul.f32 1.442695, %v4578_v13 }
0x16f6   : > { %7013 = vpow2.f32 %v4581_v2 }
0x16fa   : > { %v7012_v49 = vpop.eup %7011 }
0x16fb   : > { %v4583_v39 = vsel %vm2746_vm8, %v7012_v49, 0.0 }
0x16fc   : > { %v7014_v16 = vpop.eup %7013  ;;  %4584 = vadd.xlane.f32.xlu1 %v4583_v39 }
0x16fd   : > { %v4586_v3 = vsel %vm2746_vm8, %v7014_v16, 0.0 }
0x16fe   : > { %4587 = vadd.xlane.f32.xlu2 %v4586_v3 }
0x16ff   : > { %v4667_v45 = vpop.xlane.xlu1 %4666 }
0x1700   : > { %v4671_v17 = vsub.f32 %v4663_v41, %v4667_v45 }
0x1701   : > { %v4670_v29 = vpop.xlane.xlu2 %4669 }
0x1702   : > { %v4673_v32 = vmul.f32 1.442695, %v4671_v17  ;;  %v4672_v25 = vsub.f32 %v4664_v15, %v4670_v29 }
0x1704   : > { %7015 = vpow2.f32 %v4673_v32  ;;  %v4675_v5 = vmul.f32 1.442695, %v4672_v25 }
0x1706   : > { %7017 = vpow2.f32 %v4675_v5 }
0x1707   : > { %v4485_v47 = vpop.xlane.xlu1 %4484 }
0x1708   : > { %7019 = vrcp.f32 %v4485_v47 }
0x170a   : > { %v7016_v58 = vpop.eup %7015 }
0x170b   : > { %v4677_v28 = vsel %vm2746_vm8, %v7016_v58, 0.0 }
0x170c   : > { %v7018_v59 = vpop.eup %7017  ;;  %4678 = vadd.xlane.f32.xlu0 %v4677_v28 }
0x170d   : > { %v4680_v60 = vsel %vm2746_vm8, %v7018_v59, 0.0 }
0x170e   : > { %v7020_v55 = vpop.eup %7019  ;;  %4681 = vadd.xlane.f32.xlu1 %v4680_v60  ;;  %v6614_v60 = vld [vmem:[%s8240_s0 + $0x38] sm:$0xff] }
0x170f   : > { %v4491_v12 = vmul.f32 %v7020_v55, %v7008_v8  ;;  %v4761_v10 = vpop.xlane.xlu0 %4760  ;;  %4914 = vmatpush.bf16.msrb.mxu2 %v6614_v60  ;;  %v6613_v55 = vld [vmem:[%s8240_s0 + $0x30] sm:$0xff]  ;;  %v6375_v60 = vld [vmem:[%s8263_s28 + $0x30] sm:$0xf] }
0x1710   : > { %v4765_v48 = vsub.f32 %v4757_v4, %v4761_v10  ;;  %v6611_v10 = vld [vmem:[%s8240_s0 + $0x20] sm:$0xff] }
0x1711   : > { %v4764_v37 = vpop.xlane.xlu2 %4763  ;;  %v4493_v42 = vpack.c.bf16 %v4491_v12, %v4491_v12  ;;  %v6612_v12 = vld [vmem:[%s8240_s0 + $0x28] sm:$0xff] }
0x1712   : > { %v4767_v21 = vmul.f32 1.442695, %v4765_v48  ;;  %v4766_v43 = vsub.f32 %v4758_v6, %v4764_v37  ;;  %v6610_v48 = vld [vmem:[%s8240_s0 + $0x18] sm:$0xff]  ;;  %v6609_v37 = vld [vmem:[%s8240_s0 + $0x10] sm:$0xff] }
0x1713   : > { %6303 = vmatmul.msk.bf16.vlgmr.msra.gmra.mxu3 %vm2746_vm8, %v4493_v42  ;;  %4915 = vmatpush.bf16.msrb.mxu2 %v6613_v55  ;;  %v6608_v42 = vld [vmem:[%s8240_s0 + $0x8] sm:$0xff]  ;;  %v6622_v55 = vld [vmem:[%s8263_s28 + $0x34] sm:$0xf0] }
0x1714   : > { %7021 = vpow2.f32 %v4767_v21  ;;  %v4769_v57 = vmul.f32 1.442695, %v4766_v43  ;;  %4699 = vmatpush.bf16.msra.mxu3 %v8849_v19  ;;  %v6607_v21 = vld [vmem:[%s8240_s0] sm:$0xff] }
0x1716   : > { %7023 = vpow2.f32 %v4769_v57 }
0x1717   : > { %v4488_v18 = vpop.xlane.xlu0 %4487  ;;  %4916 = vmatpush.bf16.msrb.mxu2 %v6612_v12  ;;  %v6621_v12 = vld [vmem:[%s8263_s28 + $0x34] sm:$0xf] }
0x1718   : > { %7025 = vrcp.f32 %v4488_v18 }
0x171a   : > { %v7022_v24 = vpop.eup %7021 }
0x171b   : > { %v4771_v51 = vsel %vm2746_vm8, %v7022_v24, 0.0  ;;  %4917 = vmatpush.bf16.msrb.mxu2 %v6611_v10  ;;  %v6376_v10 = vor.u32 %v6622_v55, %v6375_v60  ;;  %v6633_v60 = vld [vmem:[%s8266_s6 + $0x10] sm:$0xff]  ;;  %v6642_v55 = vld [vmem:[%s8266_s6 + $0x58] sm:$0xff] }
0x171c   : > { %v7024_v34 = vpop.eup %7023  ;;  %4772 = vadd.xlane.f32.xlu2 %v4771_v51 }
0x171d   : > { %v4774_v50 = vsel %vm2746_vm8, %v7024_v34, 0.0 }
0x171e   : > { %v7026_v41 = vpop.eup %7025  ;;  %4775 = vadd.xlane.f32.xlu0 %v4774_v50 }
0x171f   : > { %v4492_v36 = vmul.f32 %v7026_v41, %v7010_v7  ;;  %4918 = vmatpush.bf16.msrb.mxu2 %v6610_v48  ;;  %v6377_v48 = vld [vmem:[%s8263_s28 + $0x38] sm:$0xf0] }
0x1721   : > { %v4494_v15 = vpack.c.bf16 %v4492_v36, %v4492_v36 }
0x1723   : > { %6304 = vmatmul.msk.bf16.vlgmr.msra.gmra.mxu1 %vm2746_vm8, %v4494_v15  ;;  %4919 = vmatpush.bf16.msrb.mxu2 %v6609_v37  ;;  %v6380_v37 = vor.u32 %v6621_v12, %v6377_v48  ;;  %v6632_v12 = vld [vmem:[%s8266_s6 + $0x8] sm:$0xff]  ;;  %v6641_v48 = vld [vmem:[%s8266_s6 + $0x50] sm:$0xff] }
0x1724   : > { %4715 = vmatpush.bf16.msra.mxu1 %v8852_v46 }
0x1727   : > { %4920 = vmatpush.bf16.msrb.mxu2 %v6608_v42  ;;  %v6367_v42 = vld [vmem:[%s8263_s28 + $0x20] sm:$0xf] }
0x172b   : > { %4921 = vmatpush.bf16.msrb.mxu2 %v6607_v21  ;;  %v6620_v21 = vld [vmem:[%s8263_s28 + $0x24] sm:$0xf0] }
0x176f   : > { %v4585_v53 = vpop.xlane.xlu1 %4584 }
0x1770   : > { %7027 = vrcp.f32 %v4585_v53 }
0x1771   : > { %v4588_v19 = vpop.xlane.xlu2 %4587 }
0x1772   : > { %7029 = vrcp.f32 %v4588_v19 }
0x1776   : > { %v7028_v40 = vpop.eup %7027 }
0x1777   : > { %v4591_v52 = vmul.f32 %v7028_v40, %v7012_v49 }
0x1778   : > { %v7030_v8 = vpop.eup %7029 }
0x1779   : > { %v4592_v44 = vmul.f32 %v7030_v8, %v7014_v16  ;;  %v4593_v38 = vpack.c.bf16 %v4591_v52, %v4591_v52 }
0x177b   : > { %6307 = vmatmul.msk.bf16.vlgmr.msrb.gmra.mxu3 %vm2746_vm8, %v4593_v38  ;;  %v4594_v22 = vpack.c.bf16 %v4592_v44, %v4592_v44  ;;  %v6967_v38 = vld [vmem:[%s9469_s12] ss:$0 sm:$0xff] }
0x177c   : > { %4793 = vmatpush.bf16.msrb.mxu3 %v8864_v33 }
0x177d   : > { %6308 = vmatmul.msk.bf16.vlgmr.msrb.gmra.mxu1 %vm2746_vm8, %v4594_v22 }
0x177e   : > { %4809 = vmatpush.bf16.msrb.mxu1 %v8867_v1 }
0x177f   : > { %v4679_v26 = vpop.xlane.xlu0 %4678 }
0x1780   : > { %7031 = vrcp.f32 %v4679_v26 }
0x1781   : > { %v4682_v46 = vpop.xlane.xlu1 %4681 }
0x1782   : > { %7033 = vrcp.f32 %v4682_v46 }
0x1786   : > { %v7032_v63 = vpop.eup %7031 }
0x1787   : > { %v4685_v11 = vmul.f32 %v7032_v63, %v7016_v58 }
0x1788   : > { %v7034_v4 = vpop.eup %7033 }
0x1789   : > { %v4686_v9 = vmul.f32 %v7034_v4, %v7018_v59  ;;  %v4687_v6 = vpack.c.bf16 %v4685_v11, %v4685_v11 }
0x178b   : > { %6311 = vmatmul.msk.bf16.vlgmr.msra.gmra.mxu3 %vm2746_vm8, %v4687_v6  ;;  %v4688_v62 = vpack.c.bf16 %v4686_v9, %v4686_v9 }
0x178d   : > { %6312 = vmatmul.msk.bf16.vlgmr.msra.gmra.mxu1 %vm2746_vm8, %v4688_v62 }
0x178f   : > { %v4773_v14 = vpop.xlane.xlu2 %4772 }
0x1790   : > { %7035 = vrcp.f32 %v4773_v14 }
0x1791   : > { %v4776_v33 = vpop.xlane.xlu0 %4775 }
0x1792   : > { %7037 = vrcp.f32 %v4776_v33 }
0x1796   : > { %v7036_v7 = vpop.eup %7035  ;;  %v4507_v1 = vpop.f32.mrf.mxu3 }
0x1797   : > { %v4779_v61 = vmul.f32 %v7036_v7, %v7022_v24 }
0x1798   : > { %v7038_v27 = vpop.eup %7037 }
0x1799   : > { %v4780_v56 = vmul.f32 %v7038_v27, %v7024_v34  ;;  %v4781_v30 = vpack.c.bf16 %v4779_v61, %v4779_v61  ;;  %v6630_v61 = vld [vmem:[%s8263_s28 + $0x74] sm:$0xf0]  ;;  %v6629_v27 = vld [vmem:[%s8263_s28 + $0x74] sm:$0xf] }
0x179b   : > { %6315 = vmatmul.msk.bf16.vlgmr.msrb.gmra.mxu3 %vm2746_vm8, %v4781_v30  ;;  %v4782_v35 = vpack.c.bf16 %v4780_v56, %v4780_v56  ;;  %v6409_v30 = vld [vmem:[%s8263_s28 + $0x78] sm:$0xf0] }
0x179d   : > { %6316 = vmatmul.msk.bf16.vlgmr.msrb.gmra.mxu1 %vm2746_vm8, %v4782_v35  ;;  %v6412_v35 = vor.u32 %v6629_v27, %v6409_v30 }
0x179e   : > { %v4509_v31 = vpop.f32.mrf.mxu3 }
0x179f   : > { %5099 = vmatpush.bf16.msra.mxu3 %v6412_v35  ;;  %v6399_v31 = vld [vmem:[%s8263_s28 + $0x60] sm:$0xf] }
0x17a0   : > { %v4523_v54 = vpop.f32.mrf.mxu1 }
0x17a8   : > { %v4525_v13 = vpop.f32.mrf.mxu1 }
0x17a9   : > { %v6627_v13 = vld [vmem:[%s8263_s28 + $0x64] sm:$0xf] }
0x17fa   : > { %v4623_v2 = vpop.f32.mrf.mxu1 }
0x17fe   : > { %v4607_v49 = vpop.f32.mrf.mxu3 }
0x17ff   : > { %v6947_v39 = vpack.i.bf16 %v4623_v2, %v4607_v49  ;;  %v6401_v49 = vld [vmem:[%s8263_s28 + $0x68] sm:$0xf0] }
0x1801   : > { %6948 = vrot.lane.b32.xlu1 %v6947_v39, %s7688_s3  ;;  %v6404_v39 = vor.u32 %v6627_v13, %v6401_v49 }
0x1802   : > { %v4625_v16 = vpop.f32.mrf.mxu1 }
0x1803   : > { %5100 = vmatpush.bf16.msra.mxu3 %v6404_v39  ;;  %v6391_v16 = vld [vmem:[%s8263_s28 + $0x50] sm:$0xf] }
0x1806   : > { %v4609_v3 = vpop.f32.mrf.mxu3 }
0x1807   : > { %v6626_v3 = vld [vmem:[%s8263_s28 + $0x54] sm:$0xf0] }
0x180a   : > { %v4717_v45 = vpop.f32.mrf.mxu1 }
0x180e   : > { %v4701_v17 = vpop.f32.mrf.mxu3 }
0x180f   : > { %v6952_v29 = vpack.i.bf16 %v4717_v45, %v4701_v17  ;;  %v6625_v45 = vld [vmem:[%s8263_s28 + $0x54] sm:$0xf]  ;;  %v6392_v17 = vor.u32 %v6626_v3, %v6391_v16  ;;  %v6969_v16 = vld [vmem:[%s9470_s18] ss:$0 sm:$0xff] }
0x1811   : > { %6953 = vrot.lane.b32.xlu2 %v6952_v29, %s7689_s17  ;;  %v6393_v29 = vld [vmem:[%s8263_s28 + $0x58] sm:$0xf0] }
0x1812   : > { %v4719_v32 = vpop.f32.mrf.mxu1 }
0x1813   : > { %v6396_v32 = vor.u32 %v6625_v45, %v6393_v29 }
0x1815   : > { %5101 = vmatpush.bf16.msra.mxu3 %v6396_v32  ;;  %v6637_v32 = vld [vmem:[%s8266_s6 + $0x30] sm:$0xff] }
0x1816   : > { %v4703_v25 = vpop.f32.mrf.mxu3 }
0x1817   : > { %v6383_v25 = vld [vmem:[%s8263_s28 + $0x40] sm:$0xf] }
0x181a   : > { %v4811_v5 = vpop.f32.mrf.mxu1 }
0x181e   : > { %v4795_v47 = vpop.f32.mrf.mxu3 }
0x181f   : > { %v6957_v58 = vpack.i.bf16 %v4811_v5, %v4795_v47  ;;  %v6624_v5 = vld [vmem:[%s8263_s28 + $0x44] sm:$0xf0]  ;;  %v6623_v47 = vld [vmem:[%s8263_s28 + $0x44] sm:$0xf] }
0x1821   : > { %6958 = vrot.lane.b32.xlu0 %v6957_v58, %s7690_s4  ;;  %v6384_v58 = vor.u32 %v6624_v5, %v6383_v25  ;;  %v6646_v25 = vld [vmem:[%s8266_s6 + $0x78] sm:$0xff]  ;;  %v6645_v5 = vld [vmem:[%s8266_s6 + $0x70] sm:$0xff] }
0x1822   : > { %v4813_v28 = vpop.f32.mrf.mxu1  ;;  %5297 = vmatpush.bf16.msra.mxu2 %v6646_v25 }
0x1823   : > { %v6385_v28 = vld [vmem:[%s8263_s28 + $0x48] sm:$0xf0] }
0x1826   : > { %v4797_v59 = vpop.f32.mrf.mxu3  ;;  %5298 = vmatpush.bf16.msra.mxu2 %v6645_v5  ;;  %v6970_v5 = vld [vmem:[%s8307_s2] ss:$0 sm:$0xff] }
0x1827   : > { %v6388_v59 = vor.u32 %v6623_v47, %v6385_v28  ;;  %v6635_v47 = vld [vmem:[%s8266_s6 + $0x20] sm:$0xff]  ;;  %v6634_v28 = vld [vmem:[%s8266_s6 + $0x18] sm:$0xff] }
0x1829   : > { %5102 = vmatpush.bf16.msra.mxu3 %v6388_v59  ;;  %v6643_v59 = vld [vmem:[%s8266_s6 + $0x60] sm:$0xff] }
0x182d   : > { %5103 = vmatpush.bf16.msra.mxu3 %v6380_v37  ;;  %v6631_v37 = vld [vmem:[%s8266_s6] sm:$0xff] }
0x186b   : > { %v6954_v24 = vpop.permute.xlu2 %6953 }
0x186c   : > { %v6956_v50 = vunpack.i.h.bf16 %v6954_v24  ;;  %v6955_v41 = vunpack.i.l.bf16 %v6954_v24 }
0x1873   : > { %v6949_v43 = vpop.permute.xlu1 %6948 }
0x1874   : > { %v6951_v57 = vunpack.i.h.bf16 %v6949_v43  ;;  %v6950_v18 = vunpack.i.l.bf16 %v6949_v43  ;;  %v6619_v43 = vld [vmem:[%s8263_s28 + $0x24] sm:$0xf] }
0x1876   : > { %v4840_v51 = vsel %vm1961_vm13, %v4523_v54, %v6951_v57  ;;  %v4839_v34 = vsel %vm1961_vm13, %v4507_v1, %v6950_v18  ;;  %v6407_v1 = vld [vmem:[%s8263_s28 + $0x70] sm:$0xf]  ;;  %v6628_v54 = vld [vmem:[%s8263_s28 + $0x64] sm:$0xf0]  ;;  %v6368_v57 = vor.u32 %v6620_v21, %v6367_v42  ;;  %v6369_v18 = vld [vmem:[%s8263_s28 + $0x28] sm:$0xf0] }
0x1877   : > { %v4841_v19 = vsel %vm2460_vm0, %v4839_v34, %v6955_v41  ;;  %v4842_v40 = vsel %vm2460_vm0, %v4840_v51, %v6956_v50  ;;  %v6408_v56 = vor.u32 %v6630_v61, %v6407_v1  ;;  %v6400_v2 = vor.u32 %v6628_v54, %v6399_v31  ;;  %v6359_v51 = vld [vmem:[%s8263_s28 + $0x10] sm:$0xf]  ;;  %v6618_v34 = vld [vmem:[%s8263_s28 + $0x14] sm:$0xf0]  ;;  %v6617_v50 = vld [vmem:[%s8263_s28 + $0x14] sm:$0xf] }
0x1878   : > { %v6372_v24 = vor.u32 %v6619_v43, %v6369_v18  ;;  %v6360_v41 = vor.u32 %v6618_v34, %v6359_v51  ;;  %v6640_v21 = vld [vmem:[%s8266_s6 + $0x48] sm:$0xff]  ;;  %v6639_v18 = vld [vmem:[%s8266_s6 + $0x40] sm:$0xff] }
0x1879   : > { %5085 = vmatpush.bf16.msra.mxu0 %v6408_v56 }
0x187a   : > { %5104 = vmatpush.bf16.msra.mxu3 %v6372_v24 }
0x187d   : > { %5086 = vmatpush.bf16.msra.mxu0 %v6400_v2 }
0x1881   : > { %5087 = vmatpush.bf16.msra.mxu0 %v6392_v17 }
0x1885   : > { %5088 = vmatpush.bf16.msra.mxu0 %v6384_v58  ;;  %v6644_v58 = vld [vmem:[%s8266_s6 + $0x68] sm:$0xff] }
0x1886   : > { %5299 = vmatpush.bf16.msra.mxu2 %v6644_v58 }
0x1889   : > { %5089 = vmatpush.bf16.msra.mxu0 %v6376_v10  ;;  %v4999_v10 = vld [vmem:[%s8312_s15] sm:$0x3] }
0x188a   : > { %5300 = vmatpush.bf16.msra.mxu2 %v6643_v59  ;;  %v5001_v42 = vperm.slane %v4999_v10, 0  ;;  %v5002_v51 = vperm.slane %v4999_v10, 1 }
0x188d   : > { %5090 = vmatpush.bf16.msra.mxu0 %v6368_v57 }
0x188e   : > { %5301 = vmatpush.bf16.msra.mxu2 %v6642_v55 }
0x1891   : > { %5091 = vmatpush.bf16.msra.mxu0 %v6360_v41 }
0x1892   : > { %5302 = vmatpush.bf16.msra.mxu2 %v6641_v48 }
0x1893   : > { %v6959_v36 = vpop.permute.xlu0 %6958 }
0x1894   : > { %v6961_v15 = vunpack.i.h.bf16 %v6959_v36  ;;  %v6960_v53 = vunpack.i.l.bf16 %v6959_v36  ;;  %v6361_v36 = vld [vmem:[%s8263_s28 + $0x18] sm:$0xf0] }
0x1896   : > { %v4844_v52 = vsel %vm2463_vm1, %v4842_v40, %v6961_v15  ;;  %v4843_v8 = vsel %vm2463_vm1, %v4841_v19, %v6960_v53  ;;  %v6364_v53 = vor.u32 %v6617_v50, %v6361_v36  ;;  %v6351_v40 = vld [vmem:[%s8263_s28] sm:$0xf]  ;;  %5303 = vmatpush.bf16.msra.mxu2 %v6640_v21 }
0x1897   : > { %v4845_v44 = vpack.c.bf16 %v4844_v52, %v4843_v8  ;;  %v6616_v52 = vld [vmem:[%s8263_s28 + $0x4] sm:$0xf0]  ;;  %v6615_v8 = vld [vmem:[%s8263_s28 + $0x4] sm:$0xf] }
0x1898   : > { %5105 = vmatpush.bf16.msra.mxu3 %v6364_v53 }
0x1899   : > { %4922 = vmatmul.bf16.vlgmr.msrb.gmra.mxu2 %v4845_v44  ;;  %v6352_v44 = vor.u32 %v6616_v52, %v6351_v40 }
0x189a   : > { %5304 = vmatpush.bf16.msra.mxu2 %v6639_v18 }
0x189b   : > { %5092 = vmatpush.bf16.msra.mxu0 %v6352_v44 }
0x191c   : > { %v4923_v22 = vpop.f32.mrf.mxu2 }
0x191d   : > { %v4924_v26 = vadd.f32 %v6967_v38, %v4923_v22 }
0x191f   : > { %v9204_v46 = vadd.f32 %v4924_v26, %v9093_v23 }
0x1921   : > { %4932 = vadd.xlane.f32.xlu1 %v9204_v46 }
0x1924   : > { %v4925_v63 = vpop.f32.mrf.mxu2 }
0x1925   : > { %v4926_v11 = vadd.f32 %v6967_v38, %v4925_v63  ;;  %v6353_v38 = vld [vmem:[%s8263_s28 + $0x8] sm:$0xf0] }
0x1926   : > { %v6356_v26 = vor.u32 %v6615_v8, %v6353_v38 }
0x1927   : > { %v9208_v4 = vadd.f32 %v4926_v11, %v9097_v0 }
0x1928   : > { %5106 = vmatpush.bf16.msra.mxu3 %v6356_v26 }
0x1929   : > { %4934 = vadd.xlane.f32.xlu0 %v9208_v4 }
0x1994   : > { %v4933_v9 = vpop.xlane.xlu1 %4932 }
0x1995   : > { %v4936_v6 = vmul.f32 %v4933_v9, %v8326_v20 }
0x1997   : > { %v9213_v62 = vsub.f32 %v9204_v46, %v4936_v6 }
0x1999   : > { %v4940_v23 = vmul.f32 %v9213_v62, %v9213_v62 }
0x199b   : > { %4942 = vadd.xlane.f32.xlu2 %v4940_v23 }
0x199c   : > { %v4935_v14 = vpop.xlane.xlu0 %4934 }
0x199d   : > { %v4937_v0 = vmul.f32 %v4935_v14, %v8326_v20 }
0x199f   : > { %v9219_v33 = vsub.f32 %v9208_v4, %v4937_v0 }
0x19a1   : > { %v4941_v7 = vmul.f32 %v9219_v33, %v9219_v33 }
0x19a3   : > { %4944 = vadd.xlane.f32.xlu1 %v4941_v7 }
0x1a0e   : > { %v4943_v15 = vpop.xlane.xlu2 %4942 }
0x1a0f   : > { %v4946_v19 = vmul.f32 %v4943_v15, %v8326_v20 }
0x1a11   : > { %v4948_v22 = vadd.f32 1e-05, %v4946_v19 }
0x1a13   : > { %7039 = vrsqrt.f32 %v4948_v22  ;;  %vm4956_vm0 = vweird.f32 %v4948_v22 }
0x1a16   : > { %v4945_v63 = vpop.xlane.xlu1 %4944 }
0x1a17   : > { %v4947_v11 = vmul.f32 %v4945_v63, %v8326_v20  ;;  %v6968_v20 = vld [vmem:[%s8300_s25] ss:$0 sm:$0xff] }
0x1a19   : > { %v7040_v9 = vpop.eup %7039  ;;  %v4949_v6 = vadd.f32 1e-05, %v4947_v11 }
0x1a1a   : > { %v4951_v23 = vmul.f32 %v7040_v9, %v4948_v22  ;;  %vm4957_vm13 = vweird.f32 %v7040_v9 }
0x1a1b   : > { %7041 = vrsqrt.f32 %v4949_v6  ;;  %vm4958_vm1 = vmor %vm4956_vm0, %vm4957_vm13  ;;  %vm4966_vm3 = vweird.f32 %v4949_v6 }
0x1a1c   : > { %v4952_v14 = vmul.f32 %v7040_v9, %v4951_v23 }
0x1a1e   : > { %v4953_v0 = vmul.f32 0.5, %v4952_v14 }
0x1a20   : > { %v4954_v7 = vsub.f32 1.5, %v4953_v0 }
0x1a21   : > { %v7042_v1 = vpop.eup %7041 }
0x1a22   : > { %v4955_v61 = vmul.f32 %v7040_v9, %v4954_v7  ;;  %v4961_v27 = vmul.f32 %v7042_v1, %v4949_v6  ;;  %vm4967_vm8 = vweird.f32 %v7042_v1 }
0x1a23   : > { %vm4968_vm4 = vmor %vm4966_vm3, %vm4967_vm8 }
0x1a24   : > { %v4962_v56 = vmul.f32 %v7042_v1, %v4961_v27  ;;  %v4959_v30 = vsel %vm4958_vm1, %v7040_v9, %v4955_v61 }
0x1a25   : > { %v4970_v54 = vmul.f32 %v4959_v30, %v9213_v62  ;;  %v6638_v62 = vld [vmem:[%s8266_s6 + $0x38] sm:$0xff] }
0x1a26   : > { %v4963_v35 = vmul.f32 0.5, %v4962_v56  ;;  %5283 = vmatpush.bf16.msra.mxu1 %v6638_v62 }
0x1a27   : > { %v4975_v49 = vmul.f32 %v6968_v20, %v4970_v54 }
0x1a28   : > { %v4964_v31 = vsub.f32 1.5, %v4963_v35 }
0x1a29   : > { %v4980_v45 = vadd.f32 %v6969_v16, %v4975_v49 }
0x1a2a   : > { %v4965_v13 = vmul.f32 %v7042_v1, %v4964_v31  ;;  %5284 = vmatpush.bf16.msra.mxu1 %v6637_v32 }
0x1a2c   : > { %v4969_v2 = vsel %vm4968_vm4, %v7042_v1, %v4965_v13 }
0x1a2d   : > { %v4971_v39 = vmul.f32 %v4969_v2, %v9219_v33  ;;  %v6636_v33 = vld [vmem:[%s8266_s6 + $0x28] sm:$0xff] }
0x1a2e   : > { %5285 = vmatpush.bf16.msra.mxu1 %v6636_v33 }
0x1a2f   : > { %v4976_v3 = vmul.f32 %v6968_v20, %v4971_v39 }
0x1a31   : > { %v4981_v17 = vadd.f32 %v6969_v16, %v4976_v3 }
0x1a32   : > { %5286 = vmatpush.bf16.msra.mxu1 %v6635_v47 }
0x1a33   : > { %v4982_v29 = vpack.c.bf16 %v4981_v17, %v4980_v45 }
0x1a35   : > { %5093 = vmatmul.bf16.vlgmr.msra.gmra.mxu0 %v4982_v29  ;;  %5107 = vmatmul.bf16.vlgmr.msra.gmra.mxu3 %v4982_v29 }
0x1a36   : > { %5287 = vmatpush.bf16.msra.mxu1 %v6634_v28 }
0x1a3a   : > { %5288 = vmatpush.bf16.msra.mxu1 %v6633_v60 }
0x1a3e   : > { %5289 = vmatpush.bf16.msra.mxu1 %v6632_v12 }
0x1a42   : > { %5290 = vmatpush.bf16.msra.mxu1 %v6631_v37 }
0x1ab2   : > { %v5094_v43 = vpop.f32.mrf.mxu0 }
0x1ab3   : > { %v5095_v57 = vadd.f32 %v5094_v43, %v5001_v42 }
0x1ab5   : > { %v5117_v24 = vmul.f32 0.044715, %v5095_v57  ;;  %v5113_v31 = vmul.f32 0.5, %v5095_v57 }
0x1ab7   : > { %v5121_v34 = vmul.f32 %v5117_v24, %v5095_v57 }
0x1ab8   : > { %v5108_v50 = vpop.f32.mrf.mxu3 }
0x1ab9   : > { %v5125_v41 = vmul.f32 %v5121_v34, %v5095_v57  ;;  %v5109_v36 = vadd.f32 %v5108_v50, %v5002_v51 }
0x1aba   : > { %v5096_v15 = vpop.f32.mrf.mxu0 }
0x1abb   : > { %v5129_v53 = vadd.f32 %v5125_v41, %v5095_v57  ;;  %v5118_v19 = vmul.f32 0.044715, %v5109_v36  ;;  %v5097_v40 = vadd.f32 %v5096_v15, %v5001_v42  ;;  %v5114_v45 = vmul.f32 0.5, %v5109_v36 }
0x1abd   : > { %v5122_v52 = vmul.f32 %v5118_v19, %v5109_v36  ;;  %v5119_v8 = vmul.f32 0.044715, %v5097_v40  ;;  %v5133_v44 = vmul.f32 0.7978846, %v5129_v53  ;;  %v5115_v20 = vmul.f32 0.5, %v5097_v40 }
0x1abf   : > { %v5126_v38 = vmul.f32 %v5122_v52, %v5109_v36  ;;  %v5123_v22 = vmul.f32 %v5119_v8, %v5097_v40  ;;  %7043 = vtanh.f32 %v5133_v44 }
0x1ac0   : > { %v5110_v26 = vpop.f32.mrf.mxu3 }
0x1ac1   : > { %v5130_v63 = vadd.f32 %v5126_v38, %v5109_v36  ;;  %v5127_v11 = vmul.f32 %v5123_v22, %v5097_v40  ;;  %v5111_v9 = vadd.f32 %v5110_v26, %v5002_v51 }
0x1ac3   : > { %v5131_v6 = vadd.f32 %v5127_v11, %v5097_v40  ;;  %v5120_v23 = vmul.f32 0.044715, %v5111_v9  ;;  %v5134_v14 = vmul.f32 0.7978846, %v5130_v63  ;;  %v5116_v17 = vmul.f32 0.5, %v5111_v9 }
0x1ac5   : > { %v5135_v0 = vmul.f32 0.7978846, %v5131_v6  ;;  %v5124_v7 = vmul.f32 %v5120_v23, %v5111_v9  ;;  %v7044_v61 = vpop.eup %7043 }
0x1ac6   : > { %v5141_v30 = vadd.f32 1.0, %v7044_v61 }
0x1ac7   : > { %v5128_v1 = vmul.f32 %v5124_v7, %v5111_v9  ;;  %7045 = vtanh.f32 %v5135_v0 }
0x1ac8   : > { %7047 = vtanh.f32 %v5134_v14  ;;  %v5145_v2 = vmul.f32 %v5141_v30, %v5113_v31 }
0x1ac9   : > { %v5132_v27 = vadd.f32 %v5128_v1, %v5111_v9 }
0x1acb   : > { %v5136_v56 = vmul.f32 0.7978846, %v5132_v27 }
0x1acd   : > { %v7046_v35 = vpop.eup %7045  ;;  %7049 = vtanh.f32 %v5136_v56 }
0x1ace   : > { %v5143_v54 = vadd.f32 1.0, %v7046_v35  ;;  %v7048_v13 = vpop.eup %7047 }
0x1acf   : > { %v5142_v16 = vadd.f32 1.0, %v7048_v13 }
0x1ad0   : > { %v5147_v49 = vmul.f32 %v5143_v54, %v5115_v20 }
0x1ad1   : > { %v5146_v62 = vmul.f32 %v5142_v16, %v5114_v45 }
0x1ad2   : > { %v5149_v39 = vpack.c.bf16 %v5147_v49, %v5145_v2 }
0x1ad3   : > { %v7050_v3 = vpop.eup %7049 }
0x1ad4   : > { %5291 = vmatmul.bf16.vlgmr.msra.gmra.mxu1 %v5149_v39  ;;  %v5144_v29 = vadd.f32 1.0, %v7050_v3 }
0x1ad6   : > { %v5148_v32 = vmul.f32 %v5144_v29, %v5116_v17 }
0x1ad8   : > { %v5150_v25 = vpack.c.bf16 %v5148_v32, %v5146_v62 }
0x1ada   : > { %5305 = vmatmul.bf16.vlgmr.msra.gmra.mxu2 %v5150_v25 }
0x1b51   : > { %v5292_v33 = vpop.f32.mrf.mxu1 }
0x1b52   : > { %v5293_v47 = vadd.f32 %v6970_v5, %v5292_v33 }
0x1b59   : > { %v5294_v60 = vpop.f32.mrf.mxu1 }
0x1b5a   : > { %v5295_v55 = vadd.f32 %v6970_v5, %v5294_v60 }
0x1b5d   : > { %v5306_v58 = vpop.f32.mrf.mxu2 }
0x1b5e   : > { %v5307_v28 = vadd.f32 %v5306_v58, %v5293_v47 }
0x1b60   : > { %v5311_v59 = vadd.f32 %v5307_v28, %v9204_v46 }
0x1b62   : > { %5313 = vst [vmem:[#allocation2] sm:$0xff] %v5311_v59 }
0x1b65   : > { %v5308_v12 = vpop.f32.mrf.mxu2 }
0x1b66   : > { %v5309_v10 = vadd.f32 %v5308_v12, %v5295_v55 }
0x1b68   : > { %v5312_v48 = vadd.f32 %v5309_v10, %v9208_v4 }
0x1b6a   : > { %5314 = vst [vmem:[#allocation2 + $0x8] sm:$0xff] %v5312_v48 }
0x1b6b PF: > { %s9471_s25 = sld [smem:[#allocation46_spill]]  ;;  %s7691_s1 = smov [#allocation32]  }
0x1b6c   : > { %s5320_s0 = sshll.u32 %s7691_s1, 4  ;;  %s9472_s2 = sld [smem:[#allocation78_spill]]  ;;  %s5321_s0 = int_to_ptr.vmem [resolvable:$true] %s5320_s0 }
0x1b6d   : > { %s7692_s9 = smov 128   ;;  %s7693_s29 = smov 8  }
0x1b71   : > { %p6732_p9 = scmp.eq.s32.totalorder %s9471_s25, 1 }
0x1b72   : > { %s5322_s15 = sshll.u32 %s9472_s2, 4  ;;  %s5323_s15 = int_to_ptr.hbm [resolvable:$true] %s5322_s15 }
0x1b73   : > { %6703 = dma.vmem_to_hbm [thread:$0]  (%p6732_p9), %s5321_s0, 256, %s5323_s15, [#allocation5], %s7692_s9, %s7692_s9, %s7693_s29  }
0x1b74   : > { %7650 = dma.done.wait (%p6732_p9), [#allocation5], 256  }
0x1b75   : > { %7652 = vsyncadd (%p6732_p9), [#allocation5], 4294967040 }
0x1b76 PF: > { %s9473_s30 = sld [smem:[#allocation47_spill]] }
0x1b77   : > { %s9474_s7 = sld [smem:[#allocation44_spill]] }
0x1b78   : > { %s9475_s4 = sld [smem:[#allocation45_spill]] }
0x1b79   : > { %s9476_s8 = sld [smem:[#allocation48_spill]] }
0x1b7c   : > { %p59_p10 = scmp.ge.s32.totalorder %s9473_s30, 4  }
0x1b7e   :  { %61 = sbr.rel (!%p59_p10) target bundleno = 48 (0x30), region = 363 }
0x1b83   :  { %5339 = vsyncpa [#allocation4], 1 }
0x1b84   :  { %5341 = vsyncpa [#allocation4 + $0x1], 1 }
0x1b85   :  { %5342 = vsyncpa [#allocation7], 1 }
0x1b86   :  { %5343 = vsyncpa [#allocation10], 1 }
0x1b87   :  { %5344 = vsyncpa [#allocation13], 1 }
0x1b88   :  { %5346 = vsyncpa [#allocation13 + $0x1], 1 }
0x1b89   :  { %5347 = vsyncpa [#allocation16], 1 }
0x1b8a   :  { %5349 = vsyncpa [#allocation16 + $0x1], 1 }
0x1b8b   :  { %5350 = vsyncpa [#allocation19], 1 }
0x1b8c   :  { %5352 = vsyncpa [#allocation19 + $0x1], 1 }
0x1b8d   :  { %5353 = vsyncpa [#allocation22], 1 }
0x1b8e   :  { %5355 = vsyncpa [#allocation22 + $0x1], 1 }
0x1b8f   :  { %5356 = vsyncpa [#allocation25], 1 }
0x1b90   :  { %5358 = vsyncpa [#allocation25 + $0x1], 1 }
0x1b91   :  { %5359 = vsyncpa [#allocation28], 1 }
0x1b92   :  { %5361 = vsyncpa [#allocation28 + $0x1], 1 }
0x1b93   :  { %5362 = vsyncpa [#allocation31], 1 }
0x1b94   :  { %5364 = vsyncpa [#allocation31 + $0x1], 1 }
0x1b95   :  { %5365 = vsyncpa [#allocation5], 1 }
0x1b96   :  { %5367 = vsyncpa [#allocation5 + $0x1], 1 }

</bundles_post_ra>
